<compile_context>
chip_gen: v5e
topology: v5e:2x2
jax: 0.10.0
libtpu: 0.0.40
codegen_flags: <defaults>
</compile_context>

<pallas_src>
import math

import jax
import jax.numpy as jnp
from jax.experimental import pallas as pl
from jax.experimental.pallas import tpu as pltpu

_BOTTLENECK = 512


def _round_up(x, m):
    return (x + m - 1) // m * m


def _max_batch_tile():
    # v6e / v7x MXUs are 256-wide -> prefer M=256 tiles; older generations keep 128.
    try:
        kind = jax.devices()[0].device_kind.lower()
    except Exception:
        return 128
    if any(tag in kind for tag in ("v2", "v3", "v4", "v5")):
        return 128
    return 256


def _const_spec(block_shape):
    """BlockSpec for a grid-invariant operand, single-buffered when supported."""
    idx = lambda i: (0, 0)
    buffered = getattr(pl, "Buffered", None)
    if buffered is not None:
        try:
            return pl.BlockSpec(block_shape, idx, pipeline_mode=buffered(1))
        except TypeError:
            pass
    return pl.BlockSpec(block_shape, idx)


# ---------------------------------------------------------------------------
# Fused ClassBlock kernel: Linear(3072->512, BN folded) -> LeakyReLU -> Linear(512->C_pad)
# ---------------------------------------------------------------------------
def _classblock_kernel(f0_ref, f1_ref, w1a_ref, w1b_ref, w2_ref, bias_ref,
                       logits_ref, bneck_ref):
    # Concatenated-feature matmul done as two partial matmuls (avoids materializing
    # the (B, 3072) concat):  h = [f0, f1] @ w1 + b1'   (BN already folded into w1/b1').
    h = jnp.dot(f0_ref[...], w1a_ref[...], preferred_element_type=jnp.float32)
    h = h + jnp.dot(f1_ref[...], w1b_ref[...], preferred_element_type=jnp.float32)
    h = h + bias_ref[:, :_BOTTLENECK]

    # LeakyReLU(negative_slope=0.1): single max instead of compare+select.
    h = jnp.maximum(h, 0.1 * h)

    # Dropout(p=0.5): identity at inference.
    bneck_ref[...] = h                              # add_block output (second return value)

    # classifier: Linear(512 -> class_num), computed into a lane-dense padded slab.
    logits = jnp.dot(h.astype(jnp.bfloat16), w2_ref[...],
                     preferred_element_type=jnp.float32)
    logits_ref[...] = logits + bias_ref[:, _BOTTLENECK:]


# ---------------------------------------------------------------------------
# Wrapper: global-avg-pool (XLA fused reduce) + batched Pallas ClassBlock
# ---------------------------------------------------------------------------
def ft_net_middle_head(x3_nchw, x4_nchw, params):
    """x3_nchw: layer3 output (B, 1024, H3, W3); x4_nchw: layer4 output (B, 2048, H4, W4).

    Returns [logits (B, class_num), bottleneck_features (B, 512)] like the PyTorch forward.
    """
    B = x3_nchw.shape[0]
    assert x3_nchw.shape[1] == 1024 and x4_nchw.shape[1] == 2048

    # AdaptiveAvgPool2d((1,1)) + squeeze, as a fused XLA reduce over NCHW with the bf16
    # cast fused in (no transposed / re-cast tensor is written to HBM).
    f0 = jnp.mean(x3_nchw, axis=(2, 3)).astype(jnp.bfloat16)     # (B, 1024)
    f1 = jnp.mean(x4_nchw, axis=(2, 3)).astype(jnp.bfloat16)     # (B, 2048)

    # Batch tiling: multiples of 16 (bf16 (16,128) packing), capped per-generation, and
    # >= 2 grid steps whenever B > 16 so the "parallel" axis shards over v7x's 2 TCs.
    tb_cap = _max_batch_tile()
    b16 = _round_up(B, 16)
    if b16 <= 16:
        tb = 16
    else:
        nsteps = max(2, -(-b16 // tb_cap))
        tb = _round_up(-(-b16 // nsteps), 16)
    b_pad = _round_up(b16, tb)
    nb = b_pad // tb

    if b_pad != B:
        f0 = jnp.pad(f0, ((0, b_pad - B), (0, 0)))
        f1 = jnp.pad(f1, ((0, b_pad - B), (0, 0)))

    w1a, w1b, w2, bias = params["w1a"], params["w1b"], params["w2"], params["bias"]
    class_num = params["class_num"]
    c_pad = w2.shape[1]

    grid_spec = pltpu.PrefetchScalarGridSpec(
        num_scalar_prefetch=0,
        grid=(nb,),
        in_specs=[
            pl.BlockSpec((tb, 1024), lambda i: (i, 0)),                  # f0 tile
            pl.BlockSpec((tb, 2048), lambda i: (i, 0)),                  # f1 tile
            _const_spec((1024, _BOTTLENECK)),                            # w1a (grid-invariant)
            _const_spec((2048, _BOTTLENECK)),                            # w1b (grid-invariant)
            _const_spec((_BOTTLENECK, c_pad)),                           # w2  (padded, invariant)
            _const_spec((1, _BOTTLENECK + c_pad)),                       # packed biases
        ],
        out_specs=[
            pl.BlockSpec((tb, c_pad), lambda i: (i, 0)),                 # logits (padded)
            pl.BlockSpec((tb, _BOTTLENECK), lambda i: (i, 0)),           # bottleneck feat
        ],
    )

    logits_pad, bneck_pad = pl.pallas_call(
        _classblock_kernel,
        out_shape=(
            jax.ShapeDtypeStruct((b_pad, c_pad), jnp.float32),
            jax.ShapeDtypeStruct((b_pad, _BOTTLENECK), jnp.float32),
        ),
        grid_spec=grid_spec,
        compiler_params=pltpu.CompilerParams(
            dimension_semantics=("parallel",),
            vmem_limit_bytes=32 * 1024 * 1024,
        ),
    )(f0, f1, w1a, w1b, w2, bias)

    return [logits_pad[:B, :class_num], bneck_pad[:B]]


# ---------------------------------------------------------------------------
# Deterministic parameter init (mirrors weights_init_kaiming / weights_init_classifier),
# with one-time BN folding, logits-width padding and bf16 weight casts.
# ---------------------------------------------------------------------------
def init_params(class_num, key):
    k1, k2, k3 = jax.random.split(key, 3)
    input_dim, bottleneck = 2048 + 1024, _BOTTLENECK

    # add_block Linear(3072 -> 512): kaiming_normal, a=0, mode='fan_out'
    # PyTorch weight shape (out, in) -> fan_out = out = 512; stored transposed (in, out).
    std1 = math.sqrt(2.0 / bottleneck)
    w1 = std1 * jax.random.normal(k1, (input_dim, bottleneck), jnp.float32)
    b1 = jnp.zeros((bottleneck,), jnp.float32)

    # BatchNorm1d(512): weight ~ N(1, 0.02), bias = 0; running stats at init (mean 0, var 1).
    # TODO(synk): with pretrained weights, fold the actual running_mean/running_var here.
    gamma = 1.0 + 0.02 * jax.random.normal(k2, (bottleneck,), jnp.float32)
    beta = jnp.zeros((bottleneck,), jnp.float32)
    eps = 1e-5

    # Fold eval-mode BN into the first Linear (one-time constant folding).
    scale = gamma * jax.lax.rsqrt(jnp.float32(1.0 + eps))   # running_var = 1
    w1_f = w1 * scale[None, :]
    b1_f = b1 * scale + beta                                # running_mean = 0

    # classifier Linear(512 -> class_num): normal std=0.001, bias 0; stored transposed.
    w2 = 0.001 * jax.random.normal(k3, (bottleneck, class_num), jnp.float32)
    b2 = jnp.zeros((class_num,), jnp.float32)

    # Pad classifier width to a lane-dense multiple of 128; pack the two bias vectors
    # into a single small VMEM operand.
    c_pad = _round_up(class_num, 128)
    w2_p = jnp.zeros((bottleneck, c_pad), jnp.float32).at[:, :class_num].set(w2)
    b2_p = jnp.zeros((c_pad,), jnp.float32).at[:class_num].set(b2)
    bias = jnp.concatenate([b1_f, b2_p])[None, :]           # (1, 512 + c_pad) f32

    return {
        "w1a": w1_f[:1024].astype(jnp.bfloat16),   # rows multiplying the layer3 pooled feature
        "w1b": w1_f[1024:].astype(jnp.bfloat16),   # rows multiplying the layer4 pooled feature
        "w2": w2_p.astype(jnp.bfloat16),
        "bias": bias,
        "class_num": class_num,
    }


if __name__ == "__main__":
    key = jax.random.PRNGKey(0)
    k_x3, k_x4, k_p = jax.random.split(key, 3)

    B, class_num = 2, 16
    # Small trunk feature maps (layer3: 1024 channels, layer4: 2048 channels, half spatial).
    x3 = jax.random.normal(k_x3, (B, 1024, 8, 4), jnp.float32)   # NCHW, like PyTorch
    x4 = jax.random.normal(k_x4, (B, 2048, 4, 2), jnp.float32)

    params = init_params(class_num, k_p)

    logits, bneck = ft_net_middle_head(x3, x4, params)
    jax.block_until_ready((logits, bneck))

    assert logits.shape == (B, class_num)
    assert bneck.shape == (B, _BOTTLENECK)
    assert bool(jnp.all(jnp.isfinite(logits))) and bool(jnp.all(jnp.isfinite(bneck)))
    print("KERNEL_OK")
</pallas_src>

<mosaic_0001>
module attributes {stable_mosaic.version = 11 : i64} {
  func.func @_classblock_kernel(%arg0: i32, %arg1: memref<16x1024xbf16, #tpu.memory_space<vmem>>, %arg2: memref<16x2048xbf16, #tpu.memory_space<vmem>>, %arg3: memref<1024x512xbf16, #tpu.memory_space<vmem>>, %arg4: memref<2048x512xbf16, #tpu.memory_space<vmem>>, %arg5: memref<512x128xbf16, #tpu.memory_space<vmem>>, %arg6: memref<1x640xf32, #tpu.memory_space<vmem>>, %arg7: memref<16x128xf32, #tpu.memory_space<vmem>>, %arg8: memref<16x512xf32, #tpu.memory_space<vmem>>) attributes {dimension_semantics = [#tpu.dimension_semantics<parallel>], iteration_bounds = array<i64: 1>, scalar_prefetch = 0 : i64, scratch_operands = 0 : i64, tpu.core_type = #tpu.core_type<tc>, window_params = [{transform_indices = @transform_0, window_bounds = array<i64: 16, 1024>}, {transform_indices = @transform_1, window_bounds = array<i64: 16, 2048>}, {pipeline_mode = #tpu.pipeline_mode<synchronous>, transform_indices = @transform_2, window_bounds = array<i64: 1024, 512>}, {pipeline_mode = #tpu.pipeline_mode<synchronous>, transform_indices = @transform_3, window_bounds = array<i64: 2048, 512>}, {pipeline_mode = #tpu.pipeline_mode<synchronous>, transform_indices = @transform_4, window_bounds = array<i64: 512, 128>}, {pipeline_mode = #tpu.pipeline_mode<synchronous>, transform_indices = @transform_5, window_bounds = array<i64: 1, 640>}, {transform_indices = @transform_6, window_bounds = array<i64: 16, 128>}, {transform_indices = @transform_7, window_bounds = array<i64: 16, 512>}]} {
    %c0 = arith.constant 0 : index
    %c0_0 = arith.constant 0 : index
    %0 = vector.load %arg1[%c0, %c0_0] : memref<16x1024xbf16, #tpu.memory_space<vmem>>, vector<16x1024xbf16>
    %c0_1 = arith.constant 0 : index
    %c0_2 = arith.constant 0 : index
    %1 = vector.load %arg3[%c0_1, %c0_2] : memref<1024x512xbf16, #tpu.memory_space<vmem>>, vector<1024x512xbf16>
    %cst = arith.constant dense<0.000000e+00> : vector<16x512xf32>
    %2 = tpu.matmul %0, %1, %cst {dimension_numbers = #tpu.dot_dimension_numbers<[1], [0], [0], [1], [0, 0, 1, 1], [], []>} : vector<16x1024xbf16>, vector<1024x512xbf16>, vector<16x512xf32> -> vector<16x512xf32>
    %c0_3 = arith.constant 0 : index
    %c0_4 = arith.constant 0 : index
    %3 = vector.load %arg2[%c0_3, %c0_4] : memref<16x2048xbf16, #tpu.memory_space<vmem>>, vector<16x2048xbf16>
    %c0_5 = arith.constant 0 : index
    %c0_6 = arith.constant 0 : index
    %4 = vector.load %arg4[%c0_5, %c0_6] : memref<2048x512xbf16, #tpu.memory_space<vmem>>, vector<2048x512xbf16>
    %cst_7 = arith.constant dense<0.000000e+00> : vector<16x512xf32>
    %5 = tpu.matmul %3, %4, %cst_7 {dimension_numbers = #tpu.dot_dimension_numbers<[1], [0], [0], [1], [0, 0, 1, 1], [], []>} : vector<16x2048xbf16>, vector<2048x512xbf16>, vector<16x512xf32> -> vector<16x512xf32>
    %6 = arith.addf %2, %5 : vector<16x512xf32>
    %c0_8 = arith.constant 0 : index
    %c0_9 = arith.constant 0 : index
    %7 = vector.load %arg6[%c0_8, %c0_9] : memref<1x640xf32, #tpu.memory_space<vmem>>, vector<1x512xf32>
    %8 = vector.broadcast %7 : vector<1x512xf32> to vector<16x512xf32>
    %9 = arith.addf %6, %8 : vector<16x512xf32>
    %cst_10 = arith.constant 1.000000e-01 : f32
    %10 = vector.broadcast %cst_10 : f32 to vector<16x512xf32>
    %11 = arith.mulf %10, %9 : vector<16x512xf32>
    %12 = arith.maximumf %9, %11 : vector<16x512xf32>
    %c0_11 = arith.constant 0 : index
    %c0_12 = arith.constant 0 : index
    %13 = vector.load %arg8[%c0_11, %c0_12] : memref<16x512xf32, #tpu.memory_space<vmem>>, vector<16x512xf32>
    tpu.vector_store %arg8[%c0_11, %c0_12], %12 {strides = array<i32>} : memref<16x512xf32, #tpu.memory_space<vmem>>, vector<16x512xf32>,
    %14 = arith.truncf %12 : vector<16x512xf32> to vector<16x512xbf16>
    %c0_13 = arith.constant 0 : index
    %c0_14 = arith.constant 0 : index
    %15 = vector.load %arg5[%c0_13, %c0_14] : memref<512x128xbf16, #tpu.memory_space<vmem>>, vector<512x128xbf16>
    %cst_15 = arith.constant dense<0.000000e+00> : vector<16x128xf32>
    %16 = tpu.matmul %14, %15, %cst_15 {dimension_numbers = #tpu.dot_dimension_numbers<[1], [0], [0], [1], [0, 0, 1, 1], [], []>} : vector<16x512xbf16>, vector<512x128xbf16>, vector<16x128xf32> -> vector<16x128xf32>
    %c0_16 = arith.constant 0 : index
    %c512 = arith.constant 512 : index
    %17 = vector.load %arg6[%c0_16, %c512] : memref<1x640xf32, #tpu.memory_space<vmem>>, vector<1x128xf32>
    %18 = vector.broadcast %17 : vector<1x128xf32> to vector<16x128xf32>
    %19 = arith.addf %16, %18 : vector<16x128xf32>
    %c0_17 = arith.constant 0 : index
    %c0_18 = arith.constant 0 : index
    %20 = vector.load %arg7[%c0_17, %c0_18] : memref<16x128xf32, #tpu.memory_space<vmem>>, vector<16x128xf32>
    tpu.vector_store %arg7[%c0_17, %c0_18], %19 {strides = array<i32>} : memref<16x128xf32, #tpu.memory_space<vmem>>, vector<16x128xf32>,
    return
  }
  func.func @transform_0(%arg0: i32) -> (i32, i32) {
    %c0_i32 = arith.constant 0 : i32
    %c0_i32_0 = arith.constant 0 : i32
    return %arg0, %c0_i32 : i32, i32
  }
  func.func @transform_1(%arg0: i32) -> (i32, i32) {
    %c0_i32 = arith.constant 0 : i32
    %c0_i32_0 = arith.constant 0 : i32
    return %arg0, %c0_i32 : i32, i32
  }
  func.func @transform_2(%arg0: i32) -> (i32, i32) {
    %c0_i32 = arith.constant 0 : i32
    %c0_i32_0 = arith.constant 0 : i32
    %c0_i32_1 = arith.constant 0 : i32
    return %c0_i32, %c0_i32_0 : i32, i32
  }
  func.func @transform_3(%arg0: i32) -> (i32, i32) {
    %c0_i32 = arith.constant 0 : i32
    %c0_i32_0 = arith.constant 0 : i32
    %c0_i32_1 = arith.constant 0 : i32
    return %c0_i32, %c0_i32_0 : i32, i32
  }
  func.func @transform_4(%arg0: i32) -> (i32, i32) {
    %c0_i32 = arith.constant 0 : i32
    %c0_i32_0 = arith.constant 0 : i32
    %c0_i32_1 = arith.constant 0 : i32
    return %c0_i32, %c0_i32_0 : i32, i32
  }
  func.func @transform_5(%arg0: i32) -> (i32, i32) {
    %c0_i32 = arith.constant 0 : i32
    %c0_i32_0 = arith.constant 0 : i32
    %c0_i32_1 = arith.constant 0 : i32
    return %c0_i32, %c0_i32_0 : i32, i32
  }
  func.func @transform_6(%arg0: i32) -> (i32, i32) {
    %c0_i32 = arith.constant 0 : i32
    %c0_i32_0 = arith.constant 0 : i32
    return %arg0, %c0_i32 : i32, i32
  }
  func.func @transform_7(%arg0: i32) -> (i32, i32) {
    %c0_i32 = arith.constant 0 : i32
    %c0_i32_0 = arith.constant 0 : i32
    return %arg0, %c0_i32 : i32, i32
  }
}

</mosaic_0001>

<bundles_post_ra>
// kernel: tpu_custom_call.1
= control target key start
LH: loop header
LB: loop body
LE: loop exit
PB: predicated region body
PF: predicated region fallthrough
CT: control target
= control target key end

     0   :  { %13 = vsyncpa [#allocation3], 0  ;;  %s11414_s0 = inlined_call_operand.hbm [shape: bf16[16,1024], index: 0, kind: input, shape index: {}]   ;;  %s11415_s1 = inlined_call_operand.hbm [shape: bf16[16,2048], index: 1, kind: input, shape index: {}]   ;;  %s11416_s2 = inlined_call_operand.hbm [shape: bf16[1024,512], index: 2, kind: input, shape index: {}]   ;;  %s11417_s3 = inlined_call_operand.hbm [shape: bf16[2048,512], index: 3, kind: input, shape index: {}]   ;;  %s11418_s4 = inlined_call_operand.hbm [shape: bf16[512,128], index: 4, kind: input, shape index: {}]   ;;  %s11419_s5 = inlined_call_operand.hbm [shape: f32[1,640], index: 5, kind: input, shape index: {}]   ;;  %s11420_s6 = inlined_call_operand.hbm [shape: f32[16,128], index: 6, kind: output, shape index: {0}]   ;;  %s11421_s7 = inlined_call_operand.hbm [shape: f32[16,512], index: 7, kind: output, shape index: {1}]  }
   0x1   :  { %14 = vsyncpa [#allocation6], 0 }
   0x2   :  { %15 = vsyncpa [#allocation9], 0 }
   0x3   :  { %16 = vsyncpa [#allocation12], 0 }
   0x4   :  { %17 = vsyncpa [#allocation4], 0  ;;  %s36_s26 = sshll.u32 %s11415_s1, 4  ;;  %s37_s26 = int_to_ptr.hbm [resolvable:$true] %s36_s26 }
   0x5   :  { %18 = vsyncpa [#allocation15], 0  ;;  %s10961_s27 = smov [#allocation5]   ;;  %s10962_s29 = smov 1024  }
   0x6   :  { %s38_s28 = sshll.u32 %s10961_s27, 4  ;;  %s10963_s30 = smov 64   ;;  %s39_s28 = int_to_ptr.vmem [resolvable:$true] %s38_s28 }
   0x7   :  { %44 = dma.hbm_to_vmem [thread:$0]  %s37_s26, 2048, %s39_s28, [#allocation6], %s10962_s29, %s10962_s29, %s10963_s30  }
   0x8   :  { %s62_s10 = sshll.u32 %s11417_s3, 4  ;;  %s10964_s11 = smov [#allocation8]   ;;  %s63_s10 = int_to_ptr.hbm [resolvable:$true] %s62_s10 }
   0x9   :  { %s64_s12 = sshll.u32 %s10964_s11, 4  ;;  %s23_s1 = sshll.u32 %s11414_s0, 4  ;;  %s65_s12 = int_to_ptr.vmem [resolvable:$true] %s64_s12  ;;  %s24_s1 = int_to_ptr.hbm [resolvable:$true] %s23_s1 }
   0xa   :  { %s10965_s15 = smov 256   ;;  %s10966_s16 = smov 16  }
   0xb   :  { %70 = dma.hbm_to_vmem [thread:$0]  %s63_s10, 65536, %s65_s12, [#allocation9], %s10965_s15, %s10965_s15, %s10966_s16  }
   0xc   :  { %s10967_s17 = smov [#allocation2]   ;;  %s49_s21 = sshll.u32 %s11416_s2, 4  ;;  %s50_s21 = int_to_ptr.hbm [resolvable:$true] %s49_s21 }
   0xd   :  { %s25_s18 = sshll.u32 %s10967_s17, 4  ;;  %s10968_s3 = smov 512   ;;  %s26_s18 = int_to_ptr.vmem [resolvable:$true] %s25_s18 }
   0xe   :  { %s10969_s22 = smov 32   ;;  %s10970_s0 = smov [#allocation7]  }
   0xf   :  { %31 = dma.hbm_to_vmem [thread:$0]  %s24_s1, 1024, %s26_s18, [#allocation3], %s10968_s3, %s10968_s3, %s10969_s22  }
  0x10   :  { %s51_s23 = sshll.u32 %s10970_s0, 4  ;;  %s75_s26 = sshll.u32 %s11418_s4, 4  ;;  %s52_s23 = int_to_ptr.vmem [resolvable:$true] %s51_s23  ;;  %s76_s26 = int_to_ptr.hbm [resolvable:$true] %s75_s26 }
  0x11   :  { %57 = dma.hbm_to_vmem [thread:$0]  %s50_s21, 32768, %s52_s23, [#allocation6], %s10965_s15, %s10965_s15, %s10966_s16  }
  0x12   :  { %s10971_s27 = smov [#allocation10]   ;;  %s89_s8 = sshll.u32 %s11419_s5, 4  ;;  %s90_s8 = int_to_ptr.hbm [resolvable:$true] %s89_s8 }
  0x13   :  { %s77_s28 = sshll.u32 %s10971_s27, 4  ;;  %s10972_s9 = smov 4   ;;  %s78_s28 = int_to_ptr.vmem [resolvable:$true] %s77_s28 }
  0x14   :  { %83 = dma.hbm_to_vmem [thread:$0]  %s76_s26, 4096, %s78_s28, [#allocation9], %s10963_s30, %s10963_s30, %s10972_s9  }
  0x15   :  { %s10973_s10 = smov [#allocation11]  }
  0x16   :  { %s91_s11 = sshll.u32 %s10973_s10, 4  ;;  %s92_s11 = int_to_ptr.vmem [resolvable:$true] %s91_s11 }
  0x17   :  { %94 = dma.hbm_to_vmem [thread:$0]  %s90_s8, 80, %s92_s11, [#allocation12]  }
  0x18   :  { %10949 = dma.done.wait [#allocation3], 1024  }
  0x19   :  { %10950 = vsyncadd [#allocation3], 4294966272 }
  0x1a   :  { %10951 = dma.done.wait [#allocation6], 34816  }
  0x1b   :  { %10952 = vsyncadd [#allocation6], 4294932480 }
  0x1c   :  { %10953 = dma.done.wait [#allocation9], 69632  }
  0x1d   :  { %10954 = vsyncadd [#allocation9], 4294897664 }
  0x1e   :  { %10955 = dma.done.wait [#allocation12], 80  }
  0x1f   :  { %10956 = vsyncadd [#allocation12], 4294967216  ;;  %v6797_v0 = vld [vmem:[#allocation8 + $0xe0] sm:$0xf]  ;;  %v10225_v1 = vld [vmem:[#allocation8 + $0xec] sm:$0xf0] }
  0x20   :  { %v6925_v2 = vld [vmem:[#allocation8 + $0x1e0] sm:$0xf]  ;;  %v6798_v3 = vor.u32 %v10225_v1, %v6797_v0  ;;  %v10257_v4 = vld [vmem:[#allocation8 + $0x1ec] sm:$0xf0]  ;;  %s10974_s4 = smov [#allocation14]   ;;  %s6598_s13 = sshll.u32 %s11421_s7, 4  ;;  %s6599_s13 = int_to_ptr.hbm [resolvable:$true] %s6598_s13 }
  0x21   :  { %v7053_v5 = vld [vmem:[#allocation8 + $0x2e0] sm:$0xf]  ;;  %v10289_v6 = vld [vmem:[#allocation8 + $0x2ec] sm:$0xf0]  ;;  %v6926_v7 = vor.u32 %v10257_v4, %v6925_v2  ;;  %s6596_s5 = sshll.u32 %s10974_s4, 4  ;;  %s10975_s7 = smov [#allocation13]   ;;  %s6597_s5 = int_to_ptr.vmem [resolvable:$true] %s6596_s5 }
  0x22   :  { %v7054_v8 = vor.u32 %v10289_v6, %v7053_v5  ;;  %v7181_v9 = vld [vmem:[#allocation8 + $0x3e0] sm:$0xf]  ;;  %v10321_v10 = vld [vmem:[#allocation8 + $0x3ec] sm:$0xf0]  ;;  %3551 = vmatpush.bf16.msra.mxu0 %v6798_v3  ;;  %s6583_s14 = sshll.u32 %s10975_s7, 4  ;;  %s6585_s16 = sshll.u32 %s11420_s6, 4  ;;  %s6584_s14 = int_to_ptr.vmem [resolvable:$true] %s6583_s14  ;;  %s6586_s16 = int_to_ptr.hbm [resolvable:$true] %s6585_s16 }
  0x23   :  { %v6781_v11 = vld [vmem:[#allocation8 + $0xc0] sm:$0xf]  ;;  %v7182_v12 = vor.u32 %v10321_v10, %v7181_v9  ;;  %v10221_v13 = vld [vmem:[#allocation8 + $0xcc] sm:$0xf0]  ;;  %3565 = vmatpush.bf16.msra.mxu1 %v6926_v7  ;;  %s10976_s17 = smov 128   ;;  %s10977_s18 = smov 8  }
  0x24   :  { %v6909_v14 = vld [vmem:[#allocation8 + $0x1c0] sm:$0xf]  ;;  %v10253_v15 = vld [vmem:[#allocation8 + $0x1cc] sm:$0xf0]  ;;  %3579 = vmatpush.bf16.msra.mxu2 %v7054_v8  ;;  %v6782_v16 = vor.u32 %v10221_v13, %v6781_v11 }
  0x25   :  { %v6910_v17 = vor.u32 %v10253_v15, %v6909_v14  ;;  %v7037_v18 = vld [vmem:[#allocation8 + $0x2c0] sm:$0xf]  ;;  %v10285_v19 = vld [vmem:[#allocation8 + $0x2cc] sm:$0xf0]  ;;  %3593 = vmatpush.bf16.msra.mxu3 %v7182_v12 }
  0x26   :  { %v7165_v20 = vld [vmem:[#allocation8 + $0x3c0] sm:$0xf]  ;;  %v7038_v21 = vor.u32 %v10285_v19, %v7037_v18  ;;  %v10317_v22 = vld [vmem:[#allocation8 + $0x3cc] sm:$0xf0]  ;;  %3552 = vmatpush.bf16.msra.mxu0 %v6782_v16 }
  0x27   :  { %v6765_v23 = vld [vmem:[#allocation8 + $0xa0] sm:$0xf]  ;;  %v10217_v24 = vld [vmem:[#allocation8 + $0xac] sm:$0xf0]  ;;  %v7166_v25 = vor.u32 %v10317_v22, %v7165_v20  ;;  %3566 = vmatpush.bf16.msra.mxu1 %v6910_v17 }
  0x28   :  { %v6893_v26 = vld [vmem:[#allocation8 + $0x1a0] sm:$0xf]  ;;  %v10249_v27 = vld [vmem:[#allocation8 + $0x1ac] sm:$0xf0]  ;;  %v6766_v29 = vor.u32 %v10217_v24, %v6765_v23  ;;  %3580 = vmatpush.bf16.msra.mxu2 %v7038_v21 }
  0x29   :  { %v7021_v28 = vld [vmem:[#allocation8 + $0x2a0] sm:$0xf]  ;;  %v10281_v30 = vld [vmem:[#allocation8 + $0x2ac] sm:$0xf0]  ;;  %v6894_v33 = vor.u32 %v10249_v27, %v6893_v26  ;;  %3594 = vmatpush.bf16.msra.mxu3 %v7166_v25 }
  0x2a   :  { %v7149_v31 = vld [vmem:[#allocation8 + $0x3a0] sm:$0xf]  ;;  %v10313_v32 = vld [vmem:[#allocation8 + $0x3ac] sm:$0xf0]  ;;  %v7022_v34 = vor.u32 %v10281_v30, %v7021_v28  ;;  %3553 = vmatpush.bf16.msra.mxu0 %v6766_v29 }
  0x2b   :  { %v6749_v35 = vld [vmem:[#allocation8 + $0x80] sm:$0xf]  ;;  %v10213_v36 = vld [vmem:[#allocation8 + $0x8c] sm:$0xf0]  ;;  %v7150_v38 = vor.u32 %v10313_v32, %v7149_v31  ;;  %3567 = vmatpush.bf16.msra.mxu1 %v6894_v33 }
  0x2c   :  { %v6877_v37 = vld [vmem:[#allocation8 + $0x180] sm:$0xf]  ;;  %v10245_v39 = vld [vmem:[#allocation8 + $0x18c] sm:$0xf0]  ;;  %v6750_v44 = vor.u32 %v10213_v36, %v6749_v35  ;;  %3581 = vmatpush.bf16.msra.mxu2 %v7022_v34 }
  0x2d   :  { %v7005_v40 = vld [vmem:[#allocation8 + $0x280] sm:$0xf]  ;;  %v10277_v41 = vld [vmem:[#allocation8 + $0x28c] sm:$0xf0]  ;;  %v6878_v45 = vor.u32 %v10245_v39, %v6877_v37  ;;  %3595 = vmatpush.bf16.msra.mxu3 %v7150_v38 }
  0x2e   :  { %v7133_v42 = vld [vmem:[#allocation8 + $0x380] sm:$0xf]  ;;  %v10309_v43 = vld [vmem:[#allocation8 + $0x38c] sm:$0xf0]  ;;  %v7006_v46 = vor.u32 %v10277_v41, %v7005_v40  ;;  %3554 = vmatpush.bf16.msra.mxu0 %v6750_v44 }
  0x2f   :  { %v6733_v47 = vld [vmem:[#allocation8 + $0x60] sm:$0xf]  ;;  %v10209_v48 = vld [vmem:[#allocation8 + $0x6c] sm:$0xf0]  ;;  %v7134_v50 = vor.u32 %v10309_v43, %v7133_v42  ;;  %3568 = vmatpush.bf16.msra.mxu1 %v6878_v45 }
  0x30   :  { %v6861_v49 = vld [vmem:[#allocation8 + $0x160] sm:$0xf]  ;;  %v10241_v51 = vld [vmem:[#allocation8 + $0x16c] sm:$0xf0]  ;;  %v6734_v56 = vor.u32 %v10209_v48, %v6733_v47  ;;  %3582 = vmatpush.bf16.msra.mxu2 %v7006_v46 }
  0x31   :  { %v6989_v52 = vld [vmem:[#allocation8 + $0x260] sm:$0xf]  ;;  %v10273_v53 = vld [vmem:[#allocation8 + $0x26c] sm:$0xf0]  ;;  %v6862_v57 = vor.u32 %v10241_v51, %v6861_v49  ;;  %3596 = vmatpush.bf16.msra.mxu3 %v7134_v50 }
  0x32   :  { %v7117_v54 = vld [vmem:[#allocation8 + $0x360] sm:$0xf]  ;;  %v10305_v55 = vld [vmem:[#allocation8 + $0x36c] sm:$0xf0]  ;;  %v6990_v58 = vor.u32 %v10273_v53, %v6989_v52  ;;  %3555 = vmatpush.bf16.msra.mxu0 %v6734_v56 }
  0x33   :  { %v6717_v59 = vld [vmem:[#allocation8 + $0x40] sm:$0xf]  ;;  %v10205_v60 = vld [vmem:[#allocation8 + $0x4c] sm:$0xf0]  ;;  %v7118_v62 = vor.u32 %v10305_v55, %v7117_v54  ;;  %3569 = vmatpush.bf16.msra.mxu1 %v6862_v57  ;;  %v6629_v54 = vld [vmem:[#allocation5 + $0x8] sm:$0xf] }
  0x34   :  { %v6845_v61 = vld [vmem:[#allocation8 + $0x140] sm:$0xf]  ;;  %v10237_v63 = vld [vmem:[#allocation8 + $0x14c] sm:$0xf0]  ;;  %v6718_v4 = vor.u32 %v10205_v60, %v6717_v59  ;;  %3583 = vmatpush.bf16.msra.mxu2 %v6990_v58  ;;  %v10188_v59 = vld [vmem:[#allocation5 + $0x44] sm:$0xf0] }
  0x35   :  { %v6973_v0 = vld [vmem:[#allocation8 + $0x240] sm:$0xf]  ;;  %v10269_v1 = vld [vmem:[#allocation8 + $0x24c] sm:$0xf0]  ;;  %v6846_v5 = vor.u32 %v10237_v63, %v6845_v61  ;;  %3597 = vmatpush.bf16.msra.mxu3 %v7118_v62 }
  0x36   :  { %v7101_v2 = vld [vmem:[#allocation8 + $0x340] sm:$0xf]  ;;  %v10301_v3 = vld [vmem:[#allocation8 + $0x34c] sm:$0xf0]  ;;  %v6974_v6 = vor.u32 %v10269_v1, %v6973_v0  ;;  %3556 = vmatpush.bf16.msra.mxu0 %v6718_v4  ;;  %v11044_v1 = vor.u32 %v10188_v59, %v6629_v54 }
  0x37   :  { %v6701_v7 = vld [vmem:[#allocation8 + $0x20] sm:$0xf]  ;;  %v10201_v8 = vld [vmem:[#allocation8 + $0x2c] sm:$0xf0]  ;;  %v7102_v10 = vor.u32 %v10301_v3, %v7101_v2  ;;  %3570 = vmatpush.bf16.msra.mxu1 %v6846_v5 }
  0x38   :  { %v6829_v9 = vld [vmem:[#allocation8 + $0x120] sm:$0xf]  ;;  %v10233_v11 = vld [vmem:[#allocation8 + $0x12c] sm:$0xf0]  ;;  %v6702_v16 = vor.u32 %v10201_v8, %v6701_v7  ;;  %3584 = vmatpush.bf16.msra.mxu2 %v6974_v6  ;;  %v10179_v6 = vld [vmem:[#allocation5 + $0x4] sm:$0xf] }
  0x39   :  { %v6957_v12 = vld [vmem:[#allocation8 + $0x220] sm:$0xf]  ;;  %v10265_v13 = vld [vmem:[#allocation8 + $0x22c] sm:$0xf0]  ;;  %v6830_v19 = vor.u32 %v10233_v11, %v6829_v9  ;;  %3598 = vmatpush.bf16.msra.mxu3 %v7102_v10  ;;  %v6623_v7 = vld [vmem:[#allocation5 + $0x40] sm:$0xf0] }
  0x3a   :  { %v7085_v14 = vld [vmem:[#allocation8 + $0x320] sm:$0xf]  ;;  %v10297_v15 = vld [vmem:[#allocation8 + $0x32c] sm:$0xf0]  ;;  %v6958_v20 = vor.u32 %v10265_v13, %v6957_v12  ;;  %3557 = vmatpush.bf16.msra.mxu0 %v6702_v16  ;;  %v10180_v8 = vld [vmem:[#allocation5 + $0xc] sm:$0xf]  ;;  %v11048_v10 = vor.u32 %v10179_v6, %v6623_v7 }
  0x3b   :  { %v6685_v17 = vld [vmem:[#allocation8] sm:$0xf]  ;;  %v10197_v18 = vld [vmem:[#allocation8 + $0xc] sm:$0xf0]  ;;  %v7086_v24 = vor.u32 %v10297_v15, %v7085_v14  ;;  %3571 = vmatpush.bf16.msra.mxu1 %v6830_v19  ;;  %v6631_v11 = vld [vmem:[#allocation5 + $0x48] sm:$0xf0] }
  0x3c   :  { %v6813_v21 = vld [vmem:[#allocation8 + $0x100] sm:$0xf]  ;;  %v10229_v22 = vld [vmem:[#allocation8 + $0x10c] sm:$0xf0]  ;;  %v6686_v31 = vor.u32 %v10197_v18, %v6685_v17  ;;  %3585 = vmatpush.bf16.msra.mxu2 %v6958_v20  ;;  %v11050_v17 = vor.u32 %v10180_v8, %v6631_v11 }
  0x3d   :  { %v6941_v23 = vld [vmem:[#allocation8 + $0x200] sm:$0xf]  ;;  %v10261_v25 = vld [vmem:[#allocation8 + $0x20c] sm:$0xf0]  ;;  %v6814_v35 = vor.u32 %v10229_v22, %v6813_v21  ;;  %3599 = vmatpush.bf16.msra.mxu3 %v7086_v24 }
  0x3e   :  { %v7069_v26 = vld [vmem:[#allocation8 + $0x300] sm:$0xf]  ;;  %v10293_v27 = vld [vmem:[#allocation8 + $0x30c] sm:$0xf0]  ;;  %v6942_v36 = vor.u32 %v10261_v25, %v6941_v23  ;;  %3558 = vmatpush.bf16.msra.mxu0 %v6686_v31 }
  0x3f   :  { %v7309_v28 = vld [vmem:[#allocation8 + $0x4e0] sm:$0xf]  ;;  %v10353_v29 = vld [vmem:[#allocation8 + $0x4ec] sm:$0xf0]  ;;  %v7070_v39 = vor.u32 %v10293_v27, %v7069_v26  ;;  %3572 = vmatpush.bf16.msra.mxu1 %v6814_v35 }
  0x40   :  { %v7437_v30 = vld [vmem:[#allocation8 + $0x5e0] sm:$0xf]  ;;  %v10385_v32 = vld [vmem:[#allocation8 + $0x5ec] sm:$0xf0]  ;;  %v7310_v40 = vor.u32 %v10353_v29, %v7309_v28  ;;  %3586 = vmatpush.bf16.msra.mxu2 %v6942_v36 }
  0x41   :  { %v7565_v33 = vld [vmem:[#allocation8 + $0x6e0] sm:$0xf]  ;;  %v10417_v34 = vld [vmem:[#allocation8 + $0x6ec] sm:$0xf0]  ;;  %v7438_v43 = vor.u32 %v10385_v32, %v7437_v30  ;;  %3600 = vmatpush.bf16.msra.mxu3 %v7070_v39 }
  0x42   :  { %v7693_v37 = vld [vmem:[#allocation8 + $0x7e0] sm:$0xf]  ;;  %v10449_v38 = vld [vmem:[#allocation8 + $0x7ec] sm:$0xf0]  ;;  %v7566_v44 = vor.u32 %v10417_v34, %v7565_v33  ;;  %3607 = vmatpush.bf16.msrb.mxu0 %v7310_v40  ;;  %3573 = vmatmul.bf16.vlgmr.msra.gmra.mxu1 %v11048_v10 }
  0x43   :  { %v7293_v41 = vld [vmem:[#allocation8 + $0x4c0] sm:$0xf]  ;;  %v10349_v42 = vld [vmem:[#allocation8 + $0x4cc] sm:$0xf0]  ;;  %v7694_v48 = vor.u32 %v10449_v38, %v7693_v37  ;;  %3621 = vmatpush.bf16.msrb.mxu1 %v7438_v43  ;;  %3587 = vmatmul.bf16.vlgmr.msra.gmra.mxu2 %v11044_v1 }
  0x44   :  { %v7421_v45 = vld [vmem:[#allocation8 + $0x5c0] sm:$0xf]  ;;  %v10381_v46 = vld [vmem:[#allocation8 + $0x5cc] sm:$0xf0]  ;;  %v7294_v55 = vor.u32 %v10349_v42, %v7293_v41  ;;  %3635 = vmatpush.bf16.msrb.mxu2 %v7566_v44  ;;  %3601 = vmatmul.bf16.vlgmr.msra.gmra.mxu3 %v11050_v17 }
  0x45   :  { %v7549_v47 = vld [vmem:[#allocation8 + $0x6c0] sm:$0xf]  ;;  %v10413_v49 = vld [vmem:[#allocation8 + $0x6cc] sm:$0xf0]  ;;  %v7422_v60 = vor.u32 %v10381_v46, %v7421_v45  ;;  %3649 = vmatpush.bf16.msrb.mxu3 %v7694_v48 }
  0x46   :  { %v7677_v50 = vld [vmem:[#allocation8 + $0x7c0] sm:$0xf]  ;;  %v10445_v51 = vld [vmem:[#allocation8 + $0x7cc] sm:$0xf0]  ;;  %v7550_v61 = vor.u32 %v10413_v49, %v7549_v47  ;;  %3608 = vmatpush.bf16.msrb.mxu0 %v7294_v55 }
  0x47   :  { %v6621_v52 = vld [vmem:[#allocation5] sm:$0xf]  ;;  %v10345_v57 = vld [vmem:[#allocation8 + $0x4ac] sm:$0xf0]  ;;  %v7678_v2 = vor.u32 %v10445_v51, %v7677_v50  ;;  %3622 = vmatpush.bf16.msrb.mxu1 %v7422_v60 }
  0x48   :  { %v10187_v53 = vld [vmem:[#allocation5 + $0x3c] sm:$0xf0]  ;;  %v10377_v63 = vld [vmem:[#allocation8 + $0x5ac] sm:$0xf0]  ;;  %3636 = vmatpush.bf16.msrb.mxu2 %v7550_v61 }
  0x49   :  { %v7277_v56 = vld [vmem:[#allocation8 + $0x4a0] sm:$0xf]  ;;  %v11042_v58 = vor.u32 %v10187_v53, %v6621_v52  ;;  %v10409_v3 = vld [vmem:[#allocation8 + $0x6ac] sm:$0xf0]  ;;  %3650 = vmatpush.bf16.msrb.mxu3 %v7678_v2 }
  0x4a   :  { %v7405_v62 = vld [vmem:[#allocation8 + $0x5a0] sm:$0xf]  ;;  %v10441_v5 = vld [vmem:[#allocation8 + $0x7ac] sm:$0xf0]  ;;  %v7278_v9 = vor.u32 %v10345_v57, %v7277_v56 }
  0x4b   :  { %v7533_v0 = vld [vmem:[#allocation8 + $0x6a0] sm:$0xf]  ;;  %3559 = vmatmul.bf16.vlgmr.msra.gmra.mxu0 %v11042_v58  ;;  %v7406_v12 = vor.u32 %v10377_v63, %v7405_v62  ;;  %v10341_v15 = vld [vmem:[#allocation8 + $0x48c] sm:$0xf0] }
  0x4c   :  { %v7661_v4 = vld [vmem:[#allocation8 + $0x7a0] sm:$0xf]  ;;  %v7534_v13 = vor.u32 %v10409_v3, %v7533_v0  ;;  %v10373_v19 = vld [vmem:[#allocation8 + $0x58c] sm:$0xf0]  ;;  %3609 = vmatpush.bf16.msrb.mxu0 %v7278_v9 }
  0x4d   :  { %v7261_v14 = vld [vmem:[#allocation8 + $0x480] sm:$0xf]  ;;  %v7662_v18 = vor.u32 %v10441_v5, %v7661_v4  ;;  %v10405_v21 = vld [vmem:[#allocation8 + $0x68c] sm:$0xf0]  ;;  %3623 = vmatpush.bf16.msrb.mxu1 %v7406_v12 }
  0x4e   :  { %v7389_v16 = vld [vmem:[#allocation8 + $0x580] sm:$0xf]  ;;  %v10437_v23 = vld [vmem:[#allocation8 + $0x78c] sm:$0xf0]  ;;  %v7262_v24 = vor.u32 %v10341_v15, %v7261_v14  ;;  %3637 = vmatpush.bf16.msrb.mxu2 %v7534_v13 }
  0x4f   :  { %v7517_v20 = vld [vmem:[#allocation8 + $0x680] sm:$0xf]  ;;  %v7390_v25 = vor.u32 %v10373_v19, %v7389_v16  ;;  %v10337_v28 = vld [vmem:[#allocation8 + $0x46c] sm:$0xf0]  ;;  %3651 = vmatpush.bf16.msrb.mxu3 %v7662_v18 }
  0x50   :  { %v7645_v22 = vld [vmem:[#allocation8 + $0x780] sm:$0xf]  ;;  %v7518_v26 = vor.u32 %v10405_v21, %v7517_v20  ;;  %v10369_v31 = vld [vmem:[#allocation8 + $0x56c] sm:$0xf0]  ;;  %3610 = vmatpush.bf16.msrb.mxu0 %v7262_v24 }
  0x51   :  { %v7245_v27 = vld [vmem:[#allocation8 + $0x460] sm:$0xf]  ;;  %v7646_v30 = vor.u32 %v10437_v23, %v7645_v22  ;;  %v10401_v33 = vld [vmem:[#allocation8 + $0x66c] sm:$0xf0]  ;;  %3624 = vmatpush.bf16.msrb.mxu1 %v7390_v25  ;;  %v6645_v25 = vld [vmem:[#allocation5 + $0x18] sm:$0xf] }
  0x52   :  { %v7373_v29 = vld [vmem:[#allocation8 + $0x560] sm:$0xf]  ;;  %v10433_v35 = vld [vmem:[#allocation8 + $0x76c] sm:$0xf0]  ;;  %v7246_v36 = vor.u32 %v10337_v28, %v7245_v27  ;;  %3638 = vmatpush.bf16.msrb.mxu2 %v7518_v26  ;;  %v10190_v26 = vld [vmem:[#allocation5 + $0x54] sm:$0xf0] }
  0x53   :  { %v7501_v32 = vld [vmem:[#allocation8 + $0x660] sm:$0xf]  ;;  %v7374_v37 = vor.u32 %v10369_v31, %v7373_v29  ;;  %v10333_v40 = vld [vmem:[#allocation8 + $0x44c] sm:$0xf0]  ;;  %3652 = vmatpush.bf16.msrb.mxu3 %v7646_v30  ;;  %v10181_v27 = vld [vmem:[#allocation5 + $0x14] sm:$0xf] }
  0x54   :  { %v7629_v34 = vld [vmem:[#allocation8 + $0x760] sm:$0xf]  ;;  %v7502_v38 = vor.u32 %v10401_v33, %v7501_v32  ;;  %v10365_v43 = vld [vmem:[#allocation8 + $0x54c] sm:$0xf0]  ;;  %3611 = vmatpush.bf16.msrb.mxu0 %v7246_v36  ;;  %v6639_v30 = vld [vmem:[#allocation5 + $0x50] sm:$0xf0] }
  0x55   :  { %v7229_v39 = vld [vmem:[#allocation8 + $0x440] sm:$0xf]  ;;  %v7630_v42 = vor.u32 %v10433_v35, %v7629_v34  ;;  %v10397_v45 = vld [vmem:[#allocation8 + $0x64c] sm:$0xf0]  ;;  %3625 = vmatpush.bf16.msrb.mxu1 %v7374_v37  ;;  %v10182_v31 = vld [vmem:[#allocation5 + $0x1c] sm:$0xf] }
  0x56   :  { %v7357_v41 = vld [vmem:[#allocation8 + $0x540] sm:$0xf]  ;;  %v10429_v47 = vld [vmem:[#allocation8 + $0x74c] sm:$0xf0]  ;;  %v7230_v48 = vor.u32 %v10333_v40, %v7229_v39  ;;  %3639 = vmatpush.bf16.msrb.mxu2 %v7502_v38  ;;  %v6647_v32 = vld [vmem:[#allocation5 + $0x58] sm:$0xf0] }
  0x57   :  { %v7485_v44 = vld [vmem:[#allocation8 + $0x640] sm:$0xf]  ;;  %v7358_v50 = vor.u32 %v10365_v43, %v7357_v41  ;;  %v10329_v52 = vld [vmem:[#allocation8 + $0x42c] sm:$0xf0]  ;;  %3653 = vmatpush.bf16.msrb.mxu3 %v7630_v42  ;;  %v11056_v43 = vor.u32 %v10190_v26, %v6645_v25 }
  0x58   :  { %v7613_v46 = vld [vmem:[#allocation8 + $0x740] sm:$0xf]  ;;  %v7486_v51 = vor.u32 %v10397_v45, %v7485_v44  ;;  %v10361_v54 = vld [vmem:[#allocation8 + $0x52c] sm:$0xf0]  ;;  %3612 = vmatpush.bf16.msrb.mxu0 %v7230_v48  ;;  %v11058_v44 = vor.u32 %v10181_v27, %v6639_v30 }
  0x59   :  { %v7213_v49 = vld [vmem:[#allocation8 + $0x420] sm:$0xf]  ;;  %v7614_v55 = vor.u32 %v10429_v47, %v7613_v46  ;;  %v10393_v57 = vld [vmem:[#allocation8 + $0x62c] sm:$0xf0]  ;;  %3626 = vmatpush.bf16.msrb.mxu1 %v7358_v50  ;;  %v11060_v47 = vor.u32 %v10182_v31, %v6647_v32 }
  0x5a   :  { %v7341_v53 = vld [vmem:[#allocation8 + $0x520] sm:$0xf]  ;;  %v10425_v60 = vld [vmem:[#allocation8 + $0x72c] sm:$0xf0]  ;;  %v7214_v63 = vor.u32 %v10329_v52, %v7213_v49  ;;  %3640 = vmatpush.bf16.msrb.mxu2 %v7486_v51 }
  0x5b   :  { %v7469_v56 = vld [vmem:[#allocation8 + $0x620] sm:$0xf]  ;;  %v10325_v62 = vld [vmem:[#allocation8 + $0x40c] sm:$0xf0]  ;;  %v7342_v5 = vor.u32 %v10361_v54, %v7341_v53  ;;  %3654 = vmatpush.bf16.msrb.mxu3 %v7614_v55 }
  0x5c   :  { %v7597_v59 = vld [vmem:[#allocation8 + $0x720] sm:$0xf]  ;;  %v10357_v2 = vld [vmem:[#allocation8 + $0x50c] sm:$0xf0]  ;;  %v7470_v6 = vor.u32 %v10393_v57, %v7469_v56  ;;  %3613 = vmatpush.bf16.msrb.mxu0 %v7214_v63 }
  0x5d   :  { %v7197_v61 = vld [vmem:[#allocation8 + $0x400] sm:$0xf]  ;;  %v10389_v4 = vld [vmem:[#allocation8 + $0x60c] sm:$0xf0]  ;;  %v7598_v11 = vor.u32 %v10425_v60, %v7597_v59  ;;  %3627 = vmatpush.bf16.msrb.mxu1 %v7342_v5 }
  0x5e   :  { %v7325_v0 = vld [vmem:[#allocation8 + $0x500] sm:$0xf]  ;;  %v10421_v8 = vld [vmem:[#allocation8 + $0x70c] sm:$0xf0]  ;;  %v7198_v19 = vor.u32 %v10325_v62, %v7197_v61  ;;  %3641 = vmatpush.bf16.msrb.mxu2 %v7470_v6 }
  0x5f   :  { %v7453_v3 = vld [vmem:[#allocation8 + $0x600] sm:$0xf]  ;;  %v10481_v12 = vld [vmem:[#allocation8 + $0x8ec] sm:$0xf0]  ;;  %v7326_v23 = vor.u32 %v10357_v2, %v7325_v0  ;;  %3655 = vmatpush.bf16.msrb.mxu3 %v7598_v11 }
  0x60   :  { %v7581_v7 = vld [vmem:[#allocation8 + $0x700] sm:$0xf]  ;;  %v10513_v14 = vld [vmem:[#allocation8 + $0x9ec] sm:$0xf0]  ;;  %v7454_v24 = vor.u32 %v10389_v4, %v7453_v3  ;;  %3614 = vmatpush.bf16.msrb.mxu0 %v7198_v19 }
  0x61   :  { %v7821_v9 = vld [vmem:[#allocation8 + $0x8e0] sm:$0xf]  ;;  %v10545_v16 = vld [vmem:[#allocation8 + $0xaec] sm:$0xf0]  ;;  %v7582_v28 = vor.u32 %v10421_v8, %v7581_v7  ;;  %3628 = vmatpush.bf16.msrb.mxu1 %v7326_v23 }
  0x62   :  { %v7949_v13 = vld [vmem:[#allocation8 + $0x9e0] sm:$0xf]  ;;  %v10577_v20 = vld [vmem:[#allocation8 + $0xbec] sm:$0xf0]  ;;  %v7822_v29 = vor.u32 %v10481_v12, %v7821_v9  ;;  %3642 = vmatpush.bf16.msrb.mxu2 %v7454_v24 }
  0x63   :  { %v8077_v15 = vld [vmem:[#allocation8 + $0xae0] sm:$0xf]  ;;  %v6637_v21 = vld [vmem:[#allocation5 + $0x10] sm:$0xf]  ;;  %v7950_v33 = vor.u32 %v10513_v14, %v7949_v13  ;;  %3656 = vmatpush.bf16.msrb.mxu3 %v7582_v28 }
  0x64   :  { %v8205_v18 = vld [vmem:[#allocation8 + $0xbe0] sm:$0xf]  ;;  %v10189_v22 = vld [vmem:[#allocation5 + $0x4c] sm:$0xf0]  ;;  %v8078_v34 = vor.u32 %v10545_v16, %v8077_v15  ;;  %3663 = vmatpush.bf16.msra.mxu0 %v7822_v29  ;;  %3629 = vmatmul.bf16.vlgmr.msrb.gmra.mxu1 %v11058_v44 }
  0x65   :  { %v7805_v35 = vld [vmem:[#allocation8 + $0x8c0] sm:$0xf]  ;;  %v10477_v36 = vld [vmem:[#allocation8 + $0x8cc] sm:$0xf0]  ;;  %v8206_v38 = vor.u32 %v10577_v20, %v8205_v18  ;;  %v11054_v39 = vor.u32 %v10189_v22, %v6637_v21  ;;  %3677 = vmatpush.bf16.msra.mxu1 %v7950_v33  ;;  %3643 = vmatmul.bf16.vlgmr.msrb.gmra.mxu2 %v11056_v43 }
  0x66   :  { %v7933_v37 = vld [vmem:[#allocation8 + $0x9c0] sm:$0xf]  ;;  %v10509_v40 = vld [vmem:[#allocation8 + $0x9cc] sm:$0xf0]  ;;  %v7806_v48 = vor.u32 %v10477_v36, %v7805_v35  ;;  %3691 = vmatpush.bf16.msra.mxu2 %v8078_v34  ;;  %3657 = vmatmul.bf16.vlgmr.msrb.gmra.mxu3 %v11060_v47 }
  0x67   :  { %v8061_v41 = vld [vmem:[#allocation8 + $0xac0] sm:$0xf]  ;;  %v10541_v42 = vld [vmem:[#allocation8 + $0xacc] sm:$0xf0]  ;;  %v7934_v49 = vor.u32 %v10509_v40, %v7933_v37  ;;  %3705 = vmatpush.bf16.msra.mxu3 %v8206_v38  ;;  %3615 = vmatmul.bf16.vlgmr.msrb.gmra.mxu0 %v11054_v39 }
  0x68   :  { %v8189_v45 = vld [vmem:[#allocation8 + $0xbc0] sm:$0xf]  ;;  %v10573_v46 = vld [vmem:[#allocation8 + $0xbcc] sm:$0xf0]  ;;  %v8062_v50 = vor.u32 %v10541_v42, %v8061_v41  ;;  %3664 = vmatpush.bf16.msra.mxu0 %v7806_v48 }
  0x69   :  { %v7789_v51 = vld [vmem:[#allocation8 + $0x8a0] sm:$0xf]  ;;  %v10473_v52 = vld [vmem:[#allocation8 + $0x8ac] sm:$0xf0]  ;;  %v8190_v54 = vor.u32 %v10573_v46, %v8189_v45  ;;  %3678 = vmatpush.bf16.msra.mxu1 %v7934_v49 }
  0x6a   :  { %v7917_v53 = vld [vmem:[#allocation8 + $0x9a0] sm:$0xf]  ;;  %v10505_v55 = vld [vmem:[#allocation8 + $0x9ac] sm:$0xf0]  ;;  %v7790_v61 = vor.u32 %v10473_v52, %v7789_v51  ;;  %3692 = vmatpush.bf16.msra.mxu2 %v8062_v50 }
  0x6b   :  { %v8045_v56 = vld [vmem:[#allocation8 + $0xaa0] sm:$0xf]  ;;  %v10537_v57 = vld [vmem:[#allocation8 + $0xaac] sm:$0xf0]  ;;  %v7918_v62 = vor.u32 %v10505_v55, %v7917_v53  ;;  %3706 = vmatpush.bf16.msra.mxu3 %v8190_v54 }
  0x6c   :  { %v8173_v59 = vld [vmem:[#allocation8 + $0xba0] sm:$0xf]  ;;  %v10569_v60 = vld [vmem:[#allocation8 + $0xbac] sm:$0xf0]  ;;  %v8046_v63 = vor.u32 %v10537_v57, %v8045_v56  ;;  %3665 = vmatpush.bf16.msra.mxu0 %v7790_v61 }
  0x6d   :  { %v7773_v0 = vld [vmem:[#allocation8 + $0x880] sm:$0xf]  ;;  %v10469_v2 = vld [vmem:[#allocation8 + $0x88c] sm:$0xf0]  ;;  %v8174_v4 = vor.u32 %v10569_v60, %v8173_v59  ;;  %3679 = vmatpush.bf16.msra.mxu1 %v7918_v62 }
  0x6e   :  { %v7901_v3 = vld [vmem:[#allocation8 + $0x980] sm:$0xf]  ;;  %v10501_v5 = vld [vmem:[#allocation8 + $0x98c] sm:$0xf0]  ;;  %v7774_v11 = vor.u32 %v10469_v2, %v7773_v0  ;;  %3693 = vmatpush.bf16.msra.mxu2 %v8046_v63 }
  0x6f   :  { %v8029_v6 = vld [vmem:[#allocation8 + $0xa80] sm:$0xf]  ;;  %v10533_v7 = vld [vmem:[#allocation8 + $0xa8c] sm:$0xf0]  ;;  %v7902_v12 = vor.u32 %v10501_v5, %v7901_v3  ;;  %3707 = vmatpush.bf16.msra.mxu3 %v8174_v4 }
  0x70   :  { %v8157_v8 = vld [vmem:[#allocation8 + $0xb80] sm:$0xf]  ;;  %v10565_v9 = vld [vmem:[#allocation8 + $0xb8c] sm:$0xf0]  ;;  %v8030_v13 = vor.u32 %v10533_v7, %v8029_v6  ;;  %3666 = vmatpush.bf16.msra.mxu0 %v7774_v11 }
  0x71   :  { %v7757_v14 = vld [vmem:[#allocation8 + $0x860] sm:$0xf]  ;;  %v10465_v15 = vld [vmem:[#allocation8 + $0x86c] sm:$0xf0]  ;;  %v8158_v18 = vor.u32 %v10565_v9, %v8157_v8  ;;  %3680 = vmatpush.bf16.msra.mxu1 %v7902_v12 }
  0x72   :  { %v7885_v16 = vld [vmem:[#allocation8 + $0x960] sm:$0xf]  ;;  %v10497_v19 = vld [vmem:[#allocation8 + $0x96c] sm:$0xf0]  ;;  %v7758_v24 = vor.u32 %v10465_v15, %v7757_v14  ;;  %3694 = vmatpush.bf16.msra.mxu2 %v8030_v13 }
  0x73   :  { %v8013_v20 = vld [vmem:[#allocation8 + $0xa60] sm:$0xf]  ;;  %v10529_v21 = vld [vmem:[#allocation8 + $0xa6c] sm:$0xf0]  ;;  %v7886_v25 = vor.u32 %v10497_v19, %v7885_v16  ;;  %3708 = vmatpush.bf16.msra.mxu3 %v8158_v18  ;;  %v6661_v16 = vld [vmem:[#allocation5 + $0x28] sm:$0xf] }
  0x74   :  { %v8141_v22 = vld [vmem:[#allocation8 + $0xb60] sm:$0xf]  ;;  %v10561_v23 = vld [vmem:[#allocation8 + $0xb6c] sm:$0xf0]  ;;  %v8014_v26 = vor.u32 %v10529_v21, %v8013_v20  ;;  %3667 = vmatpush.bf16.msra.mxu0 %v7758_v24  ;;  %v10192_v18 = vld [vmem:[#allocation5 + $0x64] sm:$0xf0] }
  0x75   :  { %v7741_v27 = vld [vmem:[#allocation8 + $0x840] sm:$0xf]  ;;  %v10461_v28 = vld [vmem:[#allocation8 + $0x84c] sm:$0xf0]  ;;  %v8142_v30 = vor.u32 %v10561_v23, %v8141_v22  ;;  %3681 = vmatpush.bf16.msra.mxu1 %v7886_v25  ;;  %v10183_v19 = vld [vmem:[#allocation5 + $0x24] sm:$0xf] }
  0x76   :  { %v7869_v29 = vld [vmem:[#allocation8 + $0x940] sm:$0xf]  ;;  %v10493_v31 = vld [vmem:[#allocation8 + $0x94c] sm:$0xf0]  ;;  %v7742_v36 = vor.u32 %v10461_v28, %v7741_v27  ;;  %3695 = vmatpush.bf16.msra.mxu2 %v8014_v26  ;;  %v6655_v22 = vld [vmem:[#allocation5 + $0x60] sm:$0xf0] }
  0x77   :  { %v7997_v32 = vld [vmem:[#allocation8 + $0xa40] sm:$0xf]  ;;  %v10525_v33 = vld [vmem:[#allocation8 + $0xa4c] sm:$0xf0]  ;;  %v7870_v38 = vor.u32 %v10493_v31, %v7869_v29  ;;  %3709 = vmatpush.bf16.msra.mxu3 %v8142_v30  ;;  %v10184_v23 = vld [vmem:[#allocation5 + $0x2c] sm:$0xf] }
  0x78   :  { %v8125_v34 = vld [vmem:[#allocation8 + $0xb40] sm:$0xf]  ;;  %v10557_v35 = vld [vmem:[#allocation8 + $0xb4c] sm:$0xf0]  ;;  %v7998_v40 = vor.u32 %v10525_v33, %v7997_v32  ;;  %3668 = vmatpush.bf16.msra.mxu0 %v7742_v36  ;;  %v6663_v24 = vld [vmem:[#allocation5 + $0x68] sm:$0xf0]  ;;  %v11070_v36 = vor.u32 %v10183_v19, %v6655_v22 }
  0x79   :  { %v7725_v37 = vld [vmem:[#allocation8 + $0x820] sm:$0xf]  ;;  %v10457_v41 = vld [vmem:[#allocation8 + $0x82c] sm:$0xf0]  ;;  %v8126_v46 = vor.u32 %v10557_v35, %v8125_v34  ;;  %3682 = vmatpush.bf16.msra.mxu1 %v7870_v38  ;;  %v11068_v35 = vor.u32 %v10192_v18, %v6661_v16 }
  0x7a   :  { %v7853_v42 = vld [vmem:[#allocation8 + $0x920] sm:$0xf]  ;;  %v10489_v45 = vld [vmem:[#allocation8 + $0x92c] sm:$0xf0]  ;;  %v7726_v54 = vor.u32 %v10457_v41, %v7725_v37  ;;  %3696 = vmatpush.bf16.msra.mxu2 %v7998_v40  ;;  %v11072_v40 = vor.u32 %v10184_v23, %v6663_v24 }
  0x7b   :  { %v7981_v48 = vld [vmem:[#allocation8 + $0xa20] sm:$0xf]  ;;  %v10521_v49 = vld [vmem:[#allocation8 + $0xa2c] sm:$0xf0]  ;;  %v7854_v60 = vor.u32 %v10489_v45, %v7853_v42  ;;  %3710 = vmatpush.bf16.msra.mxu3 %v8126_v46 }
  0x7c   :  { %v8109_v50 = vld [vmem:[#allocation8 + $0xb20] sm:$0xf]  ;;  %v10553_v51 = vld [vmem:[#allocation8 + $0xb2c] sm:$0xf0]  ;;  %v7982_v61 = vor.u32 %v10521_v49, %v7981_v48  ;;  %3669 = vmatpush.bf16.msra.mxu0 %v7726_v54 }
  0x7d   :  { %v7709_v52 = vld [vmem:[#allocation8 + $0x800] sm:$0xf]  ;;  %v10453_v53 = vld [vmem:[#allocation8 + $0x80c] sm:$0xf0]  ;;  %v8110_v2 = vor.u32 %v10553_v51, %v8109_v50  ;;  %3683 = vmatpush.bf16.msra.mxu1 %v7854_v60 }
  0x7e   :  { %v7837_v55 = vld [vmem:[#allocation8 + $0x900] sm:$0xf]  ;;  %v10485_v56 = vld [vmem:[#allocation8 + $0x90c] sm:$0xf0]  ;;  %v7710_v9 = vor.u32 %v10453_v53, %v7709_v52  ;;  %3697 = vmatpush.bf16.msra.mxu2 %v7982_v61 }
  0x7f   :  { %v7965_v57 = vld [vmem:[#allocation8 + $0xa00] sm:$0xf]  ;;  %v10517_v59 = vld [vmem:[#allocation8 + $0xa0c] sm:$0xf0]  ;;  %v7838_v14 = vor.u32 %v10485_v56, %v7837_v55  ;;  %3711 = vmatpush.bf16.msra.mxu3 %v8110_v2 }
  0x80   :  { %v8093_v62 = vld [vmem:[#allocation8 + $0xb00] sm:$0xf]  ;;  %v10549_v63 = vld [vmem:[#allocation8 + $0xb0c] sm:$0xf0]  ;;  %v7966_v15 = vor.u32 %v10517_v59, %v7965_v57  ;;  %3670 = vmatpush.bf16.msra.mxu0 %v7710_v9 }
  0x81   :  { %v8333_v0 = vld [vmem:[#allocation8 + $0xce0] sm:$0xf]  ;;  %v10609_v3 = vld [vmem:[#allocation8 + $0xcec] sm:$0xf0]  ;;  %v8094_v20 = vor.u32 %v10549_v63, %v8093_v62  ;;  %3684 = vmatpush.bf16.msra.mxu1 %v7838_v14 }
  0x82   :  { %v8461_v4 = vld [vmem:[#allocation8 + $0xde0] sm:$0xf]  ;;  %v10641_v5 = vld [vmem:[#allocation8 + $0xdec] sm:$0xf0]  ;;  %v8334_v21 = vor.u32 %v10609_v3, %v8333_v0  ;;  %3698 = vmatpush.bf16.msra.mxu2 %v7966_v15 }
  0x83   :  { %v8589_v6 = vld [vmem:[#allocation8 + $0xee0] sm:$0xf]  ;;  %v10673_v7 = vld [vmem:[#allocation8 + $0xeec] sm:$0xf0]  ;;  %v8462_v25 = vor.u32 %v10641_v5, %v8461_v4  ;;  %3712 = vmatpush.bf16.msra.mxu3 %v8094_v20 }
  0x84   :  { %v8717_v8 = vld [vmem:[#allocation8 + $0xfe0] sm:$0xf]  ;;  %v10705_v11 = vld [vmem:[#allocation8 + $0xfec] sm:$0xf0]  ;;  %v8590_v26 = vor.u32 %v10673_v7, %v8589_v6  ;;  %3719 = vmatpush.bf16.msrb.mxu0 %v8334_v21  ;;  %3685 = vmatmul.bf16.vlgmr.msra.gmra.mxu1 %v11070_v36 }
  0x85   :  { %v6653_v12 = vld [vmem:[#allocation5 + $0x20] sm:$0xf]  ;;  %v10605_v28 = vld [vmem:[#allocation8 + $0xccc] sm:$0xf0]  ;;  %v8718_v30 = vor.u32 %v10705_v11, %v8717_v8  ;;  %3733 = vmatpush.bf16.msrb.mxu1 %v8462_v25  ;;  %3699 = vmatmul.bf16.vlgmr.msra.gmra.mxu2 %v11068_v35 }
  0x86   :  { %v10191_v13 = vld [vmem:[#allocation5 + $0x5c] sm:$0xf0]  ;;  %v10637_v32 = vld [vmem:[#allocation8 + $0xdcc] sm:$0xf0]  ;;  %3747 = vmatpush.bf16.msrb.mxu2 %v8590_v26  ;;  %3713 = vmatmul.bf16.vlgmr.msra.gmra.mxu3 %v11072_v40 }
  0x87   :  { %v8317_v27 = vld [vmem:[#allocation8 + $0xcc0] sm:$0xf]  ;;  %v11066_v31 = vor.u32 %v10191_v13, %v6653_v12  ;;  %v10669_v34 = vld [vmem:[#allocation8 + $0xecc] sm:$0xf0]  ;;  %3761 = vmatpush.bf16.msrb.mxu3 %v8718_v30 }
  0x88   :  { %v8445_v29 = vld [vmem:[#allocation8 + $0xdc0] sm:$0xf]  ;;  %v10701_v38 = vld [vmem:[#allocation8 + $0xfcc] sm:$0xf0]  ;;  %v8318_v41 = vor.u32 %v10605_v28, %v8317_v27 }
  0x89   :  { %v8573_v33 = vld [vmem:[#allocation8 + $0xec0] sm:$0xf]  ;;  %v8446_v42 = vor.u32 %v10637_v32, %v8445_v29  ;;  %v10601_v48 = vld [vmem:[#allocation8 + $0xcac] sm:$0xf0]  ;;  %3671 = vmatmul.bf16.vlgmr.msra.gmra.mxu0 %v11066_v31 }
  0x8a   :  { %v8701_v37 = vld [vmem:[#allocation8 + $0xfc0] sm:$0xf]  ;;  %v8574_v45 = vor.u32 %v10669_v34, %v8573_v33  ;;  %v10633_v51 = vld [vmem:[#allocation8 + $0xdac] sm:$0xf0]  ;;  %3720 = vmatpush.bf16.msrb.mxu0 %v8318_v41 }
  0x8b   :  { %v8301_v46 = vld [vmem:[#allocation8 + $0xca0] sm:$0xf]  ;;  %v8702_v50 = vor.u32 %v10701_v38, %v8701_v37  ;;  %v10665_v53 = vld [vmem:[#allocation8 + $0xeac] sm:$0xf0]  ;;  %3734 = vmatpush.bf16.msrb.mxu1 %v8446_v42 }
  0x8c   :  { %v8429_v49 = vld [vmem:[#allocation8 + $0xda0] sm:$0xf]  ;;  %v10697_v55 = vld [vmem:[#allocation8 + $0xfac] sm:$0xf0]  ;;  %v8302_v56 = vor.u32 %v10601_v48, %v8301_v46  ;;  %3748 = vmatpush.bf16.msrb.mxu2 %v8574_v45 }
  0x8d   :  { %v8557_v52 = vld [vmem:[#allocation8 + $0xea0] sm:$0xf]  ;;  %v8430_v57 = vor.u32 %v10633_v51, %v8429_v49  ;;  %v10597_v61 = vld [vmem:[#allocation8 + $0xc8c] sm:$0xf0]  ;;  %3762 = vmatpush.bf16.msrb.mxu3 %v8702_v50 }
  0x8e   :  { %v8685_v54 = vld [vmem:[#allocation8 + $0xfa0] sm:$0xf]  ;;  %v8558_v59 = vor.u32 %v10665_v53, %v8557_v52  ;;  %v10629_v0 = vld [vmem:[#allocation8 + $0xd8c] sm:$0xf0]  ;;  %3721 = vmatpush.bf16.msrb.mxu0 %v8302_v56 }
  0x8f   :  { %v8285_v60 = vld [vmem:[#allocation8 + $0xc80] sm:$0xf]  ;;  %v8686_v63 = vor.u32 %v10697_v55, %v8685_v54  ;;  %v10661_v3 = vld [vmem:[#allocation8 + $0xe8c] sm:$0xf0]  ;;  %3735 = vmatpush.bf16.msrb.mxu1 %v8430_v57 }
  0x90   :  { %v8413_v62 = vld [vmem:[#allocation8 + $0xd80] sm:$0xf]  ;;  %v10693_v5 = vld [vmem:[#allocation8 + $0xf8c] sm:$0xf0]  ;;  %v8286_v6 = vor.u32 %v10597_v61, %v8285_v60  ;;  %3749 = vmatpush.bf16.msrb.mxu2 %v8558_v59 }
  0x91   :  { %v8541_v2 = vld [vmem:[#allocation8 + $0xe80] sm:$0xf]  ;;  %v8414_v7 = vor.u32 %v10629_v0, %v8413_v62  ;;  %v10593_v11 = vld [vmem:[#allocation8 + $0xc6c] sm:$0xf0]  ;;  %3763 = vmatpush.bf16.msrb.mxu3 %v8686_v63  ;;  %v10223_v0 = vld [vmem:[#allocation8 + $0xe4] sm:$0xf] }
  0x92   :  { %v8669_v4 = vld [vmem:[#allocation8 + $0xf80] sm:$0xf]  ;;  %v8542_v8 = vor.u32 %v10661_v3, %v8541_v2  ;;  %v10625_v14 = vld [vmem:[#allocation8 + $0xd6c] sm:$0xf0]  ;;  %3722 = vmatpush.bf16.msrb.mxu0 %v8286_v6  ;;  %v6799_v3 = vld [vmem:[#allocation8 + $0xf0] sm:$0xf0] }
  0x93   :  { %v8269_v9 = vld [vmem:[#allocation8 + $0xc60] sm:$0xf]  ;;  %v8670_v13 = vor.u32 %v10693_v5, %v8669_v4  ;;  %v10657_v16 = vld [vmem:[#allocation8 + $0xe6c] sm:$0xf0]  ;;  %3736 = vmatpush.bf16.msrb.mxu1 %v8414_v7  ;;  %v10255_v4 = vld [vmem:[#allocation8 + $0x1e4] sm:$0xf] }
  0x94   :  { %v8397_v12 = vld [vmem:[#allocation8 + $0xd60] sm:$0xf]  ;;  %v10689_v19 = vld [vmem:[#allocation8 + $0xf6c] sm:$0xf0]  ;;  %v8270_v20 = vor.u32 %v10593_v11, %v8269_v9  ;;  %3750 = vmatpush.bf16.msrb.mxu2 %v8542_v8  ;;  %v6927_v5 = vld [vmem:[#allocation8 + $0x1f0] sm:$0xf0] }
  0x95   :  { %v8525_v15 = vld [vmem:[#allocation8 + $0xe60] sm:$0xf]  ;;  %v8398_v21 = vor.u32 %v10625_v14, %v8397_v12  ;;  %v10589_v24 = vld [vmem:[#allocation8 + $0xc4c] sm:$0xf0]  ;;  %3764 = vmatpush.bf16.msrb.mxu3 %v8670_v13  ;;  %v10287_v6 = vld [vmem:[#allocation8 + $0x2e4] sm:$0xf] }
  0x96   :  { %v8653_v18 = vld [vmem:[#allocation8 + $0xf60] sm:$0xf]  ;;  %v8526_v22 = vor.u32 %v10657_v16, %v8525_v15  ;;  %v10621_v27 = vld [vmem:[#allocation8 + $0xd4c] sm:$0xf0]  ;;  %3723 = vmatpush.bf16.msrb.mxu0 %v8270_v20  ;;  %v7055_v7 = vld [vmem:[#allocation8 + $0x2f0] sm:$0xf0] }
  0x97   :  { %v8253_v23 = vld [vmem:[#allocation8 + $0xc40] sm:$0xf]  ;;  %v8654_v26 = vor.u32 %v10689_v19, %v8653_v18  ;;  %v10653_v29 = vld [vmem:[#allocation8 + $0xe4c] sm:$0xf0]  ;;  %3737 = vmatpush.bf16.msrb.mxu1 %v8398_v21  ;;  %v10319_v8 = vld [vmem:[#allocation8 + $0x3e4] sm:$0xf]  ;;  %v6802_v21 = vor.u32 %v10223_v0, %v6799_v3 }
  0x98   :  { %v8381_v25 = vld [vmem:[#allocation8 + $0xd40] sm:$0xf]  ;;  %v10685_v32 = vld [vmem:[#allocation8 + $0xf4c] sm:$0xf0]  ;;  %v8254_v33 = vor.u32 %v10589_v24, %v8253_v23  ;;  %3751 = vmatpush.bf16.msrb.mxu2 %v8526_v22  ;;  %v7183_v11 = vld [vmem:[#allocation8 + $0x3f0] sm:$0xf0] }
  0x99   :  { %v8509_v28 = vld [vmem:[#allocation8 + $0xe40] sm:$0xf]  ;;  %v10585_v37 = vld [vmem:[#allocation8 + $0xc2c] sm:$0xf0]  ;;  %v8382_v38 = vor.u32 %v10621_v27, %v8381_v25  ;;  %3765 = vmatpush.bf16.msrb.mxu3 %v8654_v26  ;;  %v6677_v16 = vld [vmem:[#allocation5 + $0x38] sm:$0xf]  ;;  %v6930_v25 = vor.u32 %v10255_v4, %v6927_v5  ;;  %v7058_v26 = vor.u32 %v10287_v6, %v7055_v7 }
  0x9a   :  { %v8637_v30 = vld [vmem:[#allocation8 + $0xf40] sm:$0xf]  ;;  %v8510_v41 = vor.u32 %v10653_v29, %v8509_v28  ;;  %v10617_v45 = vld [vmem:[#allocation8 + $0xd2c] sm:$0xf0]  ;;  %3724 = vmatpush.bf16.msrb.mxu0 %v8254_v33  ;;  %v10194_v18 = vld [vmem:[#allocation5 + $0x74] sm:$0xf0] }
  0x9b   :  { %v8237_v34 = vld [vmem:[#allocation8 + $0xc20] sm:$0xf]  ;;  %v8638_v48 = vor.u32 %v10685_v32, %v8637_v30  ;;  %v10649_v49 = vld [vmem:[#allocation8 + $0xe2c] sm:$0xf0]  ;;  %3738 = vmatpush.bf16.msrb.mxu1 %v8382_v38  ;;  %v10185_v19 = vld [vmem:[#allocation5 + $0x34] sm:$0xf]  ;;  %v7186_v30 = vor.u32 %v10319_v8, %v7183_v11  ;;  %v11080_v38 = vor.u32 %v10194_v18, %v6677_v16 }
  0x9c   :  { %v8365_v42 = vld [vmem:[#allocation8 + $0xd20] sm:$0xf]  ;;  %v10681_v51 = vld [vmem:[#allocation8 + $0xf2c] sm:$0xf0]  ;;  %v8238_v54 = vor.u32 %v10585_v37, %v8237_v34  ;;  %3752 = vmatpush.bf16.msrb.mxu2 %v8510_v41  ;;  %v6671_v22 = vld [vmem:[#allocation5 + $0x70] sm:$0xf0] }
  0x9d   :  { %v8493_v46 = vld [vmem:[#allocation8 + $0xe20] sm:$0xf]  ;;  %v10581_v53 = vld [vmem:[#allocation8 + $0xc0c] sm:$0xf0]  ;;  %v8366_v60 = vor.u32 %v10617_v45, %v8365_v42  ;;  %3766 = vmatpush.bf16.msrb.mxu3 %v8638_v48  ;;  %v10186_v23 = vld [vmem:[#allocation5 + $0x3c] sm:$0xf]  ;;  %v11082_v41 = vor.u32 %v10185_v19, %v6671_v22 }
  0x9e   :  { %v8621_v50 = vld [vmem:[#allocation8 + $0xf20] sm:$0xf]  ;;  %v10613_v56 = vld [vmem:[#allocation8 + $0xd0c] sm:$0xf0]  ;;  %v8494_v61 = vor.u32 %v10649_v49, %v8493_v46  ;;  %3725 = vmatpush.bf16.msrb.mxu0 %v8238_v54  ;;  %v6679_v24 = vld [vmem:[#allocation5 + $0x78] sm:$0xf0] }
  0x9f   :  { %v8221_v52 = vld [vmem:[#allocation8 + $0xc00] sm:$0xf]  ;;  %v10645_v59 = vld [vmem:[#allocation8 + $0xe0c] sm:$0xf0]  ;;  %v8622_v2 = vor.u32 %v10681_v51, %v8621_v50  ;;  %3739 = vmatpush.bf16.msrb.mxu1 %v8366_v60  ;;  %v10219_v27 = vld [vmem:[#allocation8 + $0xc4] sm:$0xf]  ;;  %v11084_v46 = vor.u32 %v10186_v23, %v6679_v24 }
  0xa0   :  { %v8349_v55 = vld [vmem:[#allocation8 + $0xd00] sm:$0xf]  ;;  %v10677_v63 = vld [vmem:[#allocation8 + $0xf0c] sm:$0xf0]  ;;  %v8222_v9 = vor.u32 %v10581_v53, %v8221_v52  ;;  %3753 = vmatpush.bf16.msrb.mxu2 %v8494_v61  ;;  %v6783_v28 = vld [vmem:[#allocation8 + $0xd0] sm:$0xf0] }
  0xa1   :  { %v8477_v57 = vld [vmem:[#allocation8 + $0xe00] sm:$0xf]  ;;  %v6669_v12 = vld [vmem:[#allocation5 + $0x30] sm:$0xf]  ;;  %v8350_v14 = vor.u32 %v10613_v56, %v8349_v55  ;;  %3767 = vmatpush.bf16.msrb.mxu3 %v8622_v2  ;;  %v10251_v29 = vld [vmem:[#allocation8 + $0x1c4] sm:$0xf]  ;;  %v6786_v48 = vor.u32 %v10219_v27, %v6783_v28 }
  0xa2   :  { %v8605_v62 = vld [vmem:[#allocation8 + $0xf00] sm:$0xf]  ;;  %v10193_v13 = vld [vmem:[#allocation5 + $0x6c] sm:$0xf0]  ;;  %v8478_v15 = vor.u32 %v10645_v59, %v8477_v57  ;;  %3726 = vmatpush.bf16.msrb.mxu0 %v8222_v9  ;;  %v6911_v33 = vld [vmem:[#allocation8 + $0x1d0] sm:$0xf0] }
  0xa3   :  { %v8606_v20 = vor.u32 %v10677_v63, %v8605_v62  ;;  %v11078_v32 = vor.u32 %v10193_v13, %v6669_v12  ;;  %v10283_v34 = vld [vmem:[#allocation8 + $0x2c4] sm:$0xf]  ;;  %v7039_v37 = vld [vmem:[#allocation8 + $0x2d0] sm:$0xf0]  ;;  %3740 = vmatpush.bf16.msrb.mxu1 %v8350_v14  ;;  %v6914_v49 = vor.u32 %v10251_v29, %v6911_v33 }
  0xa4   :  { %3754 = vmatpush.bf16.msrb.mxu2 %v8478_v15  ;;  %v10315_v42 = vld [vmem:[#allocation8 + $0x3c4] sm:$0xf]  ;;  %v7167_v45 = vld [vmem:[#allocation8 + $0x3d0] sm:$0xf0]  ;;  %v7042_v50 = vor.u32 %v10283_v34, %v7039_v37 }
  0xa5   :  { %3768 = vmatpush.bf16.msrb.mxu3 %v8606_v20  ;;  %v10215_v51 = vld [vmem:[#allocation8 + $0xa4] sm:$0xf]  ;;  %v6767_v52 = vld [vmem:[#allocation8 + $0xb0] sm:$0xf0]  ;;  %3727 = vmatmul.bf16.vlgmr.msrb.gmra.mxu0 %v11078_v32  ;;  %v7170_v54 = vor.u32 %v10315_v42, %v7167_v45 }
  0xa6   :  { %3775 = vmatpush.bf16.msra.mxu0 %v6802_v21  ;;  %v10247_v53 = vld [vmem:[#allocation8 + $0x1a4] sm:$0xf]  ;;  %v6895_v55 = vld [vmem:[#allocation8 + $0x1b0] sm:$0xf0]  ;;  %3741 = vmatmul.bf16.vlgmr.msrb.gmra.mxu1 %v11082_v41  ;;  %v6770_v61 = vor.u32 %v10215_v51, %v6767_v52 }
  0xa7   :  { %3789 = vmatpush.bf16.msra.mxu1 %v6930_v25  ;;  %v10279_v56 = vld [vmem:[#allocation8 + $0x2a4] sm:$0xf]  ;;  %v7023_v57 = vld [vmem:[#allocation8 + $0x2b0] sm:$0xf0]  ;;  %3755 = vmatmul.bf16.vlgmr.msrb.gmra.mxu2 %v11080_v38  ;;  %v6898_v62 = vor.u32 %v10247_v53, %v6895_v55 }
  0xa8   :  { %3803 = vmatpush.bf16.msra.mxu2 %v7058_v26  ;;  %v10311_v59 = vld [vmem:[#allocation8 + $0x3a4] sm:$0xf]  ;;  %v7151_v60 = vld [vmem:[#allocation8 + $0x3b0] sm:$0xf0]  ;;  %3769 = vmatmul.bf16.vlgmr.msrb.gmra.mxu3 %v11084_v46  ;;  %v7026_v63 = vor.u32 %v10279_v56, %v7023_v57 }
  0xa9   :  { %3817 = vmatpush.bf16.msra.mxu3 %v7186_v30  ;;  %v10211_v0 = vld [vmem:[#allocation8 + $0x84] sm:$0xf]  ;;  %v6751_v2 = vld [vmem:[#allocation8 + $0x90] sm:$0xf0]  ;;  %v7154_v4 = vor.u32 %v10311_v59, %v7151_v60 }
  0xaa   :  { %3776 = vmatpush.bf16.msra.mxu0 %v6786_v48  ;;  %v10243_v3 = vld [vmem:[#allocation8 + $0x184] sm:$0xf]  ;;  %v6879_v5 = vld [vmem:[#allocation8 + $0x190] sm:$0xf0]  ;;  %v6754_v11 = vor.u32 %v10211_v0, %v6751_v2 }
  0xab   :  { %3790 = vmatpush.bf16.msra.mxu1 %v6914_v49  ;;  %v10275_v6 = vld [vmem:[#allocation8 + $0x284] sm:$0xf]  ;;  %v7007_v7 = vld [vmem:[#allocation8 + $0x290] sm:$0xf0]  ;;  %v6882_v12 = vor.u32 %v10243_v3, %v6879_v5 }
  0xac   :  { %3804 = vmatpush.bf16.msra.mxu2 %v7042_v50  ;;  %v10307_v8 = vld [vmem:[#allocation8 + $0x384] sm:$0xf]  ;;  %v7135_v9 = vld [vmem:[#allocation8 + $0x390] sm:$0xf0]  ;;  %v7010_v13 = vor.u32 %v10275_v6, %v7007_v7 }
  0xad   :  { %3818 = vmatpush.bf16.msra.mxu3 %v7170_v54  ;;  %v10207_v14 = vld [vmem:[#allocation8 + $0x64] sm:$0xf]  ;;  %v6735_v15 = vld [vmem:[#allocation8 + $0x70] sm:$0xf0]  ;;  %v7138_v18 = vor.u32 %v10307_v8, %v7135_v9 }
  0xae   :  { %3777 = vmatpush.bf16.msra.mxu0 %v6770_v61  ;;  %v10239_v16 = vld [vmem:[#allocation8 + $0x164] sm:$0xf]  ;;  %v6863_v19 = vld [vmem:[#allocation8 + $0x170] sm:$0xf0]  ;;  %v6738_v24 = vor.u32 %v10207_v14, %v6735_v15 }
  0xaf   :  { %3791 = vmatpush.bf16.msra.mxu1 %v6898_v62  ;;  %v10271_v20 = vld [vmem:[#allocation8 + $0x264] sm:$0xf]  ;;  %v6991_v21 = vld [vmem:[#allocation8 + $0x270] sm:$0xf0]  ;;  %v6866_v25 = vor.u32 %v10239_v16, %v6863_v19 }
  0xb0   :  { %3805 = vmatpush.bf16.msra.mxu2 %v7026_v63  ;;  %v10303_v22 = vld [vmem:[#allocation8 + $0x364] sm:$0xf]  ;;  %v7119_v23 = vld [vmem:[#allocation8 + $0x370] sm:$0xf0]  ;;  %v6994_v26 = vor.u32 %v10271_v20, %v6991_v21 }
  0xb1   :  { %3819 = vmatpush.bf16.msra.mxu3 %v7154_v4  ;;  %v10203_v27 = vld [vmem:[#allocation8 + $0x44] sm:$0xf]  ;;  %v6719_v28 = vld [vmem:[#allocation8 + $0x50] sm:$0xf0]  ;;  %v7122_v30 = vor.u32 %v10303_v22, %v7119_v23 }
  0xb2   :  { %3778 = vmatpush.bf16.msra.mxu0 %v6754_v11  ;;  %v10235_v29 = vld [vmem:[#allocation8 + $0x144] sm:$0xf]  ;;  %v6847_v33 = vld [vmem:[#allocation8 + $0x150] sm:$0xf0]  ;;  %v6722_v48 = vor.u32 %v10203_v27, %v6719_v28 }
  0xb3   :  { %3792 = vmatpush.bf16.msra.mxu1 %v6882_v12  ;;  %v10267_v34 = vld [vmem:[#allocation8 + $0x244] sm:$0xf]  ;;  %v6975_v37 = vld [vmem:[#allocation8 + $0x250] sm:$0xf0]  ;;  %v6850_v49 = vor.u32 %v10235_v29, %v6847_v33 }
  0xb4   :  { %3806 = vmatpush.bf16.msra.mxu2 %v7010_v13  ;;  %v10299_v42 = vld [vmem:[#allocation8 + $0x344] sm:$0xf]  ;;  %v7103_v45 = vld [vmem:[#allocation8 + $0x350] sm:$0xf0]  ;;  %v6978_v50 = vor.u32 %v10267_v34, %v6975_v37 }
  0xb5   :  { %3820 = vmatpush.bf16.msra.mxu3 %v7138_v18  ;;  %v10199_v51 = vld [vmem:[#allocation8 + $0x24] sm:$0xf]  ;;  %v6703_v52 = vld [vmem:[#allocation8 + $0x30] sm:$0xf0]  ;;  %v7106_v54 = vor.u32 %v10299_v42, %v7103_v45 }
  0xb6   :  { %3779 = vmatpush.bf16.msra.mxu0 %v6738_v24  ;;  %v10231_v53 = vld [vmem:[#allocation8 + $0x124] sm:$0xf]  ;;  %v6831_v55 = vld [vmem:[#allocation8 + $0x130] sm:$0xf0]  ;;  %v6706_v61 = vor.u32 %v10199_v51, %v6703_v52 }
  0xb7   :  { %3793 = vmatpush.bf16.msra.mxu1 %v6866_v25  ;;  %v10263_v56 = vld [vmem:[#allocation8 + $0x224] sm:$0xf]  ;;  %v6959_v57 = vld [vmem:[#allocation8 + $0x230] sm:$0xf0]  ;;  %v6834_v0 = vor.u32 %v10231_v53, %v6831_v55 }
  0xb8   :  { %3807 = vmatpush.bf16.msra.mxu2 %v6994_v26  ;;  %v10295_v59 = vld [vmem:[#allocation8 + $0x324] sm:$0xf]  ;;  %v7087_v60 = vld [vmem:[#allocation8 + $0x330] sm:$0xf0]  ;;  %v6962_v2 = vor.u32 %v10263_v56, %v6959_v57 }
  0xb9   :  { %3821 = vmatpush.bf16.msra.mxu3 %v7122_v30  ;;  %v10195_v62 = vld [vmem:[#allocation8 + $0x4] sm:$0xf]  ;;  %v6687_v63 = vld [vmem:[#allocation8 + $0x10] sm:$0xf0]  ;;  %v7090_v6 = vor.u32 %v10295_v59, %v7087_v60 }
  0xba   :  { %3780 = vmatpush.bf16.msra.mxu0 %v6722_v48  ;;  %v10227_v3 = vld [vmem:[#allocation8 + $0x104] sm:$0xf]  ;;  %v6815_v4 = vld [vmem:[#allocation8 + $0x110] sm:$0xf0]  ;;  %v6690_v14 = vor.u32 %v10195_v62, %v6687_v63 }
  0xbb   :  { %3794 = vmatpush.bf16.msra.mxu1 %v6850_v49  ;;  %v10259_v5 = vld [vmem:[#allocation8 + $0x204] sm:$0xf]  ;;  %v6943_v7 = vld [vmem:[#allocation8 + $0x210] sm:$0xf0]  ;;  %v6818_v19 = vor.u32 %v10227_v3, %v6815_v4 }
  0xbc   :  { %3808 = vmatpush.bf16.msra.mxu2 %v6978_v50  ;;  %v10291_v8 = vld [vmem:[#allocation8 + $0x304] sm:$0xf]  ;;  %v7071_v9 = vld [vmem:[#allocation8 + $0x310] sm:$0xf0]  ;;  %v6946_v20 = vor.u32 %v10259_v5, %v6943_v7 }
  0xbd   :  { %3822 = vmatpush.bf16.msra.mxu3 %v7106_v54  ;;  %v10351_v11 = vld [vmem:[#allocation8 + $0x4e4] sm:$0xf]  ;;  %v7311_v12 = vld [vmem:[#allocation8 + $0x4f0] sm:$0xf0]  ;;  %v7074_v23 = vor.u32 %v10291_v8, %v7071_v9 }
  0xbe   :  { %v10383_v13 = vld [vmem:[#allocation8 + $0x5e4] sm:$0xf]  ;;  %3781 = vmatpush.bf16.msra.mxu0 %v6706_v61  ;;  %v7439_v15 = vld [vmem:[#allocation8 + $0x5f0] sm:$0xf0]  ;;  %v7314_v24 = vor.u32 %v10351_v11, %v7311_v12 }
  0xbf   :  { %v10415_v16 = vld [vmem:[#allocation8 + $0x6e4] sm:$0xf]  ;;  %v7567_v18 = vld [vmem:[#allocation8 + $0x6f0] sm:$0xf0]  ;;  %3795 = vmatpush.bf16.msra.mxu1 %v6834_v0  ;;  %v7442_v25 = vor.u32 %v10383_v13, %v7439_v15 }
  0xc0   :  { %3809 = vmatpush.bf16.msra.mxu2 %v6962_v2  ;;  %v10447_v21 = vld [vmem:[#allocation8 + $0x7e4] sm:$0xf]  ;;  %v7695_v22 = vld [vmem:[#allocation8 + $0x7f0] sm:$0xf0]  ;;  %v7570_v26 = vor.u32 %v10415_v16, %v7567_v18 }
  0xc1   :  { %3823 = vmatpush.bf16.msra.mxu3 %v7090_v6  ;;  %v10347_v27 = vld [vmem:[#allocation8 + $0x4c4] sm:$0xf]  ;;  %v7295_v28 = vld [vmem:[#allocation8 + $0x4d0] sm:$0xf0]  ;;  %v7698_v30 = vor.u32 %v10447_v21, %v7695_v22 }
  0xc2   :  { %v10379_v29 = vld [vmem:[#allocation8 + $0x5c4] sm:$0xf]  ;;  %3782 = vmatpush.bf16.msra.mxu0 %v6690_v14  ;;  %v7423_v33 = vld [vmem:[#allocation8 + $0x5d0] sm:$0xf0]  ;;  %v7298_v48 = vor.u32 %v10347_v27, %v7295_v28 }
  0xc3   :  { %v10411_v34 = vld [vmem:[#allocation8 + $0x6c4] sm:$0xf]  ;;  %v7551_v37 = vld [vmem:[#allocation8 + $0x6d0] sm:$0xf0]  ;;  %3796 = vmatpush.bf16.msra.mxu1 %v6818_v19  ;;  %v7426_v49 = vor.u32 %v10379_v29, %v7423_v33 }
  0xc4   :  { %3810 = vmatpush.bf16.msra.mxu2 %v6946_v20  ;;  %v10443_v42 = vld [vmem:[#allocation8 + $0x7c4] sm:$0xf]  ;;  %v7679_v45 = vld [vmem:[#allocation8 + $0x7d0] sm:$0xf0]  ;;  %v7554_v50 = vor.u32 %v10411_v34, %v7551_v37 }
  0xc5   :  { %3824 = vmatpush.bf16.msra.mxu3 %v7074_v23  ;;  %v10343_v51 = vld [vmem:[#allocation8 + $0x4a4] sm:$0xf]  ;;  %v7279_v52 = vld [vmem:[#allocation8 + $0x4b0] sm:$0xf0]  ;;  %v7682_v54 = vor.u32 %v10443_v42, %v7679_v45  ;;  %3783 = vmatmul.bf16.vlgmr.msra.gmra.mxu0 %v11042_v58 }
  0xc6   :  { %3831 = vmatpush.bf16.msrb.mxu0 %v7314_v24  ;;  %v10375_v53 = vld [vmem:[#allocation8 + $0x5a4] sm:$0xf]  ;;  %v7407_v55 = vld [vmem:[#allocation8 + $0x5b0] sm:$0xf0]  ;;  %3797 = vmatmul.bf16.vlgmr.msra.gmra.mxu1 %v11048_v10  ;;  %v7282_v61 = vor.u32 %v10343_v51, %v7279_v52 }
  0xc7   :  { %3845 = vmatpush.bf16.msrb.mxu1 %v7442_v25  ;;  %v10407_v56 = vld [vmem:[#allocation8 + $0x6a4] sm:$0xf]  ;;  %v7535_v57 = vld [vmem:[#allocation8 + $0x6b0] sm:$0xf0]  ;;  %3811 = vmatmul.bf16.vlgmr.msra.gmra.mxu2 %v11044_v1  ;;  %v7410_v62 = vor.u32 %v10375_v53, %v7407_v55  ;;  %v3574_v25 = vpop.f32.mrf.mxu1 }
  0xc8   :  { %3859 = vmatpush.bf16.msrb.mxu2 %v7570_v26  ;;  %v10439_v59 = vld [vmem:[#allocation8 + $0x7a4] sm:$0xf]  ;;  %v7663_v60 = vld [vmem:[#allocation8 + $0x7b0] sm:$0xf0]  ;;  %3825 = vmatmul.bf16.vlgmr.msra.gmra.mxu3 %v11050_v17  ;;  %v7538_v63 = vor.u32 %v10407_v56, %v7535_v57  ;;  %v3560_v24 = vpop.f32.mrf.mxu0 }
  0xc9   :  { %3873 = vmatpush.bf16.msrb.mxu3 %v7698_v30  ;;  %v10339_v0 = vld [vmem:[#allocation8 + $0x484] sm:$0xf]  ;;  %v7263_v2 = vld [vmem:[#allocation8 + $0x490] sm:$0xf0]  ;;  %v7666_v4 = vor.u32 %v10439_v59, %v7663_v60  ;;  %v3575_v27 = vadd.f32 %v3574_v25, %v3560_v24 }
  0xca   :  { %3832 = vmatpush.bf16.msrb.mxu0 %v7298_v48  ;;  %v10371_v3 = vld [vmem:[#allocation8 + $0x584] sm:$0xf]  ;;  %v7391_v5 = vld [vmem:[#allocation8 + $0x590] sm:$0xf0]  ;;  %v7266_v11 = vor.u32 %v10339_v0, %v7263_v2  ;;  %v3602_v0 = vpop.f32.mrf.mxu3 }
  0xcb   :  { %3846 = vmatpush.bf16.msrb.mxu1 %v7426_v49  ;;  %v10403_v6 = vld [vmem:[#allocation8 + $0x684] sm:$0xf]  ;;  %v7519_v7 = vld [vmem:[#allocation8 + $0x690] sm:$0xf0]  ;;  %v7394_v12 = vor.u32 %v10371_v3, %v7391_v5  ;;  %v3588_v49 = vpop.f32.mrf.mxu2 }
  0xcc   :  { %3860 = vmatpush.bf16.msrb.mxu2 %v7554_v50  ;;  %v10435_v8 = vld [vmem:[#allocation8 + $0x784] sm:$0xf]  ;;  %v7647_v9 = vld [vmem:[#allocation8 + $0x790] sm:$0xf0]  ;;  %v7522_v13 = vor.u32 %v10403_v6, %v7519_v7  ;;  %v3589_v52 = vadd.f32 %v3588_v49, %v3575_v27 }
  0xcd   :  { %3874 = vmatpush.bf16.msrb.mxu3 %v7682_v54  ;;  %v10335_v14 = vld [vmem:[#allocation8 + $0x464] sm:$0xf]  ;;  %v7247_v15 = vld [vmem:[#allocation8 + $0x470] sm:$0xf0]  ;;  %v7650_v18 = vor.u32 %v10435_v8, %v7647_v9 }
  0xce   :  { %3833 = vmatpush.bf16.msrb.mxu0 %v7282_v61  ;;  %v10367_v16 = vld [vmem:[#allocation8 + $0x564] sm:$0xf]  ;;  %v7375_v19 = vld [vmem:[#allocation8 + $0x570] sm:$0xf0]  ;;  %v7250_v26 = vor.u32 %v10335_v14, %v7247_v15 }
  0xcf   :  { %3847 = vmatpush.bf16.msrb.mxu1 %v7410_v62  ;;  %v10399_v20 = vld [vmem:[#allocation8 + $0x664] sm:$0xf]  ;;  %v7503_v21 = vld [vmem:[#allocation8 + $0x670] sm:$0xf0]  ;;  %v7378_v28 = vor.u32 %v10367_v16, %v7375_v19 }
  0xd0   :  { %3861 = vmatpush.bf16.msrb.mxu2 %v7538_v63  ;;  %v10431_v22 = vld [vmem:[#allocation8 + $0x764] sm:$0xf]  ;;  %v7631_v23 = vld [vmem:[#allocation8 + $0x770] sm:$0xf0]  ;;  %v7506_v29 = vor.u32 %v10399_v20, %v7503_v21 }
  0xd1   :  { %3875 = vmatpush.bf16.msrb.mxu3 %v7666_v4  ;;  %v10331_v30 = vld [vmem:[#allocation8 + $0x444] sm:$0xf]  ;;  %v7231_v33 = vld [vmem:[#allocation8 + $0x450] sm:$0xf0]  ;;  %v7634_v37 = vor.u32 %v10431_v22, %v7631_v23  ;;  %v11094_v4 = vadd.f32 %v3602_v0, %v3589_v52 }
  0xd2   :  { %3834 = vmatpush.bf16.msrb.mxu0 %v7266_v11  ;;  %v10363_v34 = vld [vmem:[#allocation8 + $0x544] sm:$0xf]  ;;  %v7359_v42 = vld [vmem:[#allocation8 + $0x550] sm:$0xf0]  ;;  %v7234_v53 = vor.u32 %v10331_v30, %v7231_v33 }
  0xd3   :  { %3848 = vmatpush.bf16.msrb.mxu1 %v7394_v12  ;;  %v10395_v45 = vld [vmem:[#allocation8 + $0x644] sm:$0xf]  ;;  %v7487_v48 = vld [vmem:[#allocation8 + $0x650] sm:$0xf0]  ;;  %v7362_v54 = vor.u32 %v10363_v34, %v7359_v42  ;;  %v11096_v42 = vpop.f32.mrf.mxu0 }
  0xd4   :  { %3862 = vmatpush.bf16.msrb.mxu2 %v7522_v13  ;;  %v10427_v50 = vld [vmem:[#allocation8 + $0x744] sm:$0xf]  ;;  %v7615_v51 = vld [vmem:[#allocation8 + $0x750] sm:$0xf0]  ;;  %v7490_v55 = vor.u32 %v10395_v45, %v7487_v48 }
  0xd5   :  { %3876 = vmatpush.bf16.msrb.mxu3 %v7650_v18  ;;  %v10327_v56 = vld [vmem:[#allocation8 + $0x424] sm:$0xf]  ;;  %v7215_v57 = vld [vmem:[#allocation8 + $0x430] sm:$0xf0]  ;;  %v7618_v60 = vor.u32 %v10427_v50, %v7615_v51 }
  0xd6   :  { %3835 = vmatpush.bf16.msrb.mxu0 %v7250_v26  ;;  %v10359_v59 = vld [vmem:[#allocation8 + $0x524] sm:$0xf]  ;;  %v7343_v61 = vld [vmem:[#allocation8 + $0x530] sm:$0xf0]  ;;  %v7218_v5 = vor.u32 %v10327_v56, %v7215_v57  ;;  %v11098_v56 = vpop.f32.mrf.mxu1 }
  0xd7   :  { %3849 = vmatpush.bf16.msrb.mxu1 %v7378_v28  ;;  %v10391_v62 = vld [vmem:[#allocation8 + $0x624] sm:$0xf]  ;;  %v7471_v63 = vld [vmem:[#allocation8 + $0x630] sm:$0xf0]  ;;  %v7346_v8 = vor.u32 %v10359_v59, %v7343_v61 }
  0xd8   :  { %3863 = vmatpush.bf16.msrb.mxu2 %v7506_v29  ;;  %v10423_v2 = vld [vmem:[#allocation8 + $0x724] sm:$0xf]  ;;  %v7599_v3 = vld [vmem:[#allocation8 + $0x730] sm:$0xf0]  ;;  %v7474_v9 = vor.u32 %v10391_v62, %v7471_v63 }
  0xd9   :  { %3877 = vmatpush.bf16.msrb.mxu3 %v7634_v37  ;;  %v10323_v6 = vld [vmem:[#allocation8 + $0x404] sm:$0xf]  ;;  %v7199_v7 = vld [vmem:[#allocation8 + $0x410] sm:$0xf0]  ;;  %v7602_v14 = vor.u32 %v10423_v2, %v7599_v3 }
  0xda   :  { %3836 = vmatpush.bf16.msrb.mxu0 %v7234_v53  ;;  %v10355_v11 = vld [vmem:[#allocation8 + $0x504] sm:$0xf]  ;;  %v7327_v12 = vld [vmem:[#allocation8 + $0x510] sm:$0xf0]  ;;  %v7202_v22 = vor.u32 %v10323_v6, %v7199_v7 }
  0xdb   :  { %3850 = vmatpush.bf16.msrb.mxu1 %v7362_v54  ;;  %v10387_v13 = vld [vmem:[#allocation8 + $0x604] sm:$0xf]  ;;  %v7455_v15 = vld [vmem:[#allocation8 + $0x610] sm:$0xf0]  ;;  %v7330_v26 = vor.u32 %v10355_v11, %v7327_v12 }
  0xdc   :  { %3864 = vmatpush.bf16.msrb.mxu2 %v7490_v55  ;;  %v10419_v16 = vld [vmem:[#allocation8 + $0x704] sm:$0xf]  ;;  %v7583_v18 = vld [vmem:[#allocation8 + $0x710] sm:$0xf0]  ;;  %v7458_v27 = vor.u32 %v10387_v13, %v7455_v15 }
  0xdd   :  { %3878 = vmatpush.bf16.msrb.mxu3 %v7618_v60  ;;  %v10479_v19 = vld [vmem:[#allocation8 + $0x8e4] sm:$0xf]  ;;  %v7823_v20 = vld [vmem:[#allocation8 + $0x8f0] sm:$0xf0]  ;;  %v7586_v30 = vor.u32 %v10419_v16, %v7583_v18  ;;  %v11106_v18 = vpop.f32.mrf.mxu3 }
  0xde   :  { %v10511_v21 = vld [vmem:[#allocation8 + $0x9e4] sm:$0xf]  ;;  %3837 = vmatpush.bf16.msrb.mxu0 %v7218_v5  ;;  %v7951_v23 = vld [vmem:[#allocation8 + $0x9f0] sm:$0xf0]  ;;  %v7826_v33 = vor.u32 %v10479_v19, %v7823_v20 }
  0xdf   :  { %v10543_v24 = vld [vmem:[#allocation8 + $0xae4] sm:$0xf]  ;;  %v8079_v25 = vld [vmem:[#allocation8 + $0xaf0] sm:$0xf0]  ;;  %3851 = vmatpush.bf16.msrb.mxu1 %v7346_v8  ;;  %v7954_v34 = vor.u32 %v10511_v21, %v7951_v23 }
  0xe0   :  { %3865 = vmatpush.bf16.msrb.mxu2 %v7474_v9  ;;  %v10575_v28 = vld [vmem:[#allocation8 + $0xbe4] sm:$0xf]  ;;  %v8207_v29 = vld [vmem:[#allocation8 + $0xbf0] sm:$0xf0]  ;;  %v8082_v37 = vor.u32 %v10543_v24, %v8079_v25  ;;  %v11104_v9 = vpop.f32.mrf.mxu2 }
  0xe1   :  { %3879 = vmatpush.bf16.msrb.mxu3 %v7602_v14  ;;  %v10475_v45 = vld [vmem:[#allocation8 + $0x8c4] sm:$0xf]  ;;  %v7807_v48 = vld [vmem:[#allocation8 + $0x8d0] sm:$0xf0]  ;;  %v8210_v50 = vor.u32 %v10575_v28, %v8207_v29  ;;  %v3630_v29 = vpop.f32.mrf.mxu1 }
  0xe2   :  { %v10507_v49 = vld [vmem:[#allocation8 + $0x9c4] sm:$0xf]  ;;  %3838 = vmatpush.bf16.msrb.mxu0 %v7202_v22  ;;  %v7935_v51 = vld [vmem:[#allocation8 + $0x9d0] sm:$0xf0]  ;;  %v7810_v57 = vor.u32 %v10475_v45, %v7807_v48 }
  0xe3   :  { %v10539_v52 = vld [vmem:[#allocation8 + $0xac4] sm:$0xf]  ;;  %v8063_v53 = vld [vmem:[#allocation8 + $0xad0] sm:$0xf0]  ;;  %3852 = vmatpush.bf16.msrb.mxu1 %v7330_v26  ;;  %v7938_v59 = vor.u32 %v10507_v49, %v7935_v51 }
  0xe4   :  { %3866 = vmatpush.bf16.msrb.mxu2 %v7458_v27  ;;  %v10571_v54 = vld [vmem:[#allocation8 + $0xbc4] sm:$0xf]  ;;  %v8191_v55 = vld [vmem:[#allocation8 + $0xbd0] sm:$0xf0]  ;;  %v8066_v60 = vor.u32 %v10539_v52, %v8063_v53  ;;  %v3616_v22 = vpop.f32.mrf.mxu0 }
  0xe5   :  { %3880 = vmatpush.bf16.msrb.mxu3 %v7586_v30  ;;  %v10471_v61 = vld [vmem:[#allocation8 + $0x8a4] sm:$0xf]  ;;  %v7791_v62 = vld [vmem:[#allocation8 + $0x8b0] sm:$0xf0]  ;;  %3839 = vmatmul.bf16.vlgmr.msrb.gmra.mxu0 %v11054_v39  ;;  %v8194_v0 = vor.u32 %v10571_v54, %v8191_v55  ;;  %v3617_v25 = vadd.f32 %v3616_v22, %v11094_v4 }
  0xe6   :  { %3887 = vmatpush.bf16.msra.mxu0 %v7826_v33  ;;  %v10503_v63 = vld [vmem:[#allocation8 + $0x9a4] sm:$0xf]  ;;  %v7919_v2 = vld [vmem:[#allocation8 + $0x9b0] sm:$0xf0]  ;;  %3853 = vmatmul.bf16.vlgmr.msrb.gmra.mxu1 %v11058_v44  ;;  %v7794_v8 = vor.u32 %v10471_v61, %v7791_v62 }
  0xe7   :  { %3901 = vmatpush.bf16.msra.mxu1 %v7954_v34  ;;  %v10535_v3 = vld [vmem:[#allocation8 + $0xaa4] sm:$0xf]  ;;  %v8047_v5 = vld [vmem:[#allocation8 + $0xab0] sm:$0xf0]  ;;  %3867 = vmatmul.bf16.vlgmr.msrb.gmra.mxu2 %v11056_v43  ;;  %v7922_v11 = vor.u32 %v10503_v63, %v7919_v2  ;;  %v3631_v45 = vadd.f32 %v3630_v29, %v3617_v25 }
  0xe8   :  { %3915 = vmatpush.bf16.msra.mxu2 %v8082_v37  ;;  %v10567_v6 = vld [vmem:[#allocation8 + $0xba4] sm:$0xf]  ;;  %v8175_v7 = vld [vmem:[#allocation8 + $0xbb0] sm:$0xf0]  ;;  %3881 = vmatmul.bf16.vlgmr.msrb.gmra.mxu3 %v11060_v47  ;;  %v8050_v12 = vor.u32 %v10535_v3, %v8047_v5  ;;  %v3644_v61 = vpop.f32.mrf.mxu2 }
  0xe9   :  { %3929 = vmatpush.bf16.msra.mxu3 %v8210_v50  ;;  %v10467_v13 = vld [vmem:[#allocation8 + $0x884] sm:$0xf]  ;;  %v7775_v14 = vld [vmem:[#allocation8 + $0x890] sm:$0xf0]  ;;  %v8178_v16 = vor.u32 %v10567_v6, %v8175_v7  ;;  %v3645_v2 = vadd.f32 %v3644_v61, %v3631_v45  ;;  %v3658_v6 = vpop.f32.mrf.mxu3 }
  0xea   :  { %3888 = vmatpush.bf16.msra.mxu0 %v7810_v57  ;;  %v10499_v15 = vld [vmem:[#allocation8 + $0x984] sm:$0xf]  ;;  %v7903_v19 = vld [vmem:[#allocation8 + $0x990] sm:$0xf0]  ;;  %v7778_v26 = vor.u32 %v10467_v13, %v7775_v14 }
  0xeb   :  { %3902 = vmatpush.bf16.msra.mxu1 %v7938_v59  ;;  %v10531_v20 = vld [vmem:[#allocation8 + $0xa84] sm:$0xf]  ;;  %v8031_v21 = vld [vmem:[#allocation8 + $0xa90] sm:$0xf0]  ;;  %v7906_v27 = vor.u32 %v10499_v15, %v7903_v19 }
  0xec   :  { %3916 = vmatpush.bf16.msra.mxu2 %v8066_v60  ;;  %v10563_v23 = vld [vmem:[#allocation8 + $0xb84] sm:$0xf]  ;;  %v8159_v24 = vld [vmem:[#allocation8 + $0xb90] sm:$0xf0]  ;;  %v8034_v28 = vor.u32 %v10531_v20, %v8031_v21 }
  0xed   :  { %3930 = vmatpush.bf16.msra.mxu3 %v8194_v0  ;;  %v10463_v30 = vld [vmem:[#allocation8 + $0x864] sm:$0xf]  ;;  %v7759_v33 = vld [vmem:[#allocation8 + $0x870] sm:$0xf0]  ;;  %v8162_v37 = vor.u32 %v10563_v23, %v8159_v24 }
  0xee   :  { %3889 = vmatpush.bf16.msra.mxu0 %v7794_v8  ;;  %v10495_v34 = vld [vmem:[#allocation8 + $0x964] sm:$0xf]  ;;  %v7887_v48 = vld [vmem:[#allocation8 + $0x970] sm:$0xf0]  ;;  %v7762_v53 = vor.u32 %v10463_v30, %v7759_v33  ;;  %v11109_v8 = vadd.f32 %v3658_v6, %v3645_v2 }
  0xef   :  { %3903 = vmatpush.bf16.msra.mxu1 %v7922_v11  ;;  %v10527_v49 = vld [vmem:[#allocation8 + $0xa64] sm:$0xf]  ;;  %v8015_v50 = vld [vmem:[#allocation8 + $0xa70] sm:$0xf0]  ;;  %v7890_v4 = vor.u32 %v10495_v34, %v7887_v48 }
  0xf0   :  { %3917 = vmatpush.bf16.msra.mxu2 %v8050_v12  ;;  %v10559_v51 = vld [vmem:[#allocation8 + $0xb64] sm:$0xf]  ;;  %v8143_v52 = vld [vmem:[#allocation8 + $0xb70] sm:$0xf0]  ;;  %v8018_v54 = vor.u32 %v10527_v49, %v8015_v50 }
  0xf1   :  { %3931 = vmatpush.bf16.msra.mxu3 %v8178_v16  ;;  %v10459_v55 = vld [vmem:[#allocation8 + $0x844] sm:$0xf]  ;;  %v7743_v57 = vld [vmem:[#allocation8 + $0x850] sm:$0xf0]  ;;  %v8146_v60 = vor.u32 %v10559_v51, %v8143_v52 }
  0xf2   :  { %3890 = vmatpush.bf16.msra.mxu0 %v7778_v26  ;;  %v10491_v59 = vld [vmem:[#allocation8 + $0x944] sm:$0xf]  ;;  %v7871_v62 = vld [vmem:[#allocation8 + $0x950] sm:$0xf0]  ;;  %v7746_v7 = vor.u32 %v10459_v55, %v7743_v57 }
  0xf3   :  { %3904 = vmatpush.bf16.msra.mxu1 %v7906_v27  ;;  %v10523_v63 = vld [vmem:[#allocation8 + $0xa44] sm:$0xf]  ;;  %v7999_v0 = vld [vmem:[#allocation8 + $0xa50] sm:$0xf0]  ;;  %v7874_v11 = vor.u32 %v10491_v59, %v7871_v62 }
  0xf4   :  { %3918 = vmatpush.bf16.msra.mxu2 %v8034_v28  ;;  %v10555_v3 = vld [vmem:[#allocation8 + $0xb44] sm:$0xf]  ;;  %v8127_v5 = vld [vmem:[#allocation8 + $0xb50] sm:$0xf0]  ;;  %v8002_v12 = vor.u32 %v10523_v63, %v7999_v0 }
  0xf5   :  { %3932 = vmatpush.bf16.msra.mxu3 %v8162_v37  ;;  %v10455_v13 = vld [vmem:[#allocation8 + $0x824] sm:$0xf]  ;;  %v7727_v14 = vld [vmem:[#allocation8 + $0x830] sm:$0xf0]  ;;  %v8130_v16 = vor.u32 %v10555_v3, %v8127_v5 }
  0xf6   :  { %3891 = vmatpush.bf16.msra.mxu0 %v7762_v53  ;;  %v10487_v15 = vld [vmem:[#allocation8 + $0x924] sm:$0xf]  ;;  %v7855_v19 = vld [vmem:[#allocation8 + $0x930] sm:$0xf0]  ;;  %v7730_v24 = vor.u32 %v10455_v13, %v7727_v14  ;;  %v11111_v13 = vpop.f32.mrf.mxu0 }
  0xf7   :  { %3905 = vmatpush.bf16.msra.mxu1 %v7890_v4  ;;  %v10519_v20 = vld [vmem:[#allocation8 + $0xa24] sm:$0xf]  ;;  %v7983_v21 = vld [vmem:[#allocation8 + $0xa30] sm:$0xf0]  ;;  %v7858_v27 = vor.u32 %v10487_v15, %v7855_v19 }
  0xf8   :  { %3919 = vmatpush.bf16.msra.mxu2 %v8018_v54  ;;  %v10551_v22 = vld [vmem:[#allocation8 + $0xb24] sm:$0xf]  ;;  %v8111_v23 = vld [vmem:[#allocation8 + $0xb30] sm:$0xf0]  ;;  %v7986_v28 = vor.u32 %v10519_v20, %v7983_v21 }
  0xf9   :  { %3933 = vmatpush.bf16.msra.mxu3 %v8146_v60  ;;  %v10451_v25 = vld [vmem:[#allocation8 + $0x804] sm:$0xf]  ;;  %v7711_v26 = vld [vmem:[#allocation8 + $0x810] sm:$0xf0]  ;;  %v8114_v34 = vor.u32 %v10551_v22, %v8111_v23 }
  0xfa   :  { %3892 = vmatpush.bf16.msra.mxu0 %v7746_v7  ;;  %v10483_v29 = vld [vmem:[#allocation8 + $0x904] sm:$0xf]  ;;  %v7839_v30 = vld [vmem:[#allocation8 + $0x910] sm:$0xf0]  ;;  %v7714_v52 = vor.u32 %v10451_v25, %v7711_v26 }
  0xfb   :  { %3906 = vmatpush.bf16.msra.mxu1 %v7874_v11  ;;  %v10515_v33 = vld [vmem:[#allocation8 + $0xa04] sm:$0xf]  ;;  %v7967_v37 = vld [vmem:[#allocation8 + $0xa10] sm:$0xf0]  ;;  %v7842_v55 = vor.u32 %v10483_v29, %v7839_v30 }
  0xfc   :  { %3920 = vmatpush.bf16.msra.mxu2 %v8002_v12  ;;  %v10547_v45 = vld [vmem:[#allocation8 + $0xb04] sm:$0xf]  ;;  %v8095_v48 = vld [vmem:[#allocation8 + $0xb10] sm:$0xf0]  ;;  %v7970_v57 = vor.u32 %v10515_v33, %v7967_v37 }
  0xfd   :  { %3934 = vmatpush.bf16.msra.mxu3 %v8130_v16  ;;  %v10607_v49 = vld [vmem:[#allocation8 + $0xce4] sm:$0xf]  ;;  %v8335_v50 = vld [vmem:[#allocation8 + $0xcf0] sm:$0xf0]  ;;  %v8098_v61 = vor.u32 %v10547_v45, %v8095_v48  ;;  %v11113_v16 = vpop.f32.mrf.mxu1 }
  0xfe   :  { %v10639_v51 = vld [vmem:[#allocation8 + $0xde4] sm:$0xf]  ;;  %3893 = vmatpush.bf16.msra.mxu0 %v7730_v24  ;;  %v8463_v53 = vld [vmem:[#allocation8 + $0xdf0] sm:$0xf0]  ;;  %v8338_v62 = vor.u32 %v10607_v49, %v8335_v50  ;;  %v11119_v50 = vpop.f32.mrf.mxu2 }
  0xff   :  { %v10671_v4 = vld [vmem:[#allocation8 + $0xee4] sm:$0xf]  ;;  %v8591_v54 = vld [vmem:[#allocation8 + $0xef0] sm:$0xf0]  ;;  %3907 = vmatpush.bf16.msra.mxu1 %v7858_v27  ;;  %v8466_v63 = vor.u32 %v10639_v51, %v8463_v53 }
 0x100   :  { %3921 = vmatpush.bf16.msra.mxu2 %v7986_v28  ;;  %v10703_v59 = vld [vmem:[#allocation8 + $0xfe4] sm:$0xf]  ;;  %v8719_v60 = vld [vmem:[#allocation8 + $0xff0] sm:$0xf0]  ;;  %v8594_v0 = vor.u32 %v10671_v4, %v8591_v54  ;;  %v11121_v54 = vpop.f32.mrf.mxu3 }
 0x101   :  { %3935 = vmatpush.bf16.msra.mxu3 %v8114_v34  ;;  %v10603_v2 = vld [vmem:[#allocation8 + $0xcc4] sm:$0xf]  ;;  %v8319_v3 = vld [vmem:[#allocation8 + $0xcd0] sm:$0xf0]  ;;  %v8722_v6 = vor.u32 %v10703_v59, %v8719_v60 }
 0x102   :  { %v10635_v5 = vld [vmem:[#allocation8 + $0xdc4] sm:$0xf]  ;;  %3894 = vmatpush.bf16.msra.mxu0 %v7714_v52  ;;  %v8447_v7 = vld [vmem:[#allocation8 + $0xdd0] sm:$0xf0]  ;;  %v8322_v19 = vor.u32 %v10603_v2, %v8319_v3 }
 0x103   :  { %v10667_v11 = vld [vmem:[#allocation8 + $0xec4] sm:$0xf]  ;;  %v8575_v12 = vld [vmem:[#allocation8 + $0xed0] sm:$0xf0]  ;;  %3908 = vmatpush.bf16.msra.mxu1 %v7842_v55  ;;  %v8450_v20 = vor.u32 %v10635_v5, %v8447_v7 }
 0x104   :  { %3922 = vmatpush.bf16.msra.mxu2 %v7970_v57  ;;  %v10699_v14 = vld [vmem:[#allocation8 + $0xfc4] sm:$0xf]  ;;  %v8703_v15 = vld [vmem:[#allocation8 + $0xfd0] sm:$0xf0]  ;;  %v8578_v21 = vor.u32 %v10667_v11, %v8575_v12 }
 0x105   :  { %3936 = vmatpush.bf16.msra.mxu3 %v8098_v61  ;;  %v10599_v22 = vld [vmem:[#allocation8 + $0xca4] sm:$0xf]  ;;  %v8303_v23 = vld [vmem:[#allocation8 + $0xcb0] sm:$0xf0]  ;;  %3895 = vmatmul.bf16.vlgmr.msra.gmra.mxu0 %v11066_v31  ;;  %v8706_v25 = vor.u32 %v10699_v14, %v8703_v15 }
 0x106   :  { %3943 = vmatpush.bf16.msrb.mxu0 %v8338_v62  ;;  %v10631_v24 = vld [vmem:[#allocation8 + $0xda4] sm:$0xf]  ;;  %v8431_v26 = vld [vmem:[#allocation8 + $0xdb0] sm:$0xf0]  ;;  %3909 = vmatmul.bf16.vlgmr.msra.gmra.mxu1 %v11070_v36  ;;  %v8306_v33 = vor.u32 %v10599_v22, %v8303_v23  ;;  %v3672_v55 = vpop.f32.mrf.mxu0  ;;  %v3686_v62 = vpop.f32.mrf.mxu1 }
 0x107   :  { %3957 = vmatpush.bf16.msrb.mxu1 %v8466_v63  ;;  %v10663_v27 = vld [vmem:[#allocation8 + $0xea4] sm:$0xf]  ;;  %v8559_v28 = vld [vmem:[#allocation8 + $0xeb0] sm:$0xf0]  ;;  %3923 = vmatmul.bf16.vlgmr.msra.gmra.mxu2 %v11068_v35  ;;  %v8434_v34 = vor.u32 %v10631_v24, %v8431_v26  ;;  %v3673_v60 = vadd.f32 %v3672_v55, %v11109_v8 }
 0x108   :  { %3971 = vmatpush.bf16.msrb.mxu2 %v8594_v0  ;;  %v10695_v29 = vld [vmem:[#allocation8 + $0xfa4] sm:$0xf]  ;;  %v8687_v30 = vld [vmem:[#allocation8 + $0xfb0] sm:$0xf0]  ;;  %3937 = vmatmul.bf16.vlgmr.msra.gmra.mxu3 %v11072_v40  ;;  %v8562_v37 = vor.u32 %v10663_v27, %v8559_v28  ;;  %v3700_v26 = vpop.f32.mrf.mxu2 }
 0x109   :  { %3985 = vmatpush.bf16.msrb.mxu3 %v8722_v6  ;;  %v10595_v45 = vld [vmem:[#allocation8 + $0xc84] sm:$0xf]  ;;  %v8287_v48 = vld [vmem:[#allocation8 + $0xc90] sm:$0xf0]  ;;  %v8690_v51 = vor.u32 %v10695_v29, %v8687_v30  ;;  %v3687_v7 = vadd.f32 %v3686_v62, %v3673_v60 }
 0x10a   :  { %3944 = vmatpush.bf16.msrb.mxu0 %v8322_v19  ;;  %v10627_v49 = vld [vmem:[#allocation8 + $0xd84] sm:$0xf]  ;;  %v8415_v52 = vld [vmem:[#allocation8 + $0xd90] sm:$0xf0]  ;;  %v8290_v61 = vor.u32 %v10595_v45, %v8287_v48 }
 0x10b   :  { %3958 = vmatpush.bf16.msrb.mxu1 %v8450_v20  ;;  %v10659_v53 = vld [vmem:[#allocation8 + $0xe84] sm:$0xf]  ;;  %v8543_v4 = vld [vmem:[#allocation8 + $0xe90] sm:$0xf0]  ;;  %v8418_v63 = vor.u32 %v10627_v49, %v8415_v52  ;;  %v3701_v30 = vadd.f32 %v3700_v26, %v3687_v7 }
 0x10c   :  { %3972 = vmatpush.bf16.msrb.mxu2 %v8578_v21  ;;  %v10691_v57 = vld [vmem:[#allocation8 + $0xf84] sm:$0xf]  ;;  %v8671_v59 = vld [vmem:[#allocation8 + $0xf90] sm:$0xf0]  ;;  %v8546_v0 = vor.u32 %v10659_v53, %v8543_v4 }
 0x10d   :  { %3986 = vmatpush.bf16.msrb.mxu3 %v8706_v25  ;;  %v10591_v2 = vld [vmem:[#allocation8 + $0xc64] sm:$0xf]  ;;  %v8271_v3 = vld [vmem:[#allocation8 + $0xc70] sm:$0xf0]  ;;  %v8674_v6 = vor.u32 %v10691_v57, %v8671_v59 }
 0x10e   :  { %3945 = vmatpush.bf16.msrb.mxu0 %v8306_v33  ;;  %v10623_v5 = vld [vmem:[#allocation8 + $0xd64] sm:$0xf]  ;;  %v8399_v11 = vld [vmem:[#allocation8 + $0xd70] sm:$0xf0]  ;;  %v8274_v20 = vor.u32 %v10591_v2, %v8271_v3  ;;  %v3714_v33 = vpop.f32.mrf.mxu3 }
 0x10f   :  { %3959 = vmatpush.bf16.msrb.mxu1 %v8434_v34  ;;  %v10655_v12 = vld [vmem:[#allocation8 + $0xe64] sm:$0xf]  ;;  %v8527_v14 = vld [vmem:[#allocation8 + $0xe70] sm:$0xf0]  ;;  %v8402_v8 = vor.u32 %v10623_v5, %v8399_v11  ;;  %v11124_v48 = vadd.f32 %v3714_v33, %v3701_v30 }
 0x110   :  { %3973 = vmatpush.bf16.msrb.mxu2 %v8562_v37  ;;  %v10687_v15 = vld [vmem:[#allocation8 + $0xf64] sm:$0xf]  ;;  %v8655_v19 = vld [vmem:[#allocation8 + $0xf70] sm:$0xf0]  ;;  %v8530_v21 = vor.u32 %v10655_v12, %v8527_v14 }
 0x111   :  { %3987 = vmatpush.bf16.msrb.mxu3 %v8690_v51  ;;  %v10587_v22 = vld [vmem:[#allocation8 + $0xc44] sm:$0xf]  ;;  %v8255_v23 = vld [vmem:[#allocation8 + $0xc50] sm:$0xf0]  ;;  %v8658_v25 = vor.u32 %v10687_v15, %v8655_v19 }
 0x112   :  { %3946 = vmatpush.bf16.msrb.mxu0 %v8290_v61  ;;  %v10619_v24 = vld [vmem:[#allocation8 + $0xd44] sm:$0xf]  ;;  %v8383_v27 = vld [vmem:[#allocation8 + $0xd50] sm:$0xf0]  ;;  %v8258_v45 = vor.u32 %v10587_v22, %v8255_v23  ;;  %v10258_v23 = vld [vmem:[#allocation8 + $0x1f4] sm:$0xf0] }
 0x113   :  { %3960 = vmatpush.bf16.msrb.mxu1 %v8418_v63  ;;  %v10651_v28 = vld [vmem:[#allocation8 + $0xe44] sm:$0xf]  ;;  %v8511_v29 = vld [vmem:[#allocation8 + $0xe50] sm:$0xf0]  ;;  %v8386_v49 = vor.u32 %v10619_v24, %v8383_v27  ;;  %v7061_v24 = vld [vmem:[#allocation8 + $0x2e8] sm:$0xf] }
 0x114   :  { %3974 = vmatpush.bf16.msrb.mxu2 %v8546_v0  ;;  %v10683_v34 = vld [vmem:[#allocation8 + $0xf44] sm:$0xf]  ;;  %v8639_v37 = vld [vmem:[#allocation8 + $0xf50] sm:$0xf0]  ;;  %v8514_v51 = vor.u32 %v10651_v28, %v8511_v29  ;;  %v7189_v28 = vld [vmem:[#allocation8 + $0x3e8] sm:$0xf] }
 0x115   :  { %3988 = vmatpush.bf16.msrb.mxu3 %v8674_v6  ;;  %v10583_v52 = vld [vmem:[#allocation8 + $0xc24] sm:$0xf]  ;;  %v8239_v53 = vld [vmem:[#allocation8 + $0xc30] sm:$0xf0]  ;;  %v8642_v55 = vor.u32 %v10683_v34, %v8639_v37  ;;  %v10322_v29 = vld [vmem:[#allocation8 + $0x3f4] sm:$0xf0] }
 0x116   :  { %3947 = vmatpush.bf16.msrb.mxu0 %v8274_v20  ;;  %v10615_v4 = vld [vmem:[#allocation8 + $0xd24] sm:$0xf]  ;;  %v8367_v57 = vld [vmem:[#allocation8 + $0xd30] sm:$0xf0]  ;;  %v8242_v63 = vor.u32 %v10583_v52, %v8239_v53  ;;  %v6805_v20 = vld [vmem:[#allocation8 + $0xe8] sm:$0xf]  ;;  %v7190_v52 = vor.u32 %v10322_v29, %v7189_v28  ;;  %v11136_v29 = vpop.f32.mrf.mxu3 }
 0x117   :  { %3961 = vmatpush.bf16.msrb.mxu1 %v8402_v8  ;;  %v10647_v59 = vld [vmem:[#allocation8 + $0xe24] sm:$0xf]  ;;  %v8495_v60 = vld [vmem:[#allocation8 + $0xe30] sm:$0xf0]  ;;  %v8370_v3 = vor.u32 %v10615_v4, %v8367_v57  ;;  %v10226_v8 = vld [vmem:[#allocation8 + $0xf4] sm:$0xf0]  ;;  %v11126_v57 = vpop.f32.mrf.mxu0 }
 0x118   :  { %3975 = vmatpush.bf16.msrb.mxu2 %v8530_v21  ;;  %v10679_v61 = vld [vmem:[#allocation8 + $0xf24] sm:$0xf]  ;;  %v8623_v62 = vld [vmem:[#allocation8 + $0xf30] sm:$0xf0]  ;;  %v8498_v5 = vor.u32 %v10647_v59, %v8495_v60  ;;  %v6933_v21 = vld [vmem:[#allocation8 + $0x1e8] sm:$0xf]  ;;  %v6806_v33 = vor.u32 %v10226_v8, %v6805_v20 }
 0x119   :  { %3989 = vmatpush.bf16.msrb.mxu3 %v8658_v25  ;;  %v10579_v0 = vld [vmem:[#allocation8 + $0xc04] sm:$0xf]  ;;  %v8223_v2 = vld [vmem:[#allocation8 + $0xc10] sm:$0xf0]  ;;  %v8626_v12 = vor.u32 %v10679_v61, %v8623_v62  ;;  %v10290_v25 = vld [vmem:[#allocation8 + $0x2f4] sm:$0xf0]  ;;  %v6934_v34 = vor.u32 %v10258_v23, %v6933_v21  ;;  %v11128_v61 = vpop.f32.mrf.mxu1 }
 0x11a   :  { %3948 = vmatpush.bf16.msrb.mxu0 %v8258_v45  ;;  %v10611_v6 = vld [vmem:[#allocation8 + $0xd04] sm:$0xf]  ;;  %v8351_v7 = vld [vmem:[#allocation8 + $0xd10] sm:$0xf0]  ;;  %v8226_v22 = vor.u32 %v10579_v0, %v8223_v2  ;;  %v7062_v37 = vor.u32 %v10290_v25, %v7061_v24  ;;  %v6789_v45 = vld [vmem:[#allocation8 + $0xc8] sm:$0xf]  ;;  %v11134_v24 = vpop.f32.mrf.mxu2 }
 0x11b   :  { %3962 = vmatpush.bf16.msrb.mxu1 %v8386_v49  ;;  %v10643_v11 = vld [vmem:[#allocation8 + $0xe04] sm:$0xf]  ;;  %v8479_v14 = vld [vmem:[#allocation8 + $0xe10] sm:$0xf0]  ;;  %v8354_v26 = vor.u32 %v10611_v6, %v8351_v7  ;;  %v10222_v49 = vld [vmem:[#allocation8 + $0xd4] sm:$0xf0] }
 0x11c   :  { %3976 = vmatpush.bf16.msrb.mxu2 %v8514_v51  ;;  %v10675_v15 = vld [vmem:[#allocation8 + $0xf04] sm:$0xf]  ;;  %v8607_v19 = vld [vmem:[#allocation8 + $0xf10] sm:$0xf0]  ;;  %v8482_v27 = vor.u32 %v10643_v11, %v8479_v14  ;;  %v6917_v51 = vld [vmem:[#allocation8 + $0x1c8] sm:$0xf]  ;;  %v6790_v62 = vor.u32 %v10222_v49, %v6789_v45 }
 0x11d   :  { %3990 = vmatpush.bf16.msrb.mxu3 %v8642_v55  ;;  %v8610_v30 = vor.u32 %v10675_v15, %v8607_v19  ;;  %v10254_v53 = vld [vmem:[#allocation8 + $0x1d4] sm:$0xf0]  ;;  %v7045_v4 = vld [vmem:[#allocation8 + $0x2c8] sm:$0xf] }
 0x11e   :  { %3949 = vmatpush.bf16.msrb.mxu0 %v8242_v63  ;;  %v10286_v55 = vld [vmem:[#allocation8 + $0x2d4] sm:$0xf0]  ;;  %v7173_v59 = vld [vmem:[#allocation8 + $0x3c8] sm:$0xf]  ;;  %v6918_v63 = vor.u32 %v10254_v53, %v6917_v51 }
 0x11f   :  { %3963 = vmatpush.bf16.msrb.mxu1 %v8370_v3  ;;  %v10318_v60 = vld [vmem:[#allocation8 + $0x3d4] sm:$0xf0]  ;;  %v7046_v0 = vor.u32 %v10286_v55, %v7045_v4  ;;  %v6773_v2 = vld [vmem:[#allocation8 + $0xa8] sm:$0xf] }
 0x120   :  { %3977 = vmatpush.bf16.msrb.mxu2 %v8498_v5  ;;  %v10218_v3 = vld [vmem:[#allocation8 + $0xb4] sm:$0xf0]  ;;  %v6901_v5 = vld [vmem:[#allocation8 + $0x1a8] sm:$0xf]  ;;  %v7174_v6 = vor.u32 %v10318_v60, %v7173_v59 }
 0x121   :  { %3991 = vmatpush.bf16.msrb.mxu3 %v8626_v12  ;;  %v10250_v7 = vld [vmem:[#allocation8 + $0x1b4] sm:$0xf0]  ;;  %v7029_v11 = vld [vmem:[#allocation8 + $0x2a8] sm:$0xf]  ;;  %v6774_v19 = vor.u32 %v10218_v3, %v6773_v2 }
 0x122   :  { %3950 = vmatpush.bf16.msrb.mxu0 %v8226_v22  ;;  %v10282_v12 = vld [vmem:[#allocation8 + $0x2b4] sm:$0xf0]  ;;  %v7157_v14 = vld [vmem:[#allocation8 + $0x3a8] sm:$0xf]  ;;  %v6902_v20 = vor.u32 %v10250_v7, %v6901_v5 }
 0x123   :  { %3964 = vmatpush.bf16.msrb.mxu1 %v8354_v26  ;;  %v10314_v15 = vld [vmem:[#allocation8 + $0x3b4] sm:$0xf0]  ;;  %v7030_v8 = vor.u32 %v10282_v12, %v7029_v11  ;;  %v6757_v21 = vld [vmem:[#allocation8 + $0x88] sm:$0xf]  ;;  %v3742_v49 = vpop.f32.mrf.mxu1 }
 0x124   :  { %3978 = vmatpush.bf16.msrb.mxu2 %v8482_v27  ;;  %v10214_v22 = vld [vmem:[#allocation8 + $0x94] sm:$0xf0]  ;;  %v6885_v23 = vld [vmem:[#allocation8 + $0x188] sm:$0xf]  ;;  %v7158_v25 = vor.u32 %v10314_v15, %v7157_v14 }
 0x125   :  { %3992 = vmatpush.bf16.msrb.mxu3 %v8610_v30  ;;  %3951 = vmatmul.bf16.vlgmr.msrb.gmra.mxu0 %v11078_v32  ;;  %v10246_v26 = vld [vmem:[#allocation8 + $0x194] sm:$0xf0]  ;;  %v7013_v27 = vld [vmem:[#allocation8 + $0x288] sm:$0xf]  ;;  %v3728_v30 = vpop.f32.mrf.mxu0  ;;  %v6758_v45 = vor.u32 %v10214_v22, %v6757_v21 }
 0x126   :  { %3999 = vmatpush.bf16.msra.mxu0 %v6806_v33  ;;  %3965 = vmatmul.bf16.vlgmr.msrb.gmra.mxu1 %v11082_v41  ;;  %v10278_v28 = vld [vmem:[#allocation8 + $0x294] sm:$0xf0]  ;;  %v7141_v33 = vld [vmem:[#allocation8 + $0x388] sm:$0xf]  ;;  %v6886_v51 = vor.u32 %v10246_v26, %v6885_v23 }
 0x127   :  { %4013 = vmatpush.bf16.msra.mxu1 %v6934_v34  ;;  %3979 = vmatmul.bf16.vlgmr.msrb.gmra.mxu2 %v11080_v38  ;;  %v10310_v34 = vld [vmem:[#allocation8 + $0x394] sm:$0xf0]  ;;  %v6741_v53 = vld [vmem:[#allocation8 + $0x68] sm:$0xf] }
 0x128   :  { %4027 = vmatpush.bf16.msra.mxu2 %v7062_v37  ;;  %3993 = vmatmul.bf16.vlgmr.msrb.gmra.mxu3 %v11084_v46  ;;  %v3729_v37 = vadd.f32 %v3728_v30, %v11124_v48  ;;  %v10210_v4 = vld [vmem:[#allocation8 + $0x74] sm:$0xf0]  ;;  %v6869_v55 = vld [vmem:[#allocation8 + $0x168] sm:$0xf]  ;;  %v7142_v59 = vor.u32 %v10310_v34, %v7141_v33 }
 0x129   :  { %4041 = vmatpush.bf16.msra.mxu3 %v7190_v52  ;;  %v7014_v52 = vor.u32 %v10278_v28, %v7013_v27  ;;  %v7125_v2 = vld [vmem:[#allocation8 + $0x368] sm:$0xf]  ;;  %v10306_v3 = vld [vmem:[#allocation8 + $0x374] sm:$0xf0]  ;;  %v6742_v5 = vor.u32 %v10210_v4, %v6741_v53 }
 0x12a   :  { %4000 = vmatpush.bf16.msra.mxu0 %v6790_v62  ;;  %v3743_v60 = vadd.f32 %v3742_v49, %v3729_v37  ;;  %v10242_v62 = vld [vmem:[#allocation8 + $0x174] sm:$0xf0]  ;;  %v6725_v7 = vld [vmem:[#allocation8 + $0x48] sm:$0xf]  ;;  %v7126_v14 = vor.u32 %v10306_v3, %v7125_v2  ;;  %v3756_v15 = vpop.f32.mrf.mxu2 }
 0x12b   :  { %4014 = vmatpush.bf16.msra.mxu1 %v6918_v63  ;;  %v6997_v63 = vld [vmem:[#allocation8 + $0x268] sm:$0xf]  ;;  %v6870_v48 = vor.u32 %v10242_v62, %v6869_v55  ;;  %v10206_v11 = vld [vmem:[#allocation8 + $0x54] sm:$0xf0]  ;;  %v3770_v22 = vpop.f32.mrf.mxu3 }
 0x12c   :  { %4028 = vmatpush.bf16.msra.mxu2 %v7046_v0  ;;  %v10274_v0 = vld [vmem:[#allocation8 + $0x274] sm:$0xf0]  ;;  %v6853_v12 = vld [vmem:[#allocation8 + $0x148] sm:$0xf]  ;;  %v3757_v21 = vadd.f32 %v3756_v15, %v3743_v60  ;;  %v6726_v26 = vor.u32 %v10206_v11, %v6725_v7 }
 0x12d   :  { %4042 = vmatpush.bf16.msra.mxu3 %v7174_v6  ;;  %v6998_v6 = vor.u32 %v10274_v0, %v6997_v63  ;;  %v7109_v23 = vld [vmem:[#allocation8 + $0x348] sm:$0xf]  ;;  %v10202_v34 = vld [vmem:[#allocation8 + $0x34] sm:$0xf0] }
 0x12e   :  { %4001 = vmatpush.bf16.msra.mxu0 %v6774_v19  ;;  %v10238_v19 = vld [vmem:[#allocation8 + $0x154] sm:$0xf0]  ;;  %v11139_v27 = vadd.f32 %v3770_v22, %v3757_v21  ;;  %v6709_v33 = vld [vmem:[#allocation8 + $0x28] sm:$0xf] }
 0x12f   :  { %4015 = vmatpush.bf16.msra.mxu1 %v6902_v20  ;;  %v6981_v20 = vld [vmem:[#allocation8 + $0x248] sm:$0xf]  ;;  %v6854_v28 = vor.u32 %v10238_v19, %v6853_v12  ;;  %v10234_v49 = vld [vmem:[#allocation8 + $0x134] sm:$0xf0]  ;;  %v6710_v55 = vor.u32 %v10202_v34, %v6709_v33 }
 0x130   :  { %4029 = vmatpush.bf16.msra.mxu2 %v7030_v8  ;;  %v10270_v8 = vld [vmem:[#allocation8 + $0x254] sm:$0xf0]  ;;  %v6837_v37 = vld [vmem:[#allocation8 + $0x128] sm:$0xf] }
 0x131   :  { %4043 = vmatpush.bf16.msra.mxu3 %v7158_v25  ;;  %v10302_v25 = vld [vmem:[#allocation8 + $0x354] sm:$0xf0]  ;;  %v6982_v30 = vor.u32 %v10270_v8, %v6981_v20  ;;  %v7093_v53 = vld [vmem:[#allocation8 + $0x328] sm:$0xf]  ;;  %v6838_v62 = vor.u32 %v10234_v49, %v6837_v37 }
 0x132   :  { %4002 = vmatpush.bf16.msra.mxu0 %v6758_v45  ;;  %v7110_v45 = vor.u32 %v10302_v25, %v7109_v23  ;;  %v10298_v4 = vld [vmem:[#allocation8 + $0x334] sm:$0xf0]  ;;  %v6821_v0 = vld [vmem:[#allocation8 + $0x108] sm:$0xf] }
 0x133   :  { %4016 = vmatpush.bf16.msra.mxu1 %v6886_v51  ;;  %v6965_v51 = vld [vmem:[#allocation8 + $0x228] sm:$0xf]  ;;  %v10198_v60 = vld [vmem:[#allocation8 + $0x14] sm:$0xf0] }
 0x134   :  { %4030 = vmatpush.bf16.msra.mxu2 %v7014_v52  ;;  %v10266_v52 = vld [vmem:[#allocation8 + $0x234] sm:$0xf0]  ;;  %v6949_v3 = vld [vmem:[#allocation8 + $0x208] sm:$0xf] }
 0x135   :  { %4044 = vmatpush.bf16.msra.mxu3 %v7142_v59  ;;  %v6693_v59 = vld [vmem:[#allocation8 + $0x8] sm:$0xf]  ;;  %v6966_v63 = vor.u32 %v10266_v52, %v6965_v51  ;;  %v10230_v2 = vld [vmem:[#allocation8 + $0x114] sm:$0xf0] }
 0x136   :  { %4003 = vmatpush.bf16.msra.mxu0 %v6742_v5  ;;  %v7094_v5 = vor.u32 %v10298_v4, %v7093_v53  ;;  %v10294_v7 = vld [vmem:[#allocation8 + $0x314] sm:$0xf0]  ;;  %v7317_v11 = vld [vmem:[#allocation8 + $0x4e8] sm:$0xf]  ;;  %v6694_v15 = vor.u32 %v10198_v60, %v6693_v59  ;;  %v6822_v21 = vor.u32 %v10230_v2, %v6821_v0  ;;  %v11141_v59 = vpop.f32.mrf.mxu0  ;;  %v11143_v60 = vpop.f32.mrf.mxu1 }
 0x137   :  { %4017 = vmatpush.bf16.msra.mxu1 %v6870_v48  ;;  %v10262_v48 = vld [vmem:[#allocation8 + $0x214] sm:$0xf0]  ;;  %v7573_v20 = vld [vmem:[#allocation8 + $0x6e8] sm:$0xf] }
 0x138   :  { %4031 = vmatpush.bf16.msra.mxu2 %v6998_v6  ;;  %v7077_v6 = vld [vmem:[#allocation8 + $0x308] sm:$0xf]  ;;  %v10354_v12 = vld [vmem:[#allocation8 + $0x4f4] sm:$0xf0]  ;;  %v6950_v22 = vor.u32 %v10262_v48, %v6949_v3 }
 0x139   :  { %4045 = vmatpush.bf16.msra.mxu3 %v7126_v14  ;;  %v7445_v14 = vld [vmem:[#allocation8 + $0x5e8] sm:$0xf]  ;;  %v10386_v19 = vld [vmem:[#allocation8 + $0x5f4] sm:$0xf0] }
 0x13a   :  { %4004 = vmatpush.bf16.msra.mxu0 %v6726_v26  ;;  %v10418_v8 = vld [vmem:[#allocation8 + $0x6f4] sm:$0xf0]  ;;  %v7701_v23 = vld [vmem:[#allocation8 + $0x7e8] sm:$0xf]  ;;  %v7078_v26 = vor.u32 %v10294_v7, %v7077_v6 }
 0x13b   :  { %4018 = vmatpush.bf16.msra.mxu1 %v6854_v28  ;;  %v10450_v25 = vld [vmem:[#allocation8 + $0x7f4] sm:$0xf0]  ;;  %v7318_v28 = vor.u32 %v10354_v12, %v7317_v11  ;;  %v7574_v33 = vor.u32 %v10418_v8, %v7573_v20  ;;  %v7301_v34 = vld [vmem:[#allocation8 + $0x4c8] sm:$0xf] }
 0x13c   :  { %4032 = vmatpush.bf16.msra.mxu2 %v6982_v30  ;;  %v7446_v30 = vor.u32 %v10386_v19, %v7445_v14  ;;  %v10350_v37 = vld [vmem:[#allocation8 + $0x4d4] sm:$0xf0]  ;;  %v7702_v49 = vor.u32 %v10450_v25, %v7701_v23  ;;  %v7557_v52 = vld [vmem:[#allocation8 + $0x6c8] sm:$0xf]  ;;  %v11149_v23 = vpop.f32.mrf.mxu2 }
 0x13d   :  { %4046 = vmatpush.bf16.msra.mxu3 %v7110_v45  ;;  %v7429_v45 = vld [vmem:[#allocation8 + $0x5c8] sm:$0xf]  ;;  %v10382_v51 = vld [vmem:[#allocation8 + $0x5d4] sm:$0xf0]  ;;  %11422 = vst [vmem:[#allocation22_spill] sm:$0xff] %v11149_v23 }
 0x13e   :  { %4005 = vmatpush.bf16.msra.mxu0 %v6710_v55  ;;  %v10414_v53 = vld [vmem:[#allocation8 + $0x6d4] sm:$0xf0]  ;;  %v7685_v4 = vld [vmem:[#allocation8 + $0x7c8] sm:$0xf] }
 0x13f   :  { %4019 = vmatpush.bf16.msra.mxu1 %v6838_v62  ;;  %v10446_v55 = vld [vmem:[#allocation8 + $0x7d4] sm:$0xf0]  ;;  %v7302_v62 = vor.u32 %v10350_v37, %v7301_v34  ;;  %v7558_v0 = vor.u32 %v10414_v53, %v7557_v52  ;;  %v7285_v2 = vld [vmem:[#allocation8 + $0x4a8] sm:$0xf] }
 0x140   :  { %4033 = vmatpush.bf16.msra.mxu2 %v6966_v63  ;;  %v7430_v63 = vor.u32 %v10382_v51, %v7429_v45  ;;  %v10346_v3 = vld [vmem:[#allocation8 + $0x4b4] sm:$0xf0]  ;;  %v7686_v48 = vor.u32 %v10446_v55, %v7685_v4  ;;  %v7541_v7 = vld [vmem:[#allocation8 + $0x6a8] sm:$0xf] }
 0x141   :  { %4047 = vmatpush.bf16.msra.mxu3 %v7094_v5  ;;  %v7413_v5 = vld [vmem:[#allocation8 + $0x5a8] sm:$0xf]  ;;  %v10378_v6 = vld [vmem:[#allocation8 + $0x5b4] sm:$0xf0] }
 0x142   :  { %4006 = vmatpush.bf16.msra.mxu0 %v6694_v15  ;;  %v10410_v11 = vld [vmem:[#allocation8 + $0x6b4] sm:$0xf0]  ;;  %v7669_v12 = vld [vmem:[#allocation8 + $0x7a8] sm:$0xf]  ;;  %v7286_v15 = vor.u32 %v10346_v3, %v7285_v2  ;;  %v7414_v19 = vor.u32 %v10378_v6, %v7413_v5 }
 0x143   :  { %4020 = vmatpush.bf16.msra.mxu1 %v6822_v21  ;;  %v10442_v14 = vld [vmem:[#allocation8 + $0x7b4] sm:$0xf0]  ;;  %v7542_v20 = vor.u32 %v10410_v11, %v7541_v7  ;;  %v7269_v8 = vld [vmem:[#allocation8 + $0x488] sm:$0xf]  ;;  %v3798_v51 = vpop.f32.mrf.mxu1 }
 0x144   :  { %4034 = vmatpush.bf16.msra.mxu2 %v6950_v22  ;;  %v10342_v21 = vld [vmem:[#allocation8 + $0x494] sm:$0xf0]  ;;  %v7397_v22 = vld [vmem:[#allocation8 + $0x588] sm:$0xf]  ;;  %v7670_v25 = vor.u32 %v10442_v14, %v7669_v12 }
 0x145   :  { %4048 = vmatpush.bf16.msra.mxu3 %v7078_v26  ;;  %4007 = vmatmul.bf16.vlgmr.msra.gmra.mxu0 %v11042_v58  ;;  %v10374_v26 = vld [vmem:[#allocation8 + $0x594] sm:$0xf0]  ;;  %v7653_v34 = vld [vmem:[#allocation8 + $0x788] sm:$0xf]  ;;  %v7270_v45 = vor.u32 %v10342_v21, %v7269_v8 }
 0x146   :  { %4055 = vmatpush.bf16.msrb.mxu0 %v7318_v28  ;;  %4021 = vmatmul.bf16.vlgmr.msra.gmra.mxu1 %v11048_v10  ;;  %v7525_v28 = vld [vmem:[#allocation8 + $0x688] sm:$0xf]  ;;  %v10438_v37 = vld [vmem:[#allocation8 + $0x794] sm:$0xf0]  ;;  %v7398_v52 = vor.u32 %v10374_v26, %v7397_v22 }
 0x147   :  { %4069 = vmatpush.bf16.msrb.mxu1 %v7446_v30  ;;  %4035 = vmatmul.bf16.vlgmr.msra.gmra.mxu2 %v11044_v1  ;;  %v10406_v30 = vld [vmem:[#allocation8 + $0x694] sm:$0xf0]  ;;  %v7253_v4 = vld [vmem:[#allocation8 + $0x468] sm:$0xf] }
 0x148   :  { %4083 = vmatpush.bf16.msrb.mxu2 %v7574_v33  ;;  %4049 = vmatmul.bf16.vlgmr.msra.gmra.mxu3 %v11050_v17  ;;  %v11151_v33 = vpop.f32.mrf.mxu3  ;;  %v7526_v53 = vor.u32 %v10406_v30, %v7525_v28  ;;  %v10338_v55 = vld [vmem:[#allocation8 + $0x474] sm:$0xf0]  ;;  %v7509_v3 = vld [vmem:[#allocation8 + $0x668] sm:$0xf] }
 0x149   :  { %4097 = vmatpush.bf16.msrb.mxu3 %v7702_v49  ;;  %11423 = vst [vmem:[#allocation23_spill] sm:$0xff] %v11151_v33  ;;  %v3784_v49 = vpop.f32.mrf.mxu0  ;;  %v10370_v2 = vld [vmem:[#allocation8 + $0x574] sm:$0xf0]  ;;  %v7254_v7 = vor.u32 %v10338_v55, %v7253_v4  ;;  %v7237_v14 = vld [vmem:[#allocation8 + $0x448] sm:$0xf] }
 0x14a   :  { %4056 = vmatpush.bf16.msrb.mxu0 %v7302_v62  ;;  %v7381_v62 = vld [vmem:[#allocation8 + $0x568] sm:$0xf]  ;;  %v10402_v5 = vld [vmem:[#allocation8 + $0x674] sm:$0xf0] }
 0x14b   :  { %4070 = vmatpush.bf16.msrb.mxu1 %v7430_v63  ;;  %v3799_v63 = vadd.f32 %v3798_v51, %v3784_v49  ;;  %v10434_v6 = vld [vmem:[#allocation8 + $0x774] sm:$0xf0]  ;;  %v7382_v11 = vor.u32 %v10370_v2, %v7381_v62  ;;  %v7510_v12 = vor.u32 %v10402_v5, %v7509_v3  ;;  %v7493_v21 = vld [vmem:[#allocation8 + $0x648] sm:$0xf] }
 0x14c   :  { %4084 = vmatpush.bf16.msrb.mxu2 %v7558_v0  ;;  %v7654_v0 = vor.u32 %v10438_v37, %v7653_v34  ;;  %v10366_v8 = vld [vmem:[#allocation8 + $0x554] sm:$0xf0]  ;;  %v7621_v26 = vld [vmem:[#allocation8 + $0x748] sm:$0xf] }
 0x14d   :  { %4098 = vmatpush.bf16.msrb.mxu3 %v7686_v48  ;;  %v7637_v48 = vld [vmem:[#allocation8 + $0x768] sm:$0xf]  ;;  %v10398_v22 = vld [vmem:[#allocation8 + $0x654] sm:$0xf0] }
 0x14e   :  { %4057 = vmatpush.bf16.msrb.mxu0 %v7286_v15  ;;  %v10334_v15 = vld [vmem:[#allocation8 + $0x454] sm:$0xf0]  ;;  %v7494_v49 = vor.u32 %v10398_v22, %v7493_v21  ;;  %v7221_v51 = vld [vmem:[#allocation8 + $0x428] sm:$0xf] }
 0x14f   :  { %4071 = vmatpush.bf16.msrb.mxu1 %v7414_v19  ;;  %v7365_v19 = vld [vmem:[#allocation8 + $0x548] sm:$0xf]  ;;  %v10430_v28 = vld [vmem:[#allocation8 + $0x754] sm:$0xf0]  ;;  %v7238_v34 = vor.u32 %v10334_v15, %v7237_v14 }
 0x150   :  { %4085 = vmatpush.bf16.msrb.mxu2 %v7542_v20  ;;  %v7638_v20 = vor.u32 %v10434_v6, %v7637_v48  ;;  %v3826_v37 = vpop.f32.mrf.mxu3  ;;  %v7622_v55 = vor.u32 %v10430_v28, %v7621_v26  ;;  %v10362_v62 = vld [vmem:[#allocation8 + $0x534] sm:$0xf0]  ;;  %v7605_v3 = vld [vmem:[#allocation8 + $0x728] sm:$0xf] }
 0x151   :  { %4099 = vmatpush.bf16.msrb.mxu3 %v7670_v25  ;;  %v3812_v25 = vpop.f32.mrf.mxu2  ;;  %v10394_v2 = vld [vmem:[#allocation8 + $0x634] sm:$0xf0]  ;;  %v7205_v48 = vld [vmem:[#allocation8 + $0x408] sm:$0xf] }
 0x152   :  { %4058 = vmatpush.bf16.msrb.mxu0 %v7270_v45  ;;  %v3813_v30 = vadd.f32 %v3812_v25, %v3799_v63  ;;  %v7366_v45 = vor.u32 %v10366_v8, %v7365_v19  ;;  %v10426_v5 = vld [vmem:[#allocation8 + $0x734] sm:$0xf0]  ;;  %v7461_v15 = vld [vmem:[#allocation8 + $0x608] sm:$0xf] }
 0x153   :  { %4072 = vmatpush.bf16.msrb.mxu1 %v7398_v52  ;;  %v10330_v52 = vld [vmem:[#allocation8 + $0x434] sm:$0xf0]  ;;  %v7606_v19 = vor.u32 %v10426_v5, %v7605_v3  ;;  %v7589_v8 = vld [vmem:[#allocation8 + $0x708] sm:$0xf] }
 0x154   :  { %4086 = vmatpush.bf16.msrb.mxu2 %v7526_v53  ;;  %v7349_v53 = vld [vmem:[#allocation8 + $0x528] sm:$0xf]  ;;  %v11153_v4 = vadd.f32 %v3826_v37, %v3813_v30  ;;  %v7222_v63 = vor.u32 %v10330_v52, %v7221_v51  ;;  %v10326_v6 = vld [vmem:[#allocation8 + $0x414] sm:$0xf0] }
 0x155   :  { %4100 = vmatpush.bf16.msrb.mxu3 %v7654_v0  ;;  %v7477_v0 = vld [vmem:[#allocation8 + $0x628] sm:$0xf]  ;;  %v10358_v14 = vld [vmem:[#allocation8 + $0x514] sm:$0xf0]  ;;  %v7206_v28 = vor.u32 %v10326_v6, %v7205_v48 }
 0x156   :  { %4059 = vmatpush.bf16.msrb.mxu0 %v7254_v7  ;;  %v7350_v7 = vor.u32 %v10362_v62, %v7349_v53  ;;  %v10422_v21 = vld [vmem:[#allocation8 + $0x714] sm:$0xf0]  ;;  %v7829_v22 = vld [vmem:[#allocation8 + $0x8e8] sm:$0xf] }
 0x157   :  { %4073 = vmatpush.bf16.msrb.mxu1 %v7382_v11  ;;  %v7478_v11 = vor.u32 %v10394_v2, %v7477_v0  ;;  %v10482_v25 = vld [vmem:[#allocation8 + $0x8f4] sm:$0xf0]  ;;  %v7957_v26 = vld [vmem:[#allocation8 + $0x9e8] sm:$0xf]  ;;  %v7590_v53 = vor.u32 %v10422_v21, %v7589_v8  ;;  %v11155_v2 = vpop.f32.mrf.mxu0 }
 0x158   :  { %4087 = vmatpush.bf16.msrb.mxu2 %v7510_v12  ;;  %v7333_v12 = vld [vmem:[#allocation8 + $0x508] sm:$0xf]  ;;  %v10514_v30 = vld [vmem:[#allocation8 + $0x9f4] sm:$0xf0]  ;;  %11424 = vst [vmem:[#allocation24_spill] sm:$0xff] %v11155_v2 }
 0x159   :  { %4101 = vmatpush.bf16.msrb.mxu3 %v7638_v20  ;;  %v10390_v20 = vld [vmem:[#allocation8 + $0x614] sm:$0xf0]  ;;  %v8213_v51 = vld [vmem:[#allocation8 + $0xbe8] sm:$0xf]  ;;  %v7958_v62 = vor.u32 %v10514_v30, %v7957_v26 }
 0x15a   :  { %4060 = vmatpush.bf16.msrb.mxu0 %v7238_v34  ;;  %v8085_v34 = vld [vmem:[#allocation8 + $0xae8] sm:$0xf]  ;;  %v10546_v37 = vld [vmem:[#allocation8 + $0xaf4] sm:$0xf0] }
 0x15b   :  { %4074 = vmatpush.bf16.msrb.mxu1 %v7366_v45  ;;  %v7334_v45 = vor.u32 %v10358_v14, %v7333_v12  ;;  %v10578_v52 = vld [vmem:[#allocation8 + $0xbf4] sm:$0xf0]  ;;  %v8086_v0 = vor.u32 %v10546_v37, %v8085_v34  ;;  %v7813_v3 = vld [vmem:[#allocation8 + $0x8c8] sm:$0xf]  ;;  %v11157_v14 = vpop.f32.mrf.mxu1 }
 0x15c   :  { %4088 = vmatpush.bf16.msrb.mxu2 %v7494_v49  ;;  %v7462_v49 = vor.u32 %v10390_v20, %v7461_v15  ;;  %v10478_v5 = vld [vmem:[#allocation8 + $0x8d4] sm:$0xf0]  ;;  %v8214_v48 = vor.u32 %v10578_v52, %v8213_v51  ;;  %v8069_v33 = vld [vmem:[#allocation8 + $0xac8] sm:$0xf]  ;;  %11425 = vst [vmem:[#allocation25_spill] sm:$0xff] %v11157_v14 }
 0x15d   :  { %4102 = vmatpush.bf16.msrb.mxu3 %v7622_v55  ;;  %v7830_v55 = vor.u32 %v10482_v25, %v7829_v22  ;;  %v10510_v6 = vld [vmem:[#allocation8 + $0x9d4] sm:$0xf0]  ;;  %v7814_v15 = vor.u32 %v10478_v5, %v7813_v3  ;;  %v7797_v8 = vld [vmem:[#allocation8 + $0x8a8] sm:$0xf] }
 0x15e   :  { %4061 = vmatpush.bf16.msrb.mxu0 %v7222_v63  ;;  %v7941_v63 = vld [vmem:[#allocation8 + $0x9c8] sm:$0xf]  ;;  %v10574_v12 = vld [vmem:[#allocation8 + $0xbd4] sm:$0xf0] }
 0x15f   :  { %4075 = vmatpush.bf16.msrb.mxu1 %v7350_v7  ;;  %v10542_v7 = vld [vmem:[#allocation8 + $0xad4] sm:$0xf0]  ;;  %v7925_v22 = vld [vmem:[#allocation8 + $0x9a8] sm:$0xf] }
 0x160   :  { %4089 = vmatpush.bf16.msrb.mxu2 %v7478_v11  ;;  %v8197_v11 = vld [vmem:[#allocation8 + $0xbc8] sm:$0xf]  ;;  %v8070_v20 = vor.u32 %v10542_v7, %v8069_v33  ;;  %v10474_v21 = vld [vmem:[#allocation8 + $0x8b4] sm:$0xf0] }
 0x161   :  { %4103 = vmatpush.bf16.msrb.mxu3 %v7606_v19  ;;  %v7942_v19 = vor.u32 %v10510_v6, %v7941_v63  ;;  %v8198_v25 = vor.u32 %v10574_v12, %v8197_v11  ;;  %v10506_v26 = vld [vmem:[#allocation8 + $0x9b4] sm:$0xf0]  ;;  %v8181_v34 = vld [vmem:[#allocation8 + $0xba8] sm:$0xf]  ;;  %v7798_v33 = vor.u32 %v10474_v21, %v7797_v8 }
 0x162   :  { %4062 = vmatpush.bf16.msrb.mxu0 %v7206_v28  ;;  %v8053_v28 = vld [vmem:[#allocation8 + $0xaa8] sm:$0xf]  ;;  %v10538_v30 = vld [vmem:[#allocation8 + $0xab4] sm:$0xf0] }
 0x163   :  { %4076 = vmatpush.bf16.msrb.mxu1 %v7334_v45  ;;  %v10570_v37 = vld [vmem:[#allocation8 + $0xbb4] sm:$0xf0]  ;;  %v11163_v45 = vpop.f32.mrf.mxu2  ;;  %v8054_v51 = vor.u32 %v10538_v30, %v8053_v28  ;;  %v7781_v52 = vld [vmem:[#allocation8 + $0x888] sm:$0xf] }
 0x164   :  { %4090 = vmatpush.bf16.msrb.mxu2 %v7462_v49  ;;  %11426 = vst [vmem:[#allocation26_spill] sm:$0xff] %v11163_v45  ;;  %v7926_v49 = vor.u32 %v10506_v26, %v7925_v22  ;;  %v10502_v3 = vld [vmem:[#allocation8 + $0x994] sm:$0xf0]  ;;  %v8037_v5 = vld [vmem:[#allocation8 + $0xa88] sm:$0xf] }
 0x165   :  { %4104 = vmatpush.bf16.msrb.mxu3 %v7590_v53  ;;  %4063 = vmatmul.bf16.vlgmr.msrb.gmra.mxu0 %v11054_v39  ;;  %v10470_v53 = vld [vmem:[#allocation8 + $0x894] sm:$0xf0]  ;;  %v8165_v6 = vld [vmem:[#allocation8 + $0xb88] sm:$0xf] }
 0x166   :  { %4111 = vmatpush.bf16.msra.mxu0 %v7830_v55  ;;  %4077 = vmatmul.bf16.vlgmr.msrb.gmra.mxu1 %v11058_v44  ;;  %v7909_v55 = vld [vmem:[#allocation8 + $0x988] sm:$0xf]  ;;  %v10534_v63 = vld [vmem:[#allocation8 + $0xa94] sm:$0xf0]  ;;  %v7782_v12 = vor.u32 %v10470_v53, %v7781_v52 }
 0x167   :  { %4125 = vmatpush.bf16.msra.mxu1 %v7958_v62  ;;  %4091 = vmatmul.bf16.vlgmr.msrb.gmra.mxu2 %v11056_v43  ;;  %v8182_v62 = vor.u32 %v10570_v37, %v8181_v34  ;;  %v10566_v7 = vld [vmem:[#allocation8 + $0xb94] sm:$0xf0]  ;;  %v7765_v8 = vld [vmem:[#allocation8 + $0x868] sm:$0xf] }
 0x168   :  { %4139 = vmatpush.bf16.msra.mxu2 %v8086_v0  ;;  %4105 = vmatmul.bf16.vlgmr.msrb.gmra.mxu3 %v11060_v47  ;;  %v11165_v0 = vpop.f32.mrf.mxu3  ;;  %v10466_v21 = vld [vmem:[#allocation8 + $0x874] sm:$0xf0]  ;;  %v7893_v22 = vld [vmem:[#allocation8 + $0x968] sm:$0xf] }
 0x169   :  { %4153 = vmatpush.bf16.msra.mxu3 %v8214_v48  ;;  %11427 = vst [vmem:[#allocation27_spill] sm:$0xff] %v11165_v0  ;;  %v3840_v48 = vpop.f32.mrf.mxu0  ;;  %v10498_v28 = vld [vmem:[#allocation8 + $0x974] sm:$0xf0]  ;;  %v8021_v30 = vld [vmem:[#allocation8 + $0xa68] sm:$0xf] }
 0x16a   :  { %4112 = vmatpush.bf16.msra.mxu0 %v7814_v15  ;;  %v3841_v11 = vadd.f32 %v3840_v48, %v11153_v4  ;;  %v7910_v15 = vor.u32 %v10502_v3, %v7909_v55  ;;  %v10530_v34 = vld [vmem:[#allocation8 + $0xa74] sm:$0xf0]  ;;  %v8149_v37 = vld [vmem:[#allocation8 + $0xb68] sm:$0xf]  ;;  %v7894_v4 = vor.u32 %v10498_v28, %v7893_v22 }
 0x16b   :  { %4126 = vmatpush.bf16.msra.mxu1 %v7942_v19  ;;  %v8038_v19 = vor.u32 %v10534_v63, %v8037_v5  ;;  %v10562_v0 = vld [vmem:[#allocation8 + $0xb74] sm:$0xf0]  ;;  %v7877_v53 = vld [vmem:[#allocation8 + $0x948] sm:$0xf]  ;;  %v3868_v3 = vpop.f32.mrf.mxu2 }
 0x16c   :  { %4140 = vmatpush.bf16.msra.mxu2 %v8070_v20  ;;  %v3854_v20 = vpop.f32.mrf.mxu1  ;;  %v10462_v52 = vld [vmem:[#allocation8 + $0x854] sm:$0xf0]  ;;  %v8150_v55 = vor.u32 %v10562_v0, %v8149_v37  ;;  %v8005_v5 = vld [vmem:[#allocation8 + $0xa48] sm:$0xf] }
 0x16d   :  { %4154 = vmatpush.bf16.msra.mxu3 %v8198_v25  ;;  %v8166_v25 = vor.u32 %v10566_v7, %v8165_v6  ;;  %v3855_v26 = vadd.f32 %v3854_v20, %v3841_v11  ;;  %v10526_v63 = vld [vmem:[#allocation8 + $0xa54] sm:$0xf0]  ;;  %v8133_v6 = vld [vmem:[#allocation8 + $0xb48] sm:$0xf] }
 0x16e   :  { %4113 = vmatpush.bf16.msra.mxu0 %v7798_v33  ;;  %v7766_v33 = vor.u32 %v10466_v21, %v7765_v8  ;;  %v10558_v7 = vld [vmem:[#allocation8 + $0xb54] sm:$0xf0]  ;;  %v8006_v20 = vor.u32 %v10526_v63, %v8005_v5  ;;  %v7733_v8 = vld [vmem:[#allocation8 + $0x828] sm:$0xf] }
 0x16f   :  { %4127 = vmatpush.bf16.msra.mxu1 %v7926_v49  ;;  %v8022_v49 = vor.u32 %v10530_v34, %v8021_v30  ;;  %v3869_v48 = vadd.f32 %v3868_v3, %v3855_v26  ;;  %v10458_v21 = vld [vmem:[#allocation8 + $0x834] sm:$0xf0]  ;;  %v7861_v22 = vld [vmem:[#allocation8 + $0x928] sm:$0xf]  ;;  %v8134_v0 = vor.u32 %v10558_v7, %v8133_v6 }
 0x170   :  { %4141 = vmatpush.bf16.msra.mxu2 %v8054_v51  ;;  %v7749_v51 = vld [vmem:[#allocation8 + $0x848] sm:$0xf]  ;;  %v3882_v11 = vpop.f32.mrf.mxu3  ;;  %v10522_v30 = vld [vmem:[#allocation8 + $0xa34] sm:$0xf0]  ;;  %v7734_v37 = vor.u32 %v10458_v21, %v7733_v8 }
 0x171   :  { %4155 = vmatpush.bf16.msra.mxu3 %v8182_v62  ;;  %v10494_v62 = vld [vmem:[#allocation8 + $0x954] sm:$0xf0]  ;;  %v7989_v28 = vld [vmem:[#allocation8 + $0xa28] sm:$0xf]  ;;  %v11170_v23 = vpop.f32.mrf.mxu0 }
 0x172   :  { %4114 = vmatpush.bf16.msra.mxu0 %v7782_v12  ;;  %v7750_v12 = vor.u32 %v10462_v52, %v7749_v51  ;;  %v8117_v26 = vld [vmem:[#allocation8 + $0xb28] sm:$0xf]  ;;  %v10554_v34 = vld [vmem:[#allocation8 + $0xb34] sm:$0xf0]  ;;  %11428 = vst [vmem:[#allocation28_spill] sm:$0xff] %v11170_v23 }
 0x173   :  { %4128 = vmatpush.bf16.msra.mxu1 %v7910_v15  ;;  %v11168_v15 = vadd.f32 %v3882_v11, %v3869_v48  ;;  %v10454_v51 = vld [vmem:[#allocation8 + $0x814] sm:$0xf0]  ;;  %v7845_v52 = vld [vmem:[#allocation8 + $0x908] sm:$0xf] }
 0x174   :  { %4142 = vmatpush.bf16.msra.mxu2 %v8038_v19  ;;  %v7878_v19 = vor.u32 %v10494_v62, %v7877_v53  ;;  %v10486_v53 = vld [vmem:[#allocation8 + $0x914] sm:$0xf0]  ;;  %v7973_v3 = vld [vmem:[#allocation8 + $0xa08] sm:$0xf]  ;;  %v8118_v62 = vor.u32 %v10554_v34, %v8117_v26 }
 0x175   :  { %4156 = vmatpush.bf16.msra.mxu3 %v8166_v25  ;;  %v10490_v25 = vld [vmem:[#allocation8 + $0x934] sm:$0xf0]  ;;  %v8101_v5 = vld [vmem:[#allocation8 + $0xb08] sm:$0xf] }
 0x176   :  { %4115 = vmatpush.bf16.msra.mxu0 %v7766_v33  ;;  %v7717_v33 = vld [vmem:[#allocation8 + $0x808] sm:$0xf]  ;;  %v10550_v63 = vld [vmem:[#allocation8 + $0xb14] sm:$0xf0] }
 0x177   :  { %4129 = vmatpush.bf16.msra.mxu1 %v7894_v4  ;;  %v7862_v4 = vor.u32 %v10490_v25, %v7861_v22  ;;  %v8341_v48 = vld [vmem:[#allocation8 + $0xce8] sm:$0xf]  ;;  %v10610_v6 = vld [vmem:[#allocation8 + $0xcf4] sm:$0xf0]  ;;  %v7718_v11 = vor.u32 %v10454_v51, %v7717_v33 }
 0x178   :  { %4143 = vmatpush.bf16.msra.mxu2 %v8022_v49  ;;  %v7990_v49 = vor.u32 %v10522_v30, %v7989_v28  ;;  %v8469_v7 = vld [vmem:[#allocation8 + $0xde8] sm:$0xf]  ;;  %v10674_v21 = vld [vmem:[#allocation8 + $0xef4] sm:$0xf0]  ;;  %v8342_v28 = vor.u32 %v10610_v6, %v8341_v48 }
 0x179   :  { %4157 = vmatpush.bf16.msra.mxu3 %v8150_v55  ;;  %v10518_v55 = vld [vmem:[#allocation8 + $0xa14] sm:$0xf0]  ;;  %v8597_v8 = vld [vmem:[#allocation8 + $0xee8] sm:$0xf] }
 0x17a   :  { %4116 = vmatpush.bf16.msra.mxu0 %v7750_v12  ;;  %v10642_v12 = vld [vmem:[#allocation8 + $0xdf4] sm:$0xf0]  ;;  %v8725_v22 = vld [vmem:[#allocation8 + $0xfe8] sm:$0xf]  ;;  %v8598_v26 = vor.u32 %v10674_v21, %v8597_v8 }
 0x17b   :  { %4130 = vmatpush.bf16.msra.mxu1 %v7878_v19  ;;  %v7846_v19 = vor.u32 %v10486_v53, %v7845_v52  ;;  %v10706_v25 = vld [vmem:[#allocation8 + $0xff4] sm:$0xf0]  ;;  %v8470_v30 = vor.u32 %v10642_v12, %v8469_v7  ;;  %v8325_v34 = vld [vmem:[#allocation8 + $0xcc8] sm:$0xf]  ;;  %v11172_v52 = vpop.f32.mrf.mxu1 }
 0x17c   :  { %4144 = vmatpush.bf16.msra.mxu2 %v8006_v20  ;;  %v7974_v20 = vor.u32 %v10518_v55, %v7973_v3  ;;  %v10606_v45 = vld [vmem:[#allocation8 + $0xcd4] sm:$0xf0]  ;;  %v8453_v14 = vld [vmem:[#allocation8 + $0xdc8] sm:$0xf]  ;;  %11429 = vst [vmem:[#allocation29_spill] sm:$0xff] %v11172_v52 }
 0x17d   :  { %4158 = vmatpush.bf16.msra.mxu3 %v8134_v0  ;;  %v8102_v0 = vor.u32 %v10550_v63, %v8101_v5  ;;  %v10638_v33 = vld [vmem:[#allocation8 + $0xdd4] sm:$0xf0]  ;;  %v8581_v51 = vld [vmem:[#allocation8 + $0xec8] sm:$0xf]  ;;  %v8326_v53 = vor.u32 %v10606_v45, %v8325_v34  ;;  %v7047_v52 = vld [vmem:[#allocation8 + $0x2d8] sm:$0xf0] }
 0x17e   :  { %4117 = vmatpush.bf16.msra.mxu0 %v7734_v37  ;;  %v8726_v37 = vor.u32 %v10706_v25, %v8725_v22  ;;  %v10670_v2 = vld [vmem:[#allocation8 + $0xed4] sm:$0xf0]  ;;  %v8454_v3 = vor.u32 %v10638_v33, %v8453_v14  ;;  %v8309_v55 = vld [vmem:[#allocation8 + $0xca8] sm:$0xf]  ;;  %v11178_v22 = vpop.f32.mrf.mxu2 }
 0x17f   :  { %4131 = vmatpush.bf16.msra.mxu1 %v7862_v4  ;;  %v8709_v4 = vld [vmem:[#allocation8 + $0xfc8] sm:$0xf]  ;;  %v10602_v5 = vld [vmem:[#allocation8 + $0xcb4] sm:$0xf0]  ;;  %11430 = vst [vmem:[#allocation30_spill] sm:$0xff] %v11178_v22 }
 0x180   :  { %4145 = vmatpush.bf16.msra.mxu2 %v7990_v49  ;;  %v10702_v49 = vld [vmem:[#allocation8 + $0xfd4] sm:$0xf0]  ;;  %v8437_v63 = vld [vmem:[#allocation8 + $0xda8] sm:$0xf]  ;;  %v10252_v22 = vld [vmem:[#allocation8 + $0x1cc] sm:$0xf] }
 0x181   :  { %4159 = vmatpush.bf16.msra.mxu3 %v8118_v62  ;;  %v8582_v62 = vor.u32 %v10670_v2, %v8581_v51  ;;  %v8710_v48 = vor.u32 %v10702_v49, %v8709_v4  ;;  %v10634_v6 = vld [vmem:[#allocation8 + $0xdb4] sm:$0xf0]  ;;  %v8565_v7 = vld [vmem:[#allocation8 + $0xea8] sm:$0xf]  ;;  %v8310_v2 = vor.u32 %v10602_v5, %v8309_v55 }
 0x182   :  { %4118 = vmatpush.bf16.msra.mxu0 %v7718_v11  ;;  %v10666_v11 = vld [vmem:[#allocation8 + $0xeb4] sm:$0xf0]  ;;  %v8693_v12 = vld [vmem:[#allocation8 + $0xfa8] sm:$0xf]  ;;  %v8438_v14 = vor.u32 %v10634_v6, %v8437_v63  ;;  %v3896_v34 = vpop.f32.mrf.mxu0 }
 0x183   :  { %4132 = vmatpush.bf16.msra.mxu1 %v7846_v19  ;;  %v10698_v45 = vld [vmem:[#allocation8 + $0xfb4] sm:$0xf0]  ;;  %v8566_v8 = vor.u32 %v10666_v11, %v8565_v7  ;;  %v8293_v21 = vld [vmem:[#allocation8 + $0xc88] sm:$0xf]  ;;  %v3897_v51 = vadd.f32 %v3896_v34, %v11168_v15  ;;  %v3910_v49 = vpop.f32.mrf.mxu1 }
 0x184   :  { %4146 = vmatpush.bf16.msra.mxu2 %v7974_v20  ;;  %v10598_v19 = vld [vmem:[#allocation8 + $0xc94] sm:$0xf0]  ;;  %v8421_v20 = vld [vmem:[#allocation8 + $0xd88] sm:$0xf]  ;;  %v8694_v25 = vor.u32 %v10698_v45, %v8693_v12 }
 0x185   :  { %4160 = vmatpush.bf16.msra.mxu3 %v8102_v0  ;;  %4119 = vmatmul.bf16.vlgmr.msra.gmra.mxu0 %v11066_v31  ;;  %v10630_v0 = vld [vmem:[#allocation8 + $0xd94] sm:$0xf0]  ;;  %v8294_v4 = vor.u32 %v10598_v19, %v8293_v21  ;;  %v8405_v5 = vld [vmem:[#allocation8 + $0xd68] sm:$0xf] }
 0x186   :  { %4167 = vmatpush.bf16.msrb.mxu0 %v8342_v28  ;;  %4133 = vmatmul.bf16.vlgmr.msra.gmra.mxu1 %v11070_v36  ;;  %v8549_v28 = vld [vmem:[#allocation8 + $0xe88] sm:$0xf]  ;;  %v10694_v33 = vld [vmem:[#allocation8 + $0xf94] sm:$0xf0] }
 0x187   :  { %4181 = vmatpush.bf16.msrb.mxu1 %v8470_v30  ;;  %4147 = vmatmul.bf16.vlgmr.msra.gmra.mxu2 %v11068_v35  ;;  %v10662_v30 = vld [vmem:[#allocation8 + $0xe94] sm:$0xf0]  ;;  %v8533_v7 = vld [vmem:[#allocation8 + $0xe68] sm:$0xf] }
 0x188   :  { %4195 = vmatpush.bf16.msrb.mxu2 %v8598_v26  ;;  %4161 = vmatmul.bf16.vlgmr.msra.gmra.mxu3 %v11072_v40  ;;  %v11180_v26 = vpop.f32.mrf.mxu3  ;;  %v10594_v55 = vld [vmem:[#allocation8 + $0xc74] sm:$0xf0]  ;;  %v8661_v12 = vld [vmem:[#allocation8 + $0xf68] sm:$0xf] }
 0x189   :  { %4209 = vmatpush.bf16.msrb.mxu3 %v8726_v37  ;;  %11431 = vst [vmem:[#allocation31_spill] sm:$0xff] %v11180_v26  ;;  %v8677_v37 = vld [vmem:[#allocation8 + $0xf88] sm:$0xf]  ;;  %v10626_v6 = vld [vmem:[#allocation8 + $0xd74] sm:$0xf0] }
 0x18a   :  { %4168 = vmatpush.bf16.msrb.mxu0 %v8326_v53  ;;  %v8422_v53 = vor.u32 %v10630_v0, %v8421_v20  ;;  %v8678_v63 = vor.u32 %v10694_v33, %v8677_v37  ;;  %v10658_v11 = vld [vmem:[#allocation8 + $0xe74] sm:$0xf0]  ;;  %v8406_v15 = vor.u32 %v10626_v6, %v8405_v5  ;;  %v8389_v19 = vld [vmem:[#allocation8 + $0xd48] sm:$0xf]  ;;  %v3924_v0 = vpop.f32.mrf.mxu2  ;;  %v6791_v26 = vld [vmem:[#allocation8 + $0xd8] sm:$0xf0]  ;;  %v11185_v23 = vpop.f32.mrf.mxu0 }
 0x18b   :  { %4182 = vmatpush.bf16.msrb.mxu1 %v8454_v3  ;;  %v8550_v3 = vor.u32 %v10662_v30, %v8549_v28  ;;  %v10690_v45 = vld [vmem:[#allocation8 + $0xf74] sm:$0xf0]  ;;  %v8517_v28 = vld [vmem:[#allocation8 + $0xe48] sm:$0xf] }
 0x18c   :  { %4196 = vmatpush.bf16.msrb.mxu2 %v8582_v62  ;;  %v8277_v62 = vld [vmem:[#allocation8 + $0xc68] sm:$0xf]  ;;  %v10590_v21 = vld [vmem:[#allocation8 + $0xc54] sm:$0xf0]  ;;  %v8662_v20 = vor.u32 %v10690_v45, %v8661_v12 }
 0x18d   :  { %4210 = vmatpush.bf16.msrb.mxu3 %v8710_v48  ;;  %v3911_v48 = vadd.f32 %v3910_v49, %v3897_v51  ;;  %v10654_v30 = vld [vmem:[#allocation8 + $0xe54] sm:$0xf0]  ;;  %v8645_v33 = vld [vmem:[#allocation8 + $0xf48] sm:$0xf] }
 0x18e   :  { %4169 = vmatpush.bf16.msrb.mxu0 %v8310_v2  ;;  %v8278_v2 = vor.u32 %v10594_v55, %v8277_v62  ;;  %v10686_v51 = vld [vmem:[#allocation8 + $0xf54] sm:$0xf0]  ;;  %v8245_v62 = vld [vmem:[#allocation8 + $0xc28] sm:$0xf] }
 0x18f   :  { %4183 = vmatpush.bf16.msrb.mxu1 %v8438_v14  ;;  %v8534_v14 = vor.u32 %v10658_v11, %v8533_v7  ;;  %v3925_v34 = vadd.f32 %v3924_v0, %v3911_v48  ;;  %v10586_v55 = vld [vmem:[#allocation8 + $0xc34] sm:$0xf0]  ;;  %v8373_v5 = vld [vmem:[#allocation8 + $0xd28] sm:$0xf] }
 0x190   :  { %4197 = vmatpush.bf16.msrb.mxu2 %v8566_v8  ;;  %v8261_v8 = vld [vmem:[#allocation8 + $0xc48] sm:$0xf]  ;;  %v3938_v37 = vpop.f32.mrf.mxu3  ;;  %v10618_v6 = vld [vmem:[#allocation8 + $0xd34] sm:$0xf0]  ;;  %v8246_v45 = vor.u32 %v10586_v55, %v8245_v62  ;;  %v10288_v62 = vld [vmem:[#allocation8 + $0x2ec] sm:$0xf] }
 0x191   :  { %4211 = vmatpush.bf16.msrb.mxu3 %v8694_v25  ;;  %v10622_v25 = vld [vmem:[#allocation8 + $0xd54] sm:$0xf0]  ;;  %v11183_v49 = vadd.f32 %v3938_v37, %v3925_v34  ;;  %v8501_v7 = vld [vmem:[#allocation8 + $0xe28] sm:$0xf]  ;;  %v10224_v34 = vld [vmem:[#allocation8 + $0xec] sm:$0xf] }
 0x192   :  { %4170 = vmatpush.bf16.msrb.mxu0 %v8294_v4  ;;  %v8262_v4 = vor.u32 %v10590_v21, %v8261_v8  ;;  %v10650_v11 = vld [vmem:[#allocation8 + $0xe34] sm:$0xf0]  ;;  %v8629_v48 = vld [vmem:[#allocation8 + $0xf28] sm:$0xf]  ;;  %v6807_v37 = vld [vmem:[#allocation8 + $0xf8] sm:$0xf0] }
 0x193   :  { %4184 = vmatpush.bf16.msrb.mxu1 %v8422_v53  ;;  %v8390_v53 = vor.u32 %v10622_v25, %v8389_v19  ;;  %v10682_v12 = vld [vmem:[#allocation8 + $0xf34] sm:$0xf0]  ;;  %v8357_v21 = vld [vmem:[#allocation8 + $0xd08] sm:$0xf]  ;;  %v7063_v55 = vld [vmem:[#allocation8 + $0x2f8] sm:$0xf0] }
 0x194   :  { %4198 = vmatpush.bf16.msrb.mxu2 %v8550_v3  ;;  %v8518_v3 = vor.u32 %v10654_v30, %v8517_v28  ;;  %v10582_v8 = vld [vmem:[#allocation8 + $0xc14] sm:$0xf0]  ;;  %v8485_v0 = vld [vmem:[#allocation8 + $0xe08] sm:$0xf]  ;;  %v8630_v25 = vor.u32 %v10682_v12, %v8629_v48  ;;  %v7066_v48 = vor.u32 %v10288_v62, %v7063_v55  ;;  %v10220_v12 = vld [vmem:[#allocation8 + $0xcc] sm:$0xf] }
 0x195   :  { %4212 = vmatpush.bf16.msrb.mxu3 %v8678_v63  ;;  %v8646_v63 = vor.u32 %v10686_v51, %v8645_v33  ;;  %v10614_v19 = vld [vmem:[#allocation8 + $0xd14] sm:$0xf0]  ;;  %v8613_v28 = vld [vmem:[#allocation8 + $0xf08] sm:$0xf]  ;;  %v10256_v33 = vld [vmem:[#allocation8 + $0x1ec] sm:$0xf] }
 0x196   :  { %4171 = vmatpush.bf16.msrb.mxu0 %v8278_v2  ;;  %v8229_v2 = vld [vmem:[#allocation8 + $0xc08] sm:$0xf]  ;;  %v10678_v30 = vld [vmem:[#allocation8 + $0xf14] sm:$0xf0]  ;;  %v10212_v55 = vld [vmem:[#allocation8 + $0x8c] sm:$0xf] }
 0x197   :  { %4185 = vmatpush.bf16.msrb.mxu1 %v8406_v15  ;;  %v8374_v15 = vor.u32 %v10618_v6, %v8373_v5  ;;  %v8230_v51 = vor.u32 %v10582_v8, %v8229_v2  ;;  %v10320_v5 = vld [vmem:[#allocation8 + $0x3ec] sm:$0xf]  ;;  %v7191_v6 = vld [vmem:[#allocation8 + $0x3f8] sm:$0xf0] }
 0x198   :  { %4199 = vmatpush.bf16.msrb.mxu2 %v8534_v14  ;;  %v8502_v14 = vor.u32 %v10650_v11, %v8501_v7  ;;  %v6810_v7 = vor.u32 %v10224_v34, %v6807_v37  ;;  %v6919_v2 = vld [vmem:[#allocation8 + $0x1d8] sm:$0xf0]  ;;  %v10284_v8 = vld [vmem:[#allocation8 + $0x2cc] sm:$0xf] }
 0x199   :  { %4213 = vmatpush.bf16.msrb.mxu3 %v8662_v20  ;;  %v10646_v20 = vld [vmem:[#allocation8 + $0xe14] sm:$0xf0]  ;;  %v6903_v37 = vld [vmem:[#allocation8 + $0x1b8] sm:$0xf0] }
 0x19a   :  { %4172 = vmatpush.bf16.msrb.mxu0 %v8262_v4  ;;  %v6935_v4 = vld [vmem:[#allocation8 + $0x1f8] sm:$0xf0] }
 0x19b   :  { %4186 = vmatpush.bf16.msrb.mxu1 %v8390_v53  ;;  %v8358_v53 = vor.u32 %v10614_v19, %v8357_v21  ;;  %v6938_v11 = vor.u32 %v10256_v33, %v6935_v4  ;;  %v11187_v21 = vpop.f32.mrf.mxu1  ;;  %v6794_v19 = vor.u32 %v10220_v12, %v6791_v26  ;;  %v10280_v33 = vld [vmem:[#allocation8 + $0x2ac] sm:$0xf]  ;;  %v7159_v26 = vld [vmem:[#allocation8 + $0x3b8] sm:$0xf0] }
 0x19c   :  { %4200 = vmatpush.bf16.msrb.mxu2 %v8518_v3  ;;  %v8486_v3 = vor.u32 %v10646_v20, %v8485_v0  ;;  %v6922_v0 = vor.u32 %v10252_v22, %v6919_v2  ;;  %v10216_v20 = vld [vmem:[#allocation8 + $0xac] sm:$0xf]  ;;  %v7143_v2 = vld [vmem:[#allocation8 + $0x398] sm:$0xf0] }
 0x19d   :  { %4214 = vmatpush.bf16.msrb.mxu3 %v8646_v63  ;;  %v8614_v63 = vor.u32 %v10678_v30, %v8613_v28  ;;  %v6775_v28 = vld [vmem:[#allocation8 + $0xb8] sm:$0xf0]  ;;  %v10248_v30 = vld [vmem:[#allocation8 + $0x1ac] sm:$0xf] }
 0x19e   :  { %4173 = vmatpush.bf16.msrb.mxu0 %v8246_v45  ;;  %v7194_v45 = vor.u32 %v10320_v5, %v7191_v6  ;;  %v10312_v4 = vld [vmem:[#allocation8 + $0x3ac] sm:$0xf]  ;;  %v6906_v22 = vor.u32 %v10248_v30, %v6903_v37  ;;  %v11193_v5 = vpop.f32.mrf.mxu2  ;;  %v6871_v37 = vld [vmem:[#allocation8 + $0x178] sm:$0xf0] }
 0x19f   :  { %4187 = vmatpush.bf16.msrb.mxu1 %v8374_v15  ;;  %v10316_v15 = vld [vmem:[#allocation8 + $0x3cc] sm:$0xf]  ;;  %11432 = vst [vmem:[#allocation32_spill] sm:$0xff] %v11193_v5  ;;  %v7162_v6 = vor.u32 %v10312_v4, %v7159_v26  ;;  %v7127_v26 = vld [vmem:[#allocation8 + $0x378] sm:$0xf0] }
 0x1a0   :  { %4201 = vmatpush.bf16.msrb.mxu2 %v8502_v14  ;;  %v7175_v14 = vld [vmem:[#allocation8 + $0x3d8] sm:$0xf0]  ;;  %v10304_v4 = vld [vmem:[#allocation8 + $0x36c] sm:$0xf] }
 0x1a1   :  { %4215 = vmatpush.bf16.msrb.mxu3 %v8630_v25  ;;  %v7050_v25 = vor.u32 %v10284_v8, %v7047_v52  ;;  %v7178_v34 = vor.u32 %v10316_v15, %v7175_v14  ;;  %v6778_v52 = vor.u32 %v10216_v20, %v6775_v28  ;;  %v6743_v20 = vld [vmem:[#allocation8 + $0x78] sm:$0xf0]  ;;  %v10240_v28 = vld [vmem:[#allocation8 + $0x16c] sm:$0xf] }
 0x1a2   :  { %4174 = vmatpush.bf16.msrb.mxu0 %v8230_v51  ;;  %v7031_v51 = vld [vmem:[#allocation8 + $0x2b8] sm:$0xf0]  ;;  %v3952_v12 = vpop.f32.mrf.mxu0 }
 0x1a3   :  { %4188 = vmatpush.bf16.msrb.mxu1 %v8358_v53  ;;  %v7034_v62 = vor.u32 %v10280_v33, %v7031_v51  ;;  %v6759_v53 = vld [vmem:[#allocation8 + $0x98] sm:$0xf0]  ;;  %v3953_v8 = vadd.f32 %v3952_v12, %v11183_v49  ;;  %v3966_v14 = vpop.f32.mrf.mxu1  ;;  %v10272_v33 = vld [vmem:[#allocation8 + $0x26c] sm:$0xf]  ;;  %v6874_v49 = vor.u32 %v10240_v28, %v6871_v37 }
 0x1a4   :  { %4202 = vmatpush.bf16.msrb.mxu2 %v8486_v3  ;;  %v10244_v3 = vld [vmem:[#allocation8 + $0x18c] sm:$0xf]  ;;  %v6762_v15 = vor.u32 %v10212_v55, %v6759_v53  ;;  %v6999_v51 = vld [vmem:[#allocation8 + $0x278] sm:$0xf0] }
 0x1a5   :  { %4216 = vmatpush.bf16.msrb.mxu3 %v8614_v63  ;;  %4175 = vmatmul.bf16.vlgmr.msrb.gmra.mxu0 %v11078_v32  ;;  %v6887_v63 = vld [vmem:[#allocation8 + $0x198] sm:$0xf0]  ;;  %v10236_v53 = vld [vmem:[#allocation8 + $0x14c] sm:$0xf] }
 0x1a6   :  { %4223 = vmatpush.bf16.msra.mxu0 %v6810_v7  ;;  %4189 = vmatmul.bf16.vlgmr.msrb.gmra.mxu1 %v11082_v41  ;;  %v10276_v7 = vld [vmem:[#allocation8 + $0x28c] sm:$0xf]  ;;  %v6727_v55 = vld [vmem:[#allocation8 + $0x58] sm:$0xf0] }
 0x1a7   :  { %4237 = vmatpush.bf16.msra.mxu1 %v6938_v11  ;;  %4203 = vmatmul.bf16.vlgmr.msrb.gmra.mxu2 %v11080_v38  ;;  %v7015_v11 = vld [vmem:[#allocation8 + $0x298] sm:$0xf0]  ;;  %v10232_v28 = vld [vmem:[#allocation8 + $0x12c] sm:$0xf] }
 0x1a8   :  { %4251 = vmatpush.bf16.msra.mxu2 %v7066_v48  ;;  %4217 = vmatmul.bf16.vlgmr.msrb.gmra.mxu3 %v11084_v46  ;;  %v11195_v48 = vpop.f32.mrf.mxu3  ;;  %v6839_v37 = vld [vmem:[#allocation8 + $0x138] sm:$0xf0] }
 0x1a9   :  { %4265 = vmatpush.bf16.msra.mxu3 %v7194_v45  ;;  %11433 = vst [vmem:[#allocation33_spill] sm:$0xff] %v11195_v48  ;;  %v10308_v45 = vld [vmem:[#allocation8 + $0x38c] sm:$0xf]  ;;  %v7559_v5 = vld [vmem:[#allocation8 + $0x6d8] sm:$0xf0] }
 0x1aa   :  { %4224 = vmatpush.bf16.msra.mxu0 %v6794_v19  ;;  %v6890_v19 = vor.u32 %v10244_v3, %v6887_v63  ;;  %v7146_v30 = vor.u32 %v10308_v45, %v7143_v2  ;;  %v7130_v3 = vor.u32 %v10304_v4, %v7127_v26  ;;  %v3980_v63 = vpop.f32.mrf.mxu2  ;;  %v10300_v2 = vld [vmem:[#allocation8 + $0x34c] sm:$0xf]  ;;  %v7095_v4 = vld [vmem:[#allocation8 + $0x338] sm:$0xf0] }
 0x1ab   :  { %4238 = vmatpush.bf16.msra.mxu1 %v6922_v0  ;;  %v7018_v0 = vor.u32 %v10276_v7, %v7015_v11  ;;  %v10268_v7 = vld [vmem:[#allocation8 + $0x24c] sm:$0xf]  ;;  %v6983_v11 = vld [vmem:[#allocation8 + $0x258] sm:$0xf0] }
 0x1ac   :  { %4252 = vmatpush.bf16.msra.mxu2 %v7050_v25  ;;  %v10208_v25 = vld [vmem:[#allocation8 + $0x6c] sm:$0xf] }
 0x1ad   :  { %4266 = vmatpush.bf16.msra.mxu3 %v7178_v34  ;;  %v3967_v34 = vadd.f32 %v3966_v14, %v3953_v8  ;;  %v7111_v8 = vld [vmem:[#allocation8 + $0x358] sm:$0xf0]  ;;  %v10380_v48 = vld [vmem:[#allocation8 + $0x5cc] sm:$0xf] }
 0x1ae   :  { %4225 = vmatpush.bf16.msra.mxu0 %v6778_v52  ;;  %v6746_v52 = vor.u32 %v10208_v25, %v6743_v20  ;;  %v10200_v25 = vld [vmem:[#allocation8 + $0x2c] sm:$0xf]  ;;  %v6711_v20 = vld [vmem:[#allocation8 + $0x38] sm:$0xf0] }
 0x1af   :  { %4239 = vmatpush.bf16.msra.mxu1 %v6906_v22  ;;  %v7002_v22 = vor.u32 %v10272_v33, %v6999_v51  ;;  %v3981_v12 = vadd.f32 %v3980_v63, %v3967_v34  ;;  %v10264_v33 = vld [vmem:[#allocation8 + $0x22c] sm:$0xf]  ;;  %v6967_v51 = vld [vmem:[#allocation8 + $0x238] sm:$0xf0]  ;;  %v6714_v26 = vor.u32 %v10200_v25, %v6711_v20 }
 0x1b0   :  { %4253 = vmatpush.bf16.msra.mxu2 %v7034_v62  ;;  %v10204_v62 = vld [vmem:[#allocation8 + $0x4c] sm:$0xf]  ;;  %v3994_v45 = vpop.f32.mrf.mxu3  ;;  %v7575_v20 = vld [vmem:[#allocation8 + $0x6f8] sm:$0xf0] }
 0x1b1   :  { %4267 = vmatpush.bf16.msra.mxu3 %v7162_v6  ;;  %v6855_v6 = vld [vmem:[#allocation8 + $0x158] sm:$0xf0]  ;;  %v11198_v14 = vadd.f32 %v3994_v45, %v3981_v12  ;;  %v10296_v34 = vld [vmem:[#allocation8 + $0x32c] sm:$0xf] }
 0x1b2   :  { %4226 = vmatpush.bf16.msra.mxu0 %v6762_v15  ;;  %v6730_v15 = vor.u32 %v10204_v62, %v6727_v55  ;;  %v6695_v62 = vld [vmem:[#allocation8 + $0x18] sm:$0xf0]  ;;  %v10228_v55 = vld [vmem:[#allocation8 + $0x10c] sm:$0xf] }
 0x1b3   :  { %4240 = vmatpush.bf16.msra.mxu1 %v6890_v19  ;;  %11434 = vst [vmem:[#allocation34_spill] sm:$0xff] %v11198_v14  ;;  %v6858_v19 = vor.u32 %v10236_v53, %v6855_v6  ;;  %v6823_v53 = vld [vmem:[#allocation8 + $0x118] sm:$0xf0]  ;;  %v10260_v63 = vld [vmem:[#allocation8 + $0x20c] sm:$0xf]  ;;  %v7098_v6 = vor.u32 %v10296_v34, %v7095_v4 }
 0x1b4   :  { %4254 = vmatpush.bf16.msra.mxu2 %v7018_v0  ;;  %v6986_v0 = vor.u32 %v10268_v7, %v6983_v11  ;;  %v10292_v7 = vld [vmem:[#allocation8 + $0x30c] sm:$0xf]  ;;  %v7079_v11 = vld [vmem:[#allocation8 + $0x318] sm:$0xf0] }
 0x1b5   :  { %4268 = vmatpush.bf16.msra.mxu3 %v7146_v30  ;;  %v7114_v30 = vor.u32 %v10300_v2, %v7111_v8  ;;  %v10352_v12 = vld [vmem:[#allocation8 + $0x4ec] sm:$0xf]  ;;  %v7319_v45 = vld [vmem:[#allocation8 + $0x4f8] sm:$0xf0] }
 0x1b6   :  { %4227 = vmatpush.bf16.msra.mxu0 %v6746_v52  ;;  %v10196_v52 = vld [vmem:[#allocation8 + $0xc] sm:$0xf]  ;;  %v7303_v14 = vld [vmem:[#allocation8 + $0x4d8] sm:$0xf0] }
 0x1b7   :  { %4241 = vmatpush.bf16.msra.mxu1 %v6874_v49  ;;  %v6842_v49 = vor.u32 %v10232_v28, %v6839_v37  ;;  %v10384_v2 = vld [vmem:[#allocation8 + $0x5ec] sm:$0xf]  ;;  %v6698_v8 = vor.u32 %v10196_v52, %v6695_v62  ;;  %v7703_v37 = vld [vmem:[#allocation8 + $0x7f8] sm:$0xf0] }
 0x1b8   :  { %4255 = vmatpush.bf16.msra.mxu2 %v7002_v22  ;;  %v6970_v22 = vor.u32 %v10264_v33, %v6967_v51  ;;  %v10416_v25 = vld [vmem:[#allocation8 + $0x6ec] sm:$0xf]  ;;  %v7322_v33 = vor.u32 %v10352_v12, %v7319_v45  ;;  %v7431_v52 = vld [vmem:[#allocation8 + $0x5d8] sm:$0xf0] }
 0x1b9   :  { %4269 = vmatpush.bf16.msra.mxu3 %v7130_v3  ;;  %v6951_v3 = vld [vmem:[#allocation8 + $0x218] sm:$0xf0]  ;;  %v10448_v28 = vld [vmem:[#allocation8 + $0x7ec] sm:$0xf]  ;;  %v7578_v34 = vor.u32 %v10416_v25, %v7575_v20 }
 0x1ba   :  { %4228 = vmatpush.bf16.msra.mxu0 %v6730_v15  ;;  %v7447_v15 = vld [vmem:[#allocation8 + $0x5f8] sm:$0xf0]  ;;  %v10348_v4 = vld [vmem:[#allocation8 + $0x4cc] sm:$0xf] }
 0x1bb   :  { %4242 = vmatpush.bf16.msra.mxu1 %v6858_v19  ;;  %v6826_v19 = vor.u32 %v10228_v55, %v6823_v53  ;;  %v7450_v51 = vor.u32 %v10384_v2, %v7447_v15  ;;  %v10412_v62 = vld [vmem:[#allocation8 + $0x6cc] sm:$0xf]  ;;  %v11200_v55 = vpop.f32.mrf.mxu0  ;;  %v11202_v53 = vpop.f32.mrf.mxu1  ;;  %v7415_v2 = vld [vmem:[#allocation8 + $0x5b8] sm:$0xf0] }
 0x1bc   :  { %4256 = vmatpush.bf16.msra.mxu2 %v6986_v0  ;;  %v6954_v0 = vor.u32 %v10260_v63, %v6951_v3  ;;  %v7306_v63 = vor.u32 %v10348_v4, %v7303_v14  ;;  %v7562_v3 = vor.u32 %v10412_v62, %v7559_v5  ;;  %v10376_v12 = vld [vmem:[#allocation8 + $0x5ac] sm:$0xf]  ;;  %v7543_v15 = vld [vmem:[#allocation8 + $0x6b8] sm:$0xf0] }
 0x1bd   :  { %4270 = vmatpush.bf16.msra.mxu3 %v7114_v30  ;;  %v7082_v30 = vor.u32 %v10292_v7, %v7079_v11  ;;  %v10344_v7 = vld [vmem:[#allocation8 + $0x4ac] sm:$0xf]  ;;  %v7287_v11 = vld [vmem:[#allocation8 + $0x4b8] sm:$0xf0]  ;;  %v7418_v5 = vor.u32 %v10376_v12, %v7415_v2 }
 0x1be   :  { %4229 = vmatpush.bf16.msra.mxu0 %v6714_v26  ;;  %v7706_v26 = vor.u32 %v10448_v28, %v7703_v37  ;;  %v10440_v25 = vld [vmem:[#allocation8 + $0x7ac] sm:$0xf]  ;;  %v7671_v20 = vld [vmem:[#allocation8 + $0x7b8] sm:$0xf0]  ;;  %v7290_v14 = vor.u32 %v10344_v7, %v7287_v11  ;;  %v11208_v37 = vpop.f32.mrf.mxu2 }
 0x1bf   :  { %4243 = vmatpush.bf16.msra.mxu1 %v6842_v49  ;;  %v10444_v49 = vld [vmem:[#allocation8 + $0x7cc] sm:$0xf]  ;;  %v7383_v7 = vld [vmem:[#allocation8 + $0x578] sm:$0xf0] }
 0x1c0   :  { %4257 = vmatpush.bf16.msra.mxu2 %v6970_v22  ;;  %v7687_v22 = vld [vmem:[#allocation8 + $0x7d8] sm:$0xf0]  ;;  %v10372_v28 = vld [vmem:[#allocation8 + $0x58c] sm:$0xf] }
 0x1c1   :  { %4271 = vmatpush.bf16.msra.mxu3 %v7098_v6  ;;  %v7434_v6 = vor.u32 %v10380_v48, %v7431_v52  ;;  %v7690_v45 = vor.u32 %v10444_v49, %v7687_v22  ;;  %v10336_v49 = vld [vmem:[#allocation8 + $0x46c] sm:$0xf]  ;;  %v7255_v22 = vld [vmem:[#allocation8 + $0x478] sm:$0xf0] }
 0x1c2   :  { %4230 = vmatpush.bf16.msra.mxu0 %v6698_v8  ;;  %v10408_v8 = vld [vmem:[#allocation8 + $0x6ac] sm:$0xf]  ;;  %v7511_v12 = vld [vmem:[#allocation8 + $0x678] sm:$0xf0] }
 0x1c3   :  { %4244 = vmatpush.bf16.msra.mxu1 %v6826_v19  ;;  %v7546_v48 = vor.u32 %v10408_v8, %v7543_v15  ;;  %v10340_v19 = vld [vmem:[#allocation8 + $0x48c] sm:$0xf]  ;;  %v4008_v4 = vpop.f32.mrf.mxu0  ;;  %v7639_v2 = vld [vmem:[#allocation8 + $0x778] sm:$0xf0]  ;;  %v7258_v8 = vor.u32 %v10336_v49, %v7255_v22 }
 0x1c4   :  { %4258 = vmatpush.bf16.msra.mxu2 %v6954_v0  ;;  %v7271_v0 = vld [vmem:[#allocation8 + $0x498] sm:$0xf0]  ;;  %v10400_v11 = vld [vmem:[#allocation8 + $0x66c] sm:$0xf] }
 0x1c5   :  { %4272 = vmatpush.bf16.msra.mxu3 %v7082_v30  ;;  %4231 = vmatmul.bf16.vlgmr.msra.gmra.mxu0 %v11042_v58  ;;  %v7674_v58 = vor.u32 %v10440_v25, %v7671_v20  ;;  %v7399_v30 = vld [vmem:[#allocation8 + $0x598] sm:$0xf0]  ;;  %v7514_v25 = vor.u32 %v10400_v11, %v7511_v12  ;;  %v10332_v20 = vld [vmem:[#allocation8 + $0x44c] sm:$0xf] }
 0x1c6   :  { %4279 = vmatpush.bf16.msrb.mxu0 %v7322_v33  ;;  %4245 = vmatmul.bf16.vlgmr.msra.gmra.mxu1 %v11048_v10  ;;  %v10404_v33 = vld [vmem:[#allocation8 + $0x68c] sm:$0xf]  ;;  %v7402_v52 = vor.u32 %v10372_v28, %v7399_v30  ;;  %v7495_v28 = vld [vmem:[#allocation8 + $0x658] sm:$0xf0] }
 0x1c7   :  { %4293 = vmatpush.bf16.msrb.mxu1 %v7450_v51  ;;  %4259 = vmatmul.bf16.vlgmr.msra.gmra.mxu2 %v11044_v1  ;;  %v7527_v1 = vld [vmem:[#allocation8 + $0x698] sm:$0xf0]  ;;  %v11210_v51 = vpop.f32.mrf.mxu3  ;;  %v10436_v10 = vld [vmem:[#allocation8 + $0x78c] sm:$0xf] }
 0x1c8   :  { %4307 = vmatpush.bf16.msrb.mxu2 %v7578_v34  ;;  %4273 = vmatmul.bf16.vlgmr.msra.gmra.mxu3 %v11050_v17  ;;  %11435 = vst [vmem:[#allocation35_spill] sm:$0xff] %v11210_v51  ;;  %v7655_v34 = vld [vmem:[#allocation8 + $0x798] sm:$0xf0]  ;;  %v7274_v17 = vor.u32 %v10340_v19, %v7271_v0  ;;  %v7530_v62 = vor.u32 %v10404_v33, %v7527_v1  ;;  %v10396_v0 = vld [vmem:[#allocation8 + $0x64c] sm:$0xf] }
 0x1c9   :  { %4321 = vmatpush.bf16.msrb.mxu3 %v7706_v26  ;;  %v4022_v26 = vpop.f32.mrf.mxu1  ;;  %v7367_v19 = vld [vmem:[#allocation8 + $0x558] sm:$0xf0]  ;;  %v10428_v30 = vld [vmem:[#allocation8 + $0x74c] sm:$0xf] }
 0x1ca   :  { %4280 = vmatpush.bf16.msrb.mxu0 %v7306_v63  ;;  %v10368_v63 = vld [vmem:[#allocation8 + $0x56c] sm:$0xf]  ;;  %v7623_v33 = vld [vmem:[#allocation8 + $0x758] sm:$0xf0] }
 0x1cb   :  { %4294 = vmatpush.bf16.msrb.mxu1 %v7434_v6  ;;  %v4023_v6 = vadd.f32 %v4022_v26, %v4008_v4  ;;  %v7386_v15 = vor.u32 %v10368_v63, %v7383_v7  ;;  %v7498_v4 = vor.u32 %v10396_v0, %v7495_v28  ;;  %v10328_v26 = vld [vmem:[#allocation8 + $0x42c] sm:$0xf]  ;;  %v7626_v22 = vor.u32 %v10428_v30, %v7623_v33  ;;  %v7351_v63 = vld [vmem:[#allocation8 + $0x538] sm:$0xf0] }
 0x1cc   :  { %4308 = vmatpush.bf16.msrb.mxu2 %v7562_v3  ;;  %v7658_v3 = vor.u32 %v10436_v10, %v7655_v34  ;;  %v7479_v7 = vld [vmem:[#allocation8 + $0x638] sm:$0xf0]  ;;  %v10424_v11 = vld [vmem:[#allocation8 + $0x72c] sm:$0xf] }
 0x1cd   :  { %4322 = vmatpush.bf16.msrb.mxu3 %v7690_v45  ;;  %v10432_v45 = vld [vmem:[#allocation8 + $0x76c] sm:$0xf]  ;;  %v7607_v12 = vld [vmem:[#allocation8 + $0x738] sm:$0xf0] }
 0x1ce   :  { %4281 = vmatpush.bf16.msrb.mxu0 %v7290_v14  ;;  %v7239_v14 = vld [vmem:[#allocation8 + $0x458] sm:$0xf0]  ;;  %v10480_v28 = vld [vmem:[#allocation8 + $0x8ec] sm:$0xf] }
 0x1cf   :  { %4295 = vmatpush.bf16.msrb.mxu1 %v7418_v5  ;;  %v10364_v5 = vld [vmem:[#allocation8 + $0x54c] sm:$0xf]  ;;  %v7242_v10 = vor.u32 %v10332_v20, %v7239_v14  ;;  %v4050_v34 = vpop.f32.mrf.mxu3  ;;  %v7335_v20 = vld [vmem:[#allocation8 + $0x518] sm:$0xf0] }
 0x1d0   :  { %4309 = vmatpush.bf16.msrb.mxu2 %v7546_v48  ;;  %v7642_v48 = vor.u32 %v10432_v45, %v7639_v2  ;;  %v10324_v45 = vld [vmem:[#allocation8 + $0x40c] sm:$0xf]  ;;  %v7207_v2 = vld [vmem:[#allocation8 + $0x418] sm:$0xf0] }
 0x1d1   :  { %4323 = vmatpush.bf16.msrb.mxu3 %v7674_v58  ;;  %v4036_v58 = vpop.f32.mrf.mxu2  ;;  %v10388_v14 = vld [vmem:[#allocation8 + $0x60c] sm:$0xf]  ;;  %v7591_v0 = vld [vmem:[#allocation8 + $0x718] sm:$0xf0]  ;;  %v7210_v33 = vor.u32 %v10324_v45, %v7207_v2 }
 0x1d2   :  { %4282 = vmatpush.bf16.msrb.mxu0 %v7274_v17  ;;  %v4037_v1 = vadd.f32 %v4036_v58, %v4023_v6  ;;  %v7370_v17 = vor.u32 %v10364_v5, %v7367_v19  ;;  %v7610_v5 = vor.u32 %v10424_v11, %v7607_v12  ;;  %v10420_v19 = vld [vmem:[#allocation8 + $0x70c] sm:$0xf]  ;;  %v7831_v58 = vld [vmem:[#allocation8 + $0x8f8] sm:$0xf0] }
 0x1d3   :  { %4296 = vmatpush.bf16.msrb.mxu1 %v7402_v52  ;;  %v7223_v52 = vld [vmem:[#allocation8 + $0x438] sm:$0xf0]  ;;  %v10512_v30 = vld [vmem:[#allocation8 + $0x9ec] sm:$0xf] }
 0x1d4   :  { %4310 = vmatpush.bf16.msrb.mxu2 %v7530_v62  ;;  %v10360_v62 = vld [vmem:[#allocation8 + $0x52c] sm:$0xf]  ;;  %v11212_v49 = vadd.f32 %v4050_v34, %v4037_v1  ;;  %v7226_v6 = vor.u32 %v10328_v26, %v7223_v52  ;;  %v7959_v1 = vld [vmem:[#allocation8 + $0x9f8] sm:$0xf0] }
 0x1d5   :  { %4324 = vmatpush.bf16.msrb.mxu3 %v7658_v3  ;;  %v10392_v3 = vld [vmem:[#allocation8 + $0x62c] sm:$0xf]  ;;  %v8087_v34 = vld [vmem:[#allocation8 + $0xaf8] sm:$0xf0] }
 0x1d6   :  { %4283 = vmatpush.bf16.msrb.mxu0 %v7258_v8  ;;  %v7354_v8 = vor.u32 %v10360_v62, %v7351_v63  ;;  %v10576_v26 = vld [vmem:[#allocation8 + $0xbec] sm:$0xf]  ;;  %v8215_v52 = vld [vmem:[#allocation8 + $0xbf8] sm:$0xf0]  ;;  %v7594_v62 = vor.u32 %v10420_v19, %v7591_v0  ;;  %v7962_v63 = vor.u32 %v10512_v30, %v7959_v1 }
 0x1d7   :  { %4297 = vmatpush.bf16.msrb.mxu1 %v7386_v15  ;;  %v7482_v15 = vor.u32 %v10392_v3, %v7479_v7  ;;  %v11214_v7 = vpop.f32.mrf.mxu0  ;;  %v10476_v11 = vld [vmem:[#allocation8 + $0x8cc] sm:$0xf]  ;;  %v7815_v12 = vld [vmem:[#allocation8 + $0x8d8] sm:$0xf0]  ;;  %v8218_v45 = vor.u32 %v10576_v26, %v8215_v52 }
 0x1d8   :  { %4311 = vmatpush.bf16.msrb.mxu2 %v7514_v25  ;;  %v10356_v25 = vld [vmem:[#allocation8 + $0x50c] sm:$0xf]  ;;  %v7943_v2 = vld [vmem:[#allocation8 + $0x9d8] sm:$0xf0] }
 0x1d9   :  { %4325 = vmatpush.bf16.msrb.mxu3 %v7642_v48  ;;  %v7463_v48 = vld [vmem:[#allocation8 + $0x618] sm:$0xf0]  ;;  %v10540_v51 = vld [vmem:[#allocation8 + $0xacc] sm:$0xf] }
 0x1da   :  { %4284 = vmatpush.bf16.msrb.mxu0 %v7242_v10  ;;  %v10544_v10 = vld [vmem:[#allocation8 + $0xaec] sm:$0xf]  ;;  %v7799_v0 = vld [vmem:[#allocation8 + $0x8b8] sm:$0xf0] }
 0x1db   :  { %4298 = vmatpush.bf16.msrb.mxu1 %v7370_v17  ;;  %v7338_v17 = vor.u32 %v10356_v25, %v7335_v20  ;;  %v8090_v3 = vor.u32 %v10544_v10, %v8087_v34  ;;  %v8199_v25 = vld [vmem:[#allocation8 + $0xbd8] sm:$0xf0]  ;;  %v11216_v20 = vpop.f32.mrf.mxu1  ;;  %v10472_v19 = vld [vmem:[#allocation8 + $0x8ac] sm:$0xf] }
 0x1dc   :  { %4312 = vmatpush.bf16.msrb.mxu2 %v7498_v4  ;;  %v7466_v4 = vor.u32 %v10388_v14, %v7463_v48  ;;  %v7818_v14 = vor.u32 %v10476_v11, %v7815_v12  ;;  %v7927_v30 = vld [vmem:[#allocation8 + $0x9b8] sm:$0xf0]  ;;  %v10568_v10 = vld [vmem:[#allocation8 + $0xbac] sm:$0xf] }
 0x1dd   :  { %4326 = vmatpush.bf16.msrb.mxu3 %v7626_v22  ;;  %v7834_v22 = vor.u32 %v10480_v28, %v7831_v58  ;;  %v10504_v28 = vld [vmem:[#allocation8 + $0x9ac] sm:$0xf]  ;;  %v8055_v1 = vld [vmem:[#allocation8 + $0xab8] sm:$0xf0] }
 0x1de   :  { %4285 = vmatpush.bf16.msrb.mxu0 %v7226_v6  ;;  %v10508_v6 = vld [vmem:[#allocation8 + $0x9cc] sm:$0xf]  ;;  %v8183_v34 = vld [vmem:[#allocation8 + $0xbb8] sm:$0xf0] }
 0x1df   :  { %4299 = vmatpush.bf16.msrb.mxu1 %v7354_v8  ;;  %v8071_v8 = vld [vmem:[#allocation8 + $0xad8] sm:$0xf0]  ;;  %v10468_v26 = vld [vmem:[#allocation8 + $0x88c] sm:$0xf] }
 0x1e0   :  { %4313 = vmatpush.bf16.msrb.mxu2 %v7482_v15  ;;  %v10572_v15 = vld [vmem:[#allocation8 + $0xbcc] sm:$0xf]  ;;  %v8074_v48 = vor.u32 %v10540_v51, %v8071_v8  ;;  %v7802_v51 = vor.u32 %v10472_v19, %v7799_v0  ;;  %v7783_v52 = vld [vmem:[#allocation8 + $0x898] sm:$0xf0] }
 0x1e1   :  { %4327 = vmatpush.bf16.msrb.mxu3 %v7610_v5  ;;  %v7946_v5 = vor.u32 %v10508_v6, %v7943_v2  ;;  %v8202_v58 = vor.u32 %v10572_v15, %v8199_v25  ;;  %v8167_v12 = vld [vmem:[#allocation8 + $0xb98] sm:$0xf0]  ;;  %v10464_v25 = vld [vmem:[#allocation8 + $0x86c] sm:$0xf] }
 0x1e2   :  { %4286 = vmatpush.bf16.msrb.mxu0 %v7210_v33  ;;  %v10536_v33 = vld [vmem:[#allocation8 + $0xaac] sm:$0xf]  ;;  %v4064_v11 = vpop.f32.mrf.mxu0  ;;  %v7895_v0 = vld [vmem:[#allocation8 + $0x978] sm:$0xf0] }
 0x1e3   :  { %4300 = vmatpush.bf16.msrb.mxu1 %v7338_v17  ;;  %v11222_v17 = vpop.f32.mrf.mxu2  ;;  %v4065_v6 = vadd.f32 %v4064_v11, %v11212_v49  ;;  %v4078_v15 = vpop.f32.mrf.mxu1 }
 0x1e4   :  { %4314 = vmatpush.bf16.msrb.mxu2 %v7466_v4  ;;  %11436 = vst [vmem:[#allocation36_spill] sm:$0xff] %v11222_v17  ;;  %v7930_v4 = vor.u32 %v10504_v28, %v7927_v30  ;;  %v10528_v28 = vld [vmem:[#allocation8 + $0xa6c] sm:$0xf]  ;;  %v10139_v17 = vld [vmem:[#allocation7 + $0x6c4] sm:$0xf] }
 0x1e5   :  { %4328 = vmatpush.bf16.msrb.mxu3 %v7594_v62  ;;  %4287 = vmatmul.bf16.vlgmr.msrb.gmra.mxu0 %v11054_v39  ;;  %v8058_v39 = vor.u32 %v10536_v33, %v8055_v1  ;;  %v10500_v62 = vld [vmem:[#allocation8 + $0x98c] sm:$0xf]  ;;  %v4079_v19 = vadd.f32 %v4078_v15, %v4065_v6  ;;  %v8151_v33 = vld [vmem:[#allocation8 + $0xb78] sm:$0xf0] }
 0x1e6   :  { %4335 = vmatpush.bf16.msra.mxu0 %v7834_v22  ;;  %4301 = vmatmul.bf16.vlgmr.msrb.gmra.mxu1 %v11058_v44  ;;  %v8186_v22 = vor.u32 %v10568_v10, %v8183_v34  ;;  %v7911_v44 = vld [vmem:[#allocation8 + $0x998] sm:$0xf0]  ;;  %v10560_v30 = vld [vmem:[#allocation8 + $0xb6c] sm:$0xf] }
 0x1e7   :  { %4349 = vmatpush.bf16.msra.mxu1 %v7962_v63  ;;  %4315 = vmatmul.bf16.vlgmr.msrb.gmra.mxu2 %v11056_v43  ;;  %v11224_v43 = vpop.f32.mrf.mxu3  ;;  %v10532_v63 = vld [vmem:[#allocation8 + $0xa8c] sm:$0xf]  ;;  %v7914_v2 = vor.u32 %v10500_v62, %v7911_v44 }
 0x1e8   :  { %4363 = vmatpush.bf16.msra.mxu2 %v8090_v3  ;;  %4329 = vmatmul.bf16.vlgmr.msrb.gmra.mxu3 %v11060_v47  ;;  %11437 = vst [vmem:[#allocation37_spill] sm:$0xff] %v11224_v43  ;;  %v8039_v3 = vld [vmem:[#allocation8 + $0xa98] sm:$0xf0]  ;;  %v10564_v47 = vld [vmem:[#allocation8 + $0xb8c] sm:$0xf] }
 0x1e9   :  { %4377 = vmatpush.bf16.msra.mxu3 %v8218_v45  ;;  %v7786_v45 = vor.u32 %v10468_v26, %v7783_v52  ;;  %v8042_v8 = vor.u32 %v10532_v63, %v8039_v3  ;;  %v10460_v34 = vld [vmem:[#allocation8 + $0x84c] sm:$0xf]  ;;  %v7879_v52 = vld [vmem:[#allocation8 + $0x958] sm:$0xf0] }
 0x1ea   :  { %4336 = vmatpush.bf16.msra.mxu0 %v7818_v14  ;;  %v7767_v14 = vld [vmem:[#allocation8 + $0x878] sm:$0xf0]  ;;  %v10524_v62 = vld [vmem:[#allocation8 + $0xa4c] sm:$0xf]  ;;  %v11229_v43 = vpop.f32.mrf.mxu0 }
 0x1eb   :  { %4350 = vmatpush.bf16.msra.mxu1 %v7946_v5  ;;  %v10496_v5 = vld [vmem:[#allocation8 + $0x96c] sm:$0xf]  ;;  %v7770_v1 = vor.u32 %v10464_v25, %v7767_v14  ;;  %v4092_v26 = vpop.f32.mrf.mxu2  ;;  %v8135_v3 = vld [vmem:[#allocation8 + $0xb58] sm:$0xf0]  ;;  %11438 = vst [vmem:[#allocation38_spill] sm:$0xff] %v11229_v43 }
 0x1ec   :  { %4364 = vmatpush.bf16.msra.mxu2 %v8074_v48  ;;  %v8170_v48 = vor.u32 %v10564_v47, %v8167_v12  ;;  %v7898_v49 = vor.u32 %v10496_v5, %v7895_v0  ;;  %v4093_v44 = vadd.f32 %v4092_v26, %v4079_v19  ;;  %v10556_v63 = vld [vmem:[#allocation8 + $0xb4c] sm:$0xf]  ;;  %v7863_v14 = vld [vmem:[#allocation8 + $0x938] sm:$0xf0]  ;;  %v9979_v43 = vld [vmem:[#allocation7 + $0x1c4] sm:$0xf] }
 0x1ed   :  { %4378 = vmatpush.bf16.msra.mxu3 %v8202_v58  ;;  %v8023_v58 = vld [vmem:[#allocation8 + $0xa78] sm:$0xf0]  ;;  %v10488_v15 = vld [vmem:[#allocation8 + $0x92c] sm:$0xf]  ;;  %v8138_v25 = vor.u32 %v10556_v63, %v8135_v3 }
 0x1ee   :  { %4337 = vmatpush.bf16.msra.mxu0 %v7802_v51  ;;  %v8026_v10 = vor.u32 %v10528_v28, %v8023_v58  ;;  %v7751_v51 = vld [vmem:[#allocation8 + $0x858] sm:$0xf0]  ;;  %v10520_v5 = vld [vmem:[#allocation8 + $0xa2c] sm:$0xf] }
 0x1ef   :  { %4351 = vmatpush.bf16.msra.mxu1 %v7930_v4  ;;  %v10492_v4 = vld [vmem:[#allocation8 + $0x94c] sm:$0xf]  ;;  %v4106_v11 = vpop.f32.mrf.mxu3  ;;  %v7754_v47 = vor.u32 %v10460_v34, %v7751_v51  ;;  %v8119_v0 = vld [vmem:[#allocation8 + $0xb38] sm:$0xf0] }
 0x1f0   :  { %4365 = vmatpush.bf16.msra.mxu2 %v8058_v39  ;;  %v8154_v39 = vor.u32 %v10560_v30, %v8151_v33  ;;  %v11227_v12 = vadd.f32 %v4106_v11, %v4093_v44  ;;  %v7882_v6 = vor.u32 %v10492_v4, %v7879_v52  ;;  %v10552_v19 = vld [vmem:[#allocation8 + $0xb2c] sm:$0xf]  ;;  %v7719_v30 = vld [vmem:[#allocation8 + $0x818] sm:$0xf0]  ;;  %v7866_v33 = vor.u32 %v10488_v15, %v7863_v14 }
 0x1f1   :  { %4379 = vmatpush.bf16.msra.mxu3 %v8186_v22  ;;  %v8007_v22 = vld [vmem:[#allocation8 + $0xa58] sm:$0xf0]  ;;  %v10452_v58 = vld [vmem:[#allocation8 + $0x80c] sm:$0xf]  ;;  %v8122_v51 = vor.u32 %v10552_v19, %v8119_v0 }
 0x1f2   :  { %4338 = vmatpush.bf16.msra.mxu0 %v7786_v45  ;;  %v8010_v45 = vor.u32 %v10524_v62, %v8007_v22  ;;  %v10516_v34 = vld [vmem:[#allocation8 + $0xa0c] sm:$0xf]  ;;  %v7975_v4 = vld [vmem:[#allocation8 + $0xa18] sm:$0xf0]  ;;  %v7722_v44 = vor.u32 %v10452_v58, %v7719_v30 }
 0x1f3   :  { %4352 = vmatpush.bf16.msra.mxu1 %v7914_v2  ;;  %v10456_v2 = vld [vmem:[#allocation8 + $0x82c] sm:$0xf]  ;;  %v8103_v26 = vld [vmem:[#allocation8 + $0xb18] sm:$0xf0] }
 0x1f4   :  { %4366 = vmatpush.bf16.msra.mxu2 %v8042_v8  ;;  %v7735_v8 = vld [vmem:[#allocation8 + $0x838] sm:$0xf0]  ;;  %v10608_v52 = vld [vmem:[#allocation8 + $0xcec] sm:$0xf] }
 0x1f5   :  { %4380 = vmatpush.bf16.msra.mxu3 %v8170_v48  ;;  %v7991_v48 = vld [vmem:[#allocation8 + $0xa38] sm:$0xf0]  ;;  %v7738_v28 = vor.u32 %v10456_v2, %v7735_v8  ;;  %v10640_v22 = vld [vmem:[#allocation8 + $0xdec] sm:$0xf] }
 0x1f6   :  { %4339 = vmatpush.bf16.msra.mxu0 %v7770_v1  ;;  %v7994_v1 = vor.u32 %v10520_v5, %v7991_v48  ;;  %v8343_v62 = vld [vmem:[#allocation8 + $0xcf8] sm:$0xf0]  ;;  %v10672_v3 = vld [vmem:[#allocation8 + $0xeec] sm:$0xf] }
 0x1f7   :  { %4353 = vmatpush.bf16.msra.mxu1 %v7898_v49  ;;  %v10484_v49 = vld [vmem:[#allocation8 + $0x90c] sm:$0xf]  ;;  %v8471_v63 = vld [vmem:[#allocation8 + $0xdf8] sm:$0xf0]  ;;  %v8346_v15 = vor.u32 %v10608_v52, %v8343_v62 }
 0x1f8   :  { %4367 = vmatpush.bf16.msra.mxu2 %v8026_v10  ;;  %v7847_v10 = vld [vmem:[#allocation8 + $0x918] sm:$0xf0]  ;;  %v10604_v5 = vld [vmem:[#allocation8 + $0xccc] sm:$0xf] }
 0x1f9   :  { %4381 = vmatpush.bf16.msra.mxu3 %v8154_v39  ;;  %v10548_v39 = vld [vmem:[#allocation8 + $0xb0c] sm:$0xf]  ;;  %v8599_v11 = vld [vmem:[#allocation8 + $0xef8] sm:$0xf0] }
 0x1fa   :  { %4340 = vmatpush.bf16.msra.mxu0 %v7754_v47  ;;  %v7850_v47 = vor.u32 %v10484_v49, %v7847_v10  ;;  %v8727_v2 = vld [vmem:[#allocation8 + $0xff8] sm:$0xf0]  ;;  %v8106_v8 = vor.u32 %v10548_v39, %v8103_v26  ;;  %v8602_v14 = vor.u32 %v10672_v3, %v8599_v11  ;;  %v10636_v19 = vld [vmem:[#allocation8 + $0xdcc] sm:$0xf]  ;;  %v11231_v49 = vpop.f32.mrf.mxu1 }
 0x1fb   :  { %4354 = vmatpush.bf16.msra.mxu1 %v7882_v6  ;;  %v7978_v6 = vor.u32 %v10516_v34, %v7975_v4  ;;  %v8327_v48 = vld [vmem:[#allocation8 + $0xcd8] sm:$0xf0]  ;;  %v10668_v58 = vld [vmem:[#allocation8 + $0xecc] sm:$0xf]  ;;  %11439 = vst [vmem:[#allocation39_spill] sm:$0xff] %v11231_v49 }
 0x1fc   :  { %4368 = vmatpush.bf16.msra.mxu2 %v8010_v45  ;;  %v10704_v45 = vld [vmem:[#allocation8 + $0xfec] sm:$0xf]  ;;  %v8583_v30 = vld [vmem:[#allocation8 + $0xed8] sm:$0xf0]  ;;  %v8330_v10 = vor.u32 %v10604_v5, %v8327_v48 }
 0x1fd   :  { %4382 = vmatpush.bf16.msra.mxu3 %v8138_v25  ;;  %v8474_v25 = vor.u32 %v10640_v22, %v8471_v63  ;;  %v8730_v0 = vor.u32 %v10704_v45, %v8727_v2  ;;  %v10600_v4 = vld [vmem:[#allocation8 + $0xcac] sm:$0xf]  ;;  %v8311_v39 = vld [vmem:[#allocation8 + $0xcb8] sm:$0xf0] }
 0x1fe   :  { %4341 = vmatpush.bf16.msra.mxu0 %v7738_v28  ;;  %v8455_v28 = vld [vmem:[#allocation8 + $0xdd8] sm:$0xf0]  ;;  %v10632_v26 = vld [vmem:[#allocation8 + $0xdac] sm:$0xf]  ;;  %v8314_v11 = vor.u32 %v10600_v4, %v8311_v39 }
 0x1ff   :  { %4355 = vmatpush.bf16.msra.mxu1 %v7866_v33  ;;  %v10700_v33 = vld [vmem:[#allocation8 + $0xfcc] sm:$0xf]  ;;  %v8458_v34 = vor.u32 %v10636_v19, %v8455_v28  ;;  %v8439_v62 = vld [vmem:[#allocation8 + $0xdb8] sm:$0xf0] }
 0x200   :  { %4369 = vmatpush.bf16.msra.mxu2 %v7994_v1  ;;  %v8711_v1 = vld [vmem:[#allocation8 + $0xfd8] sm:$0xf0]  ;;  %v10664_v22 = vld [vmem:[#allocation8 + $0xeac] sm:$0xf] }
 0x201   :  { %4383 = vmatpush.bf16.msra.mxu3 %v8122_v51  ;;  %v8586_v51 = vor.u32 %v10668_v58, %v8583_v30  ;;  %v8714_v52 = vor.u32 %v10700_v33, %v8711_v1  ;;  %v10696_v63 = vld [vmem:[#allocation8 + $0xfac] sm:$0xf]  ;;  %v8695_v3 = vld [vmem:[#allocation8 + $0xfb8] sm:$0xf0] }
 0x202   :  { %4342 = vmatpush.bf16.msra.mxu0 %v7722_v44  ;;  %v8567_v44 = vld [vmem:[#allocation8 + $0xeb8] sm:$0xf0]  ;;  %v10596_v45 = vld [vmem:[#allocation8 + $0xc8c] sm:$0xf]  ;;  %v4120_v5 = vpop.f32.mrf.mxu0 }
 0x203   :  { %4356 = vmatpush.bf16.msra.mxu1 %v7850_v47  ;;  %v8442_v47 = vor.u32 %v10632_v26, %v8439_v62  ;;  %v10628_v2 = vld [vmem:[#allocation8 + $0xd8c] sm:$0xf]  ;;  %v8679_v48 = vld [vmem:[#allocation8 + $0xf98] sm:$0xf0]  ;;  %v4121_v19 = vadd.f32 %v4120_v5, %v11227_v12  ;;  %v4134_v28 = vpop.f32.mrf.mxu1 }
 0x204   :  { %4370 = vmatpush.bf16.msra.mxu2 %v7978_v6  ;;  %v8570_v6 = vor.u32 %v10664_v22, %v8567_v44  ;;  %v10592_v33 = vld [vmem:[#allocation8 + $0xc6c] sm:$0xf]  ;;  %v8279_v1 = vld [vmem:[#allocation8 + $0xc78] sm:$0xf0] }
 0x205   :  { %4384 = vmatpush.bf16.msra.mxu3 %v8106_v8  ;;  %4343 = vmatmul.bf16.vlgmr.msra.gmra.mxu0 %v11066_v31  ;;  %v8295_v31 = vld [vmem:[#allocation8 + $0xc98] sm:$0xf0]  ;;  %v11237_v8 = vpop.f32.mrf.mxu2  ;;  %v10656_v39 = vld [vmem:[#allocation8 + $0xe6c] sm:$0xf]  ;;  %v8282_v22 = vor.u32 %v10592_v33, %v8279_v1 }
 0x206   :  { %4391 = vmatpush.bf16.msrb.mxu0 %v8346_v15  ;;  %4357 = vmatmul.bf16.vlgmr.msra.gmra.mxu1 %v11070_v36  ;;  %11440 = vst [vmem:[#allocation40_spill] sm:$0xff] %v11237_v8  ;;  %v8698_v15 = vor.u32 %v10696_v63, %v8695_v3  ;;  %v8551_v36 = vld [vmem:[#allocation8 + $0xe98] sm:$0xf0]  ;;  %v10588_v63 = vld [vmem:[#allocation8 + $0xc4c] sm:$0xf] }
 0x207   :  { %4405 = vmatpush.bf16.msrb.mxu1 %v8474_v25  ;;  %4371 = vmatmul.bf16.vlgmr.msra.gmra.mxu2 %v11068_v35  ;;  %v8423_v35 = vld [vmem:[#allocation8 + $0xd98] sm:$0xf0]  ;;  %v10660_v25 = vld [vmem:[#allocation8 + $0xe8c] sm:$0xf] }
 0x208   :  { %4419 = vmatpush.bf16.msrb.mxu2 %v8602_v14  ;;  %4385 = vmatmul.bf16.vlgmr.msra.gmra.mxu3 %v11072_v40  ;;  %v11239_v14 = vpop.f32.mrf.mxu3  ;;  %v10692_v40 = vld [vmem:[#allocation8 + $0xf8c] sm:$0xf]  ;;  %v8426_v58 = vor.u32 %v10628_v2, %v8423_v35  ;;  %v8554_v30 = vor.u32 %v10660_v25, %v8551_v36  ;;  %v8407_v4 = vld [vmem:[#allocation8 + $0xd78] sm:$0xf0] }
 0x209   :  { %4433 = vmatpush.bf16.msrb.mxu3 %v8730_v0  ;;  %11441 = vst [vmem:[#allocation41_spill] sm:$0xff] %v11239_v14  ;;  %v8298_v0 = vor.u32 %v10596_v45, %v8295_v31  ;;  %v8535_v26 = vld [vmem:[#allocation8 + $0xe78] sm:$0xf0]  ;;  %v10652_v31 = vld [vmem:[#allocation8 + $0xe4c] sm:$0xf] }
 0x20a   :  { %4392 = vmatpush.bf16.msrb.mxu0 %v8330_v10  ;;  %v10624_v10 = vld [vmem:[#allocation8 + $0xd6c] sm:$0xf]  ;;  %v8663_v62 = vld [vmem:[#allocation8 + $0xf78] sm:$0xf0]  ;;  %v8538_v44 = vor.u32 %v10656_v39, %v8535_v26 }
 0x20b   :  { %4406 = vmatpush.bf16.msrb.mxu1 %v8458_v34  ;;  %v8682_v34 = vor.u32 %v10692_v40, %v8679_v48  ;;  %v8410_v12 = vor.u32 %v10624_v10, %v8407_v4  ;;  %v8263_v3 = vld [vmem:[#allocation8 + $0xc58] sm:$0xf0]  ;;  %v10684_v25 = vld [vmem:[#allocation8 + $0xf4c] sm:$0xf] }
 0x20c   :  { %4420 = vmatpush.bf16.msrb.mxu2 %v8586_v51  ;;  %v4135_v51 = vadd.f32 %v4134_v28, %v4121_v19  ;;  %v8391_v45 = vld [vmem:[#allocation8 + $0xd58] sm:$0xf0]  ;;  %v8266_v5 = vor.u32 %v10588_v63, %v8263_v3  ;;  %v10648_v1 = vld [vmem:[#allocation8 + $0xe2c] sm:$0xf] }
 0x20d   :  { %4434 = vmatpush.bf16.msrb.mxu3 %v8714_v52  ;;  %v10688_v52 = vld [vmem:[#allocation8 + $0xf6c] sm:$0xf]  ;;  %v8519_v2 = vld [vmem:[#allocation8 + $0xe58] sm:$0xf0] }
 0x20e   :  { %4393 = vmatpush.bf16.msrb.mxu0 %v8314_v11  ;;  %v10620_v11 = vld [vmem:[#allocation8 + $0xd4c] sm:$0xf]  ;;  %v8647_v36 = vld [vmem:[#allocation8 + $0xf58] sm:$0xf0]  ;;  %v8522_v19 = vor.u32 %v10652_v31, %v8519_v2  ;;  %v9005_v31 = vld [vmem:[#allocation7 + $0x1e0] sm:$0xf] }
 0x20f   :  { %4407 = vmatpush.bf16.msrb.mxu1 %v8442_v47  ;;  %v8666_v47 = vor.u32 %v10688_v52, %v8663_v62  ;;  %v8394_v48 = vor.u32 %v10620_v11, %v8391_v45  ;;  %v8247_v28 = vld [vmem:[#allocation8 + $0xc38] sm:$0xf0]  ;;  %v10580_v39 = vld [vmem:[#allocation8 + $0xc0c] sm:$0xf]  ;;  %v9953_v45 = vld [vmem:[#allocation7 + $0xec] sm:$0xf0] }
 0x210   :  { %4421 = vmatpush.bf16.msrb.mxu2 %v8570_v6  ;;  %v4148_v6 = vpop.f32.mrf.mxu2  ;;  %v4162_v35 = vpop.f32.mrf.mxu3  ;;  %v8375_v33 = vld [vmem:[#allocation8 + $0xd38] sm:$0xf0]  ;;  %v10676_v11 = vld [vmem:[#allocation8 + $0xf0c] sm:$0xf] }
 0x211   :  { %4435 = vmatpush.bf16.msrb.mxu3 %v8698_v15  ;;  %v4149_v15 = vadd.f32 %v4148_v6, %v4135_v51  ;;  %v8503_v10 = vld [vmem:[#allocation8 + $0xe38] sm:$0xf0]  ;;  %v8877_v6 = vld [vmem:[#allocation7 + $0xe0] sm:$0xf] }
 0x212   :  { %4394 = vmatpush.bf16.msrb.mxu0 %v8298_v0  ;;  %v10584_v0 = vld [vmem:[#allocation8 + $0xc2c] sm:$0xf]  ;;  %v8631_v51 = vld [vmem:[#allocation8 + $0xf38] sm:$0xf0]  ;;  %v8506_v62 = vor.u32 %v10648_v1, %v8503_v10  ;;  %v9949_v1 = vld [vmem:[#allocation7 + $0xcc] sm:$0xf0] }
 0x213   :  { %4408 = vmatpush.bf16.msrb.mxu1 %v8426_v58  ;;  %v11242_v40 = vadd.f32 %v4162_v35, %v4149_v15  ;;  %v10616_v58 = vld [vmem:[#allocation8 + $0xd2c] sm:$0xf]  ;;  %v8250_v4 = vor.u32 %v10584_v0, %v8247_v28  ;;  %v8231_v26 = vld [vmem:[#allocation8 + $0xc18] sm:$0xf0]  ;;  %v9985_v15 = vld [vmem:[#allocation7 + $0x1ec] sm:$0xf0]  ;;  %v8878_v28 = vor.u32 %v9953_v45, %v8877_v6 }
 0x214   :  { %4422 = vmatpush.bf16.msrb.mxu2 %v8554_v30  ;;  %v8650_v30 = vor.u32 %v10684_v25, %v8647_v36  ;;  %v8378_v52 = vor.u32 %v10616_v58, %v8375_v33  ;;  %v8487_v3 = vld [vmem:[#allocation8 + $0xe18] sm:$0xf0]  ;;  %v8234_v2 = vor.u32 %v10580_v39, %v8231_v26  ;;  %v9133_v35 = vld [vmem:[#allocation7 + $0x2e0] sm:$0xf]  ;;  %v10017_v25 = vld [vmem:[#allocation7 + $0x2ec] sm:$0xf0]  ;;  %v9006_v58 = vor.u32 %v9985_v15, %v9005_v31  ;;  %v11244_v26 = vpop.f32.mrf.mxu0 }
 0x215   :  { %4436 = vmatpush.bf16.msrb.mxu3 %v8682_v34  ;;  %v10680_v34 = vld [vmem:[#allocation8 + $0xf2c] sm:$0xf]  ;;  %v8861_v33 = vld [vmem:[#allocation7 + $0xc0] sm:$0xf]  ;;  %v10013_v39 = vld [vmem:[#allocation7 + $0x2cc] sm:$0xf0] }
 0x216   :  { %4395 = vmatpush.bf16.msrb.mxu0 %v8282_v22  ;;  %v10612_v22 = vld [vmem:[#allocation8 + $0xd0c] sm:$0xf]  ;;  %v8634_v63 = vor.u32 %v10680_v34, %v8631_v51  ;;  %v8989_v10 = vld [vmem:[#allocation7 + $0x1c0] sm:$0xf]  ;;  %v9981_v51 = vld [vmem:[#allocation7 + $0x1cc] sm:$0xf0] }
 0x217   :  { %4409 = vmatpush.bf16.msrb.mxu1 %v8410_v12  ;;  %v8359_v12 = vld [vmem:[#allocation8 + $0xd18] sm:$0xf0]  ;;  %11442 = vst [vmem:[#allocation42_spill] sm:$0xff] %v11244_v26  ;;  %v9977_v45 = vld [vmem:[#allocation7 + $0x1ac] sm:$0xf0] }
 0x218   :  { %4423 = vmatpush.bf16.msrb.mxu2 %v8538_v44  ;;  %v10644_v44 = vld [vmem:[#allocation8 + $0xe0c] sm:$0xf]  ;;  %v8362_v36 = vor.u32 %v10612_v22, %v8359_v12  ;;  %v11246_v22 = vpop.f32.mrf.mxu1  ;;  %v8862_v12 = vor.u32 %v9949_v1, %v8861_v33  ;;  %v9101_v31 = vld [vmem:[#allocation7 + $0x2a0] sm:$0xf]  ;;  %v10037_v1 = vld [vmem:[#allocation7 + $0x38c] sm:$0xf0] }
 0x219   :  { %4437 = vmatpush.bf16.msrb.mxu3 %v8666_v47  ;;  %v8615_v47 = vld [vmem:[#allocation8 + $0xf18] sm:$0xf0]  ;;  %11443 = vst [vmem:[#allocation43_spill] sm:$0xff] %v11246_v22  ;;  %v9229_v15 = vld [vmem:[#allocation7 + $0x3a0] sm:$0xf] }
 0x21a   :  { %4396 = vmatpush.bf16.msrb.mxu0 %v8266_v5  ;;  %v8490_v5 = vor.u32 %v10644_v44, %v8487_v3  ;;  %v8618_v0 = vor.u32 %v10676_v11, %v8615_v47  ;;  %v8990_v44 = vor.u32 %v9981_v51, %v8989_v10  ;;  %v8845_v3 = vld [vmem:[#allocation7 + $0xa0] sm:$0xf]  ;;  %v9945_v11 = vld [vmem:[#allocation7 + $0xac] sm:$0xf0]  ;;  %v8759_v14 = vld [vmem:[#allocation2 + $0x38] sm:$0xf0] }
 0x21b   :  { %4410 = vmatpush.bf16.msrb.mxu1 %v8394_v48  ;;  %v9261_v48 = vld [vmem:[#allocation7 + $0x3e0] sm:$0xf]  ;;  %v9921_v26 = vld [vmem:[#allocation2 + $0x2c] sm:$0xf0] }
 0x21c   :  { %4424 = vmatpush.bf16.msrb.mxu2 %v8522_v19  ;;  %v10049_v19 = vld [vmem:[#allocation7 + $0x3ec] sm:$0xf0]  ;;  %v8973_v47 = vld [vmem:[#allocation7 + $0x1a0] sm:$0xf] }
 0x21d   :  { %4438 = vmatpush.bf16.msrb.mxu3 %v8650_v30  ;;  %v9134_v30 = vor.u32 %v10017_v25, %v9133_v35  ;;  %v9262_v34 = vor.u32 %v10049_v19, %v9261_v48  ;;  %v10041_v35 = vld [vmem:[#allocation7 + $0x3ac] sm:$0xf0]  ;;  %v8846_v25 = vor.u32 %v9945_v11, %v8845_v3  ;;  %v8829_v48 = vld [vmem:[#allocation7 + $0x80] sm:$0xf] }
 0x21e   :  { %4397 = vmatpush.bf16.msrb.mxu0 %v8250_v4  ;;  %v9117_v4 = vld [vmem:[#allocation7 + $0x2c0] sm:$0xf]  ;;  %v9969_v3 = vld [vmem:[#allocation7 + $0x16c] sm:$0xf0] }
 0x21f   :  { %4411 = vmatpush.bf16.msrb.mxu1 %v8378_v52  ;;  %v9245_v52 = vld [vmem:[#allocation7 + $0x3c0] sm:$0xf] }
 0x220   :  { %4425 = vmatpush.bf16.msrb.mxu2 %v8506_v62  ;;  %v10045_v62 = vld [vmem:[#allocation7 + $0x3cc] sm:$0xf0]  ;;  %v8957_v19 = vld [vmem:[#allocation7 + $0x180] sm:$0xf] }
 0x221   :  { %4439 = vmatpush.bf16.msrb.mxu3 %v8634_v63  ;;  %v9118_v63 = vor.u32 %v10013_v39, %v9117_v4  ;;  %v9246_v6 = vor.u32 %v10045_v62, %v9245_v52  ;;  %v8813_v52 = vld [vmem:[#allocation7 + $0x60] sm:$0xf]  ;;  %v9937_v62 = vld [vmem:[#allocation7 + $0x6c] sm:$0xf0] }
 0x222   :  { %4398 = vmatpush.bf16.msrb.mxu0 %v8234_v2  ;;  %v10009_v2 = vld [vmem:[#allocation7 + $0x2ac] sm:$0xf0]  ;;  %v4176_v33 = vpop.f32.mrf.mxu0  ;;  %v9069_v11 = vld [vmem:[#allocation7 + $0x260] sm:$0xf] }
 0x223   :  { %4412 = vmatpush.bf16.msrb.mxu1 %v8362_v36  ;;  %v8974_v36 = vor.u32 %v9977_v45, %v8973_v47  ;;  %v4177_v10 = vadd.f32 %v4176_v33, %v11242_v40  ;;  %v4190_v51 = vpop.f32.mrf.mxu1  ;;  %v10001_v47 = vld [vmem:[#allocation7 + $0x26c] sm:$0xf0] }
 0x224   :  { %4426 = vmatpush.bf16.msrb.mxu2 %v8490_v5  ;;  %v9102_v5 = vor.u32 %v10009_v2, %v9101_v31  ;;  %v10033_v45 = vld [vmem:[#allocation7 + $0x36c] sm:$0xf0]  ;;  %v8814_v31 = vor.u32 %v9937_v62, %v8813_v52  ;;  %v9070_v2 = vor.u32 %v10001_v47, %v9069_v11  ;;  %v9037_v62 = vld [vmem:[#allocation7 + $0x220] sm:$0xf] }
 0x225   :  { %4440 = vmatpush.bf16.msrb.mxu3 %v8618_v0  ;;  %4399 = vmatmul.bf16.vlgmr.msrb.gmra.mxu0 %v11078_v32  ;;  %v9941_v32 = vld [vmem:[#allocation7 + $0x8c] sm:$0xf0]  ;;  %v11252_v0 = vpop.f32.mrf.mxu2 }
 0x226   :  { %5767 = vmatpush.bf16.msra.mxu0 %v8878_v28  ;;  %4413 = vmatmul.bf16.vlgmr.msrb.gmra.mxu1 %v11082_v41  ;;  %11444 = vst [vmem:[#allocation44_spill] sm:$0xff] %v11252_v0  ;;  %v9230_v28 = vor.u32 %v10041_v35, %v9229_v15  ;;  %v10005_v41 = vld [vmem:[#allocation7 + $0x28c] sm:$0xf0]  ;;  %v8797_v15 = vld [vmem:[#allocation7 + $0x40] sm:$0xf] }
 0x227   :  { %5781 = vmatpush.bf16.msra.mxu1 %v9006_v58  ;;  %4427 = vmatmul.bf16.vlgmr.msrb.gmra.mxu2 %v11080_v38  ;;  %v9973_v38 = vld [vmem:[#allocation7 + $0x18c] sm:$0xf0]  ;;  %v9085_v58 = vld [vmem:[#allocation7 + $0x280] sm:$0xf] }
 0x228   :  { %5795 = vmatpush.bf16.msra.mxu2 %v9134_v30  ;;  %4441 = vmatmul.bf16.vlgmr.msrb.gmra.mxu3 %v11084_v46  ;;  %v11254_v30 = vpop.f32.mrf.mxu3  ;;  %v9213_v46 = vld [vmem:[#allocation7 + $0x380] sm:$0xf]  ;;  %v8958_v4 = vor.u32 %v9973_v38, %v8957_v19  ;;  %v9086_v39 = vor.u32 %v10005_v41, %v9085_v58  ;;  %v9933_v35 = vld [vmem:[#allocation7 + $0x4c] sm:$0xf0] }
 0x229   :  { %5809 = vmatpush.bf16.msra.mxu3 %v9262_v34  ;;  %11445 = vst [vmem:[#allocation45_spill] sm:$0xff] %v11254_v30  ;;  %v8830_v34 = vor.u32 %v9941_v32, %v8829_v48  ;;  %v9965_v48 = vld [vmem:[#allocation7 + $0x14c] sm:$0xf0]  ;;  %v9053_v32 = vld [vmem:[#allocation7 + $0x240] sm:$0xf]  ;;  %v8798_v33 = vor.u32 %v9933_v35, %v8797_v15 }
 0x22a   :  { %5768 = vmatpush.bf16.msra.mxu0 %v8862_v12  ;;  %v8941_v12 = vld [vmem:[#allocation7 + $0x160] sm:$0xf]  ;;  %v9997_v19 = vld [vmem:[#allocation7 + $0x24c] sm:$0xf0] }
 0x22b   :  { %5782 = vmatpush.bf16.msra.mxu1 %v8990_v44  ;;  %v9214_v44 = vor.u32 %v10037_v1, %v9213_v46  ;;  %v8942_v40 = vor.u32 %v9969_v3, %v8941_v12  ;;  %v9181_v58 = vld [vmem:[#allocation7 + $0x340] sm:$0xf]  ;;  %v10029_v41 = vld [vmem:[#allocation7 + $0x34c] sm:$0xf0] }
 0x22c   :  { %5796 = vmatpush.bf16.msra.mxu2 %v9118_v63  ;;  %v4191_v63 = vadd.f32 %v4190_v51, %v4177_v10  ;;  %v8781_v46 = vld [vmem:[#allocation7 + $0x20] sm:$0xf]  ;;  %v9929_v51 = vld [vmem:[#allocation7 + $0x2c] sm:$0xf0]  ;;  %v9182_v52 = vor.u32 %v10029_v41, %v9181_v58 }
 0x22d   :  { %5810 = vmatpush.bf16.msra.mxu3 %v9246_v6  ;;  %v9197_v6 = vld [vmem:[#allocation7 + $0x360] sm:$0xf]  ;;  %v9993_v12 = vld [vmem:[#allocation7 + $0x22c] sm:$0xf0]  ;;  %v8782_v47 = vor.u32 %v9929_v51, %v8781_v46 }
 0x22e   :  { %5769 = vmatpush.bf16.msra.mxu0 %v8846_v25  ;;  %v8925_v25 = vld [vmem:[#allocation7 + $0x140] sm:$0xf]  ;;  %v9925_v11 = vld [vmem:[#allocation7 + $0xc] sm:$0xf0]  ;;  %v9038_v15 = vor.u32 %v9993_v12, %v9037_v62  ;;  %v9915_v62 = vld [vmem:[#allocation2 + $0x4] sm:$0xf] }
 0x22f   :  { %5783 = vmatpush.bf16.msra.mxu1 %v8974_v36  ;;  %v9198_v36 = vor.u32 %v10033_v45, %v9197_v6  ;;  %v8926_v10 = vor.u32 %v9965_v48, %v8925_v25  ;;  %v8765_v3 = vld [vmem:[#allocation7] sm:$0xf]  ;;  %v9957_v45 = vld [vmem:[#allocation7 + $0x10c] sm:$0xf0] }
 0x230   :  { %5797 = vmatpush.bf16.msra.mxu2 %v9102_v5  ;;  %v4204_v5 = vpop.f32.mrf.mxu2  ;;  %v4218_v38 = vpop.f32.mrf.mxu3  ;;  %v8893_v6 = vld [vmem:[#allocation7 + $0x100] sm:$0xf]  ;;  %v10021_v25 = vld [vmem:[#allocation7 + $0x30c] sm:$0xf0]  ;;  %v8766_v41 = vor.u32 %v9925_v11, %v8765_v3 }
 0x231   :  { %5811 = vmatpush.bf16.msra.mxu3 %v9230_v28  ;;  %v4205_v28 = vadd.f32 %v4204_v5, %v4191_v63  ;;  %v10025_v63 = vld [vmem:[#allocation7 + $0x32c] sm:$0xf0]  ;;  %v9149_v35 = vld [vmem:[#allocation7 + $0x300] sm:$0xf] }
 0x232   :  { %5770 = vmatpush.bf16.msra.mxu0 %v8830_v34  ;;  %v9054_v34 = vor.u32 %v9997_v19, %v9053_v32  ;;  %v10081_v48 = vld [vmem:[#allocation7 + $0x4ec] sm:$0xf0]  ;;  %v9517_v32 = vld [vmem:[#allocation7 + $0x5e0] sm:$0xf] }
 0x233   :  { %5784 = vmatpush.bf16.msra.mxu1 %v8958_v4  ;;  %v11257_v1 = vadd.f32 %v4218_v38, %v4205_v28  ;;  %v8909_v4 = vld [vmem:[#allocation7 + $0x120] sm:$0xf]  ;;  %v10113_v19 = vld [vmem:[#allocation7 + $0x5ec] sm:$0xf0] }
 0x234   :  { %5798 = vmatpush.bf16.msra.mxu2 %v9086_v39  ;;  %v9961_v39 = vld [vmem:[#allocation7 + $0x12c] sm:$0xf0]  ;;  %v9645_v28 = vld [vmem:[#allocation7 + $0x6e0] sm:$0xf]  ;;  %v9518_v30 = vor.u32 %v10113_v19, %v9517_v32 }
 0x235   :  { %5812 = vmatpush.bf16.msra.mxu3 %v9214_v44  ;;  %11446 = vst [vmem:[#allocation46_spill] sm:$0xff] %v11257_v1  ;;  %v9165_v44 = vld [vmem:[#allocation7 + $0x320] sm:$0xf]  ;;  %v10145_v38 = vld [vmem:[#allocation7 + $0x6ec] sm:$0xf0] }
 0x236   :  { %5771 = vmatpush.bf16.msra.mxu0 %v8814_v31  ;;  %v9021_v31 = vld [vmem:[#allocation7 + $0x200] sm:$0xf]  ;;  %v9166_v5 = vor.u32 %v10025_v63, %v9165_v44  ;;  %v8735_v44 = vld [vmem:[#allocation2 + $0x20] sm:$0xf0]  ;;  %v9916_v63 = vld [vmem:[#allocation2 + $0xc] sm:$0xf]  ;;  %v9646_v0 = vor.u32 %v10145_v38, %v9645_v28 }
 0x237   :  { %5785 = vmatpush.bf16.msra.mxu1 %v8942_v40  ;;  %v9989_v40 = vld [vmem:[#allocation7 + $0x20c] sm:$0xf0]  ;;  %v9773_v58 = vld [vmem:[#allocation7 + $0x7e0] sm:$0xf]  ;;  %v8743_v1 = vld [vmem:[#allocation2 + $0x28] sm:$0xf0] }
 0x238   :  { %5799 = vmatpush.bf16.msra.mxu2 %v9070_v2  ;;  %v8910_v2 = vor.u32 %v9961_v39, %v8909_v4  ;;  %v8733_v46 = vld [vmem:[#allocation2] sm:$0xf]  ;;  %v8741_v4 = vld [vmem:[#allocation2 + $0x8] sm:$0xf]  ;;  %v10077_v3 = vld [vmem:[#allocation7 + $0x4cc] sm:$0xf0] }
 0x239   :  { %5813 = vmatpush.bf16.msra.mxu3 %v9198_v36  ;;  %v9389_v36 = vld [vmem:[#allocation7 + $0x4e0] sm:$0xf]  ;;  %v9920_v39 = vld [vmem:[#allocation2 + $0x24] sm:$0xf0] }
 0x23a   :  { %5772 = vmatpush.bf16.msra.mxu0 %v8798_v33  ;;  %v10177_v33 = vld [vmem:[#allocation7 + $0x7ec] sm:$0xf0]  ;;  %v9919_v51 = vld [vmem:[#allocation2 + $0x1c] sm:$0xf0]  ;;  %v9390_v12 = vor.u32 %v10081_v48, %v9389_v36  ;;  %v11265_v36 = vpop.f32.mrf.mxu0  ;;  %v11269_v48 = vor.u32 %v9916_v63, %v8743_v1 }
 0x23b   :  { %5786 = vmatpush.bf16.msra.mxu1 %v8926_v10  ;;  %v8894_v10 = vor.u32 %v9957_v45, %v8893_v6  ;;  %v9501_v11 = vld [vmem:[#allocation7 + $0x5c0] sm:$0xf]  ;;  %v9774_v22 = vor.u32 %v10177_v33, %v9773_v58  ;;  %v10109_v6 = vld [vmem:[#allocation7 + $0x5cc] sm:$0xf0]  ;;  %11447 = vst [vmem:[#allocation47_spill] sm:$0xff] %v11265_v36 }
 0x23c   :  { %5800 = vmatpush.bf16.msra.mxu2 %v9054_v34  ;;  %v9022_v34 = vor.u32 %v9989_v40, %v9021_v31  ;;  %v9629_v45 = vld [vmem:[#allocation7 + $0x6c0] sm:$0xf]  ;;  %v10141_v31 = vld [vmem:[#allocation7 + $0x6cc] sm:$0xf0]  ;;  %v11261_v40 = vor.u32 %v9920_v39, %v8741_v4  ;;  %v9502_v19 = vor.u32 %v10109_v6, %v9501_v11 }
 0x23d   :  { %5814 = vmatpush.bf16.msra.mxu3 %v9182_v52  ;;  %v9150_v52 = vor.u32 %v10021_v25, %v9149_v35  ;;  %v9757_v35 = vld [vmem:[#allocation7 + $0x7c0] sm:$0xf]  ;;  %v10173_v25 = vld [vmem:[#allocation7 + $0x7cc] sm:$0xf0]  ;;  %v9630_v28 = vor.u32 %v10141_v31, %v9629_v45 }
 0x23e   :  { %5773 = vmatpush.bf16.msra.mxu0 %v8782_v47  ;;  %v9373_v47 = vld [vmem:[#allocation7 + $0x4c0] sm:$0xf]  ;;  %v10073_v58 = vld [vmem:[#allocation7 + $0x4ac] sm:$0xf0]  ;;  %v9758_v33 = vor.u32 %v10173_v25, %v9757_v35 }
 0x23f   :  { %5787 = vmatpush.bf16.msra.mxu1 %v8910_v2  ;;  %v11259_v2 = vor.u32 %v9919_v51, %v8733_v46  ;;  %v9374_v32 = vor.u32 %v10077_v3, %v9373_v47  ;;  %v9357_v38 = vld [vmem:[#allocation7 + $0x4a0] sm:$0xf]  ;;  %v10105_v46 = vld [vmem:[#allocation7 + $0x5ac] sm:$0xf0]  ;;  %v11277_v3 = vpop.f32.mrf.mxu3 }
 0x240   :  { %5801 = vmatpush.bf16.msra.mxu2 %v9038_v15  ;;  %v11263_v15 = vor.u32 %v9915_v62, %v8735_v44  ;;  %v9613_v51 = vld [vmem:[#allocation7 + $0x6a0] sm:$0xf]  ;;  %v10069_v39 = vld [vmem:[#allocation7 + $0x48c] sm:$0xf0]  ;;  %11450 = vst [vmem:[#allocation50_spill] sm:$0xff] %v11277_v3 }
 0x241   :  { %5815 = vmatpush.bf16.msra.mxu3 %v9166_v5  ;;  %v11267_v5 = vpop.f32.mrf.mxu1  ;;  %v9741_v1 = vld [vmem:[#allocation7 + $0x7a0] sm:$0xf]  ;;  %v10101_v44 = vld [vmem:[#allocation7 + $0x58c] sm:$0xf0] }
 0x242   :  { %5774 = vmatpush.bf16.msra.mxu0 %v8766_v41  ;;  %11448 = vst [vmem:[#allocation48_spill] sm:$0xff] %v11267_v5  ;;  %v9485_v41 = vld [vmem:[#allocation7 + $0x5a0] sm:$0xf]  ;;  %v10133_v47 = vld [vmem:[#allocation7 + $0x68c] sm:$0xf0]  ;;  %v4232_v31 = vpop.f32.mrf.mxu0 }
 0x243   :  { %5788 = vmatpush.bf16.msra.mxu1 %v8894_v10  ;;  %v10137_v10 = vld [vmem:[#allocation7 + $0x6ac] sm:$0xf0]  ;;  %v9341_v4 = vld [vmem:[#allocation7 + $0x480] sm:$0xf]  ;;  %v9135_v5 = vld [vmem:[#allocation7 + $0x2f0] sm:$0xf0] }
 0x244   :  { %5802 = vmatpush.bf16.msra.mxu2 %v9022_v34  ;;  %v10169_v34 = vld [vmem:[#allocation7 + $0x7ac] sm:$0xf0]  ;;  %v9469_v62 = vld [vmem:[#allocation7 + $0x580] sm:$0xf]  ;;  %v9342_v45 = vor.u32 %v10069_v39, %v9341_v4 }
 0x245   :  { %5816 = vmatpush.bf16.msra.mxu3 %v9150_v52  ;;  %5775 = vmatmul.bf16.vlgmr.msra.gmra.mxu0 %v11259_v2  ;;  %v11275_v52 = vpop.f32.mrf.mxu2  ;;  %v9597_v63 = vld [vmem:[#allocation7 + $0x680] sm:$0xf]  ;;  %v10165_v6 = vld [vmem:[#allocation7 + $0x78c] sm:$0xf0]  ;;  %v9470_v25 = vor.u32 %v10101_v44, %v9469_v62 }
 0x246   :  { %5823 = vmatpush.bf16.msrb.mxu0 %v9390_v12  ;;  %5789 = vmatmul.bf16.vlgmr.msra.gmra.mxu1 %v11263_v15  ;;  %11449 = vst [vmem:[#allocation49_spill] sm:$0xff] %v11275_v52  ;;  %v9742_v12 = vor.u32 %v10169_v34, %v9741_v1  ;;  %v9725_v11 = vld [vmem:[#allocation7 + $0x780] sm:$0xf]  ;;  %v10161_v1 = vld [vmem:[#allocation7 + $0x76c] sm:$0xf0] }
 0x247   :  { %5837 = vmatpush.bf16.msrb.mxu1 %v9518_v30  ;;  %5803 = vmatmul.bf16.vlgmr.msra.gmra.mxu2 %v11261_v40  ;;  %v9486_v30 = vor.u32 %v10105_v46, %v9485_v41  ;;  %v9726_v41 = vor.u32 %v10165_v6, %v9725_v11  ;;  %v9581_v46 = vld [vmem:[#allocation7 + $0x660] sm:$0xf]  ;;  %v10061_v4 = vld [vmem:[#allocation7 + $0x44c] sm:$0xf0]  ;;  %v10015_v52 = vld [vmem:[#allocation7 + $0x2e4] sm:$0xf] }
 0x248   :  { %5851 = vmatpush.bf16.msrb.mxu2 %v9646_v0  ;;  %5817 = vmatmul.bf16.vlgmr.msra.gmra.mxu3 %v11269_v48  ;;  %v9358_v0 = vor.u32 %v10073_v58, %v9357_v38  ;;  %v9453_v38 = vld [vmem:[#allocation7 + $0x560] sm:$0xf]  ;;  %v10093_v44 = vld [vmem:[#allocation7 + $0x54c] sm:$0xf0]  ;;  %v9138_v49 = vor.u32 %v10015_v52, %v9135_v5  ;;  %v9247_v5 = vld [vmem:[#allocation7 + $0x3d0] sm:$0xf0] }
 0x249   :  { %5865 = vmatpush.bf16.msrb.mxu3 %v9774_v22  ;;  %v9614_v22 = vor.u32 %v10137_v10, %v9613_v51  ;;  %v4246_v35 = vpop.f32.mrf.mxu1  ;;  %v10129_v51 = vld [vmem:[#allocation7 + $0x66c] sm:$0xf0]  ;;  %v9709_v10 = vld [vmem:[#allocation7 + $0x760] sm:$0xf] }
 0x24a   :  { %5824 = vmatpush.bf16.msrb.mxu0 %v9374_v32  ;;  %v9598_v32 = vor.u32 %v10133_v47, %v9597_v63  ;;  %v4247_v58 = vadd.f32 %v4246_v35, %v4232_v31  ;;  %v9437_v39 = vld [vmem:[#allocation7 + $0x540] sm:$0xf]  ;;  %v9710_v62 = vor.u32 %v10161_v1, %v9709_v10  ;;  %v10157_v6 = vld [vmem:[#allocation7 + $0x74c] sm:$0xf0] }
 0x24b   :  { %5838 = vmatpush.bf16.msrb.mxu1 %v9502_v19  ;;  %v9325_v19 = vld [vmem:[#allocation7 + $0x460] sm:$0xf]  ;;  %v10121_v10 = vld [vmem:[#allocation7 + $0x62c] sm:$0xf0] }
 0x24c   :  { %5852 = vmatpush.bf16.msrb.mxu2 %v9630_v28  ;;  %v10065_v28 = vld [vmem:[#allocation7 + $0x46c] sm:$0xf0]  ;;  %v9565_v63 = vld [vmem:[#allocation7 + $0x640] sm:$0xf] }
 0x24d   :  { %5866 = vmatpush.bf16.msrb.mxu3 %v9758_v33  ;;  %v10097_v33 = vld [vmem:[#allocation7 + $0x56c] sm:$0xf0]  ;;  %v9326_v34 = vor.u32 %v10065_v28, %v9325_v19  ;;  %v4260_v47 = vpop.f32.mrf.mxu2  ;;  %v9693_v11 = vld [vmem:[#allocation7 + $0x740] sm:$0xf]  ;;  %v4274_v19 = vpop.f32.mrf.mxu3 }
 0x24e   :  { %5825 = vmatpush.bf16.msrb.mxu0 %v9358_v0  ;;  %v9454_v0 = vor.u32 %v10097_v33, %v9453_v38  ;;  %v4261_v31 = vadd.f32 %v4260_v47, %v4247_v58  ;;  %v10057_v28 = vld [vmem:[#allocation7 + $0x42c] sm:$0xf0]  ;;  %v9421_v38 = vld [vmem:[#allocation7 + $0x520] sm:$0xf] }
 0x24f   :  { %5839 = vmatpush.bf16.msrb.mxu1 %v9486_v30  ;;  %v9582_v30 = vor.u32 %v10129_v51, %v9581_v46  ;;  %v10089_v33 = vld [vmem:[#allocation7 + $0x52c] sm:$0xf0]  ;;  %v9694_v46 = vor.u32 %v10157_v6, %v9693_v11  ;;  %v9549_v51 = vld [vmem:[#allocation7 + $0x620] sm:$0xf]  ;;  %v8879_v6 = vld [vmem:[#allocation7 + $0xf0] sm:$0xf0] }
 0x250   :  { %5853 = vmatpush.bf16.msrb.mxu2 %v9614_v22  ;;  %v9309_v22 = vld [vmem:[#allocation7 + $0x440] sm:$0xf]  ;;  %v10153_v3 = vld [vmem:[#allocation7 + $0x72c] sm:$0xf0] }
 0x251   :  { %5867 = vmatpush.bf16.msrb.mxu3 %v9742_v12  ;;  %v10125_v12 = vld [vmem:[#allocation7 + $0x64c] sm:$0xf0]  ;;  %v9310_v35 = vor.u32 %v10061_v4, %v9309_v22  ;;  %v9677_v1 = vld [vmem:[#allocation7 + $0x720] sm:$0xf] }
 0x252   :  { %5826 = vmatpush.bf16.msrb.mxu0 %v9342_v45  ;;  %v9293_v45 = vld [vmem:[#allocation7 + $0x420] sm:$0xf]  ;;  %v10149_v47 = vld [vmem:[#allocation7 + $0x70c] sm:$0xf0]  ;;  %v9678_v11 = vor.u32 %v10153_v3, %v9677_v1  ;;  %v9918_v1 = vld [vmem:[#allocation2 + $0x1c] sm:$0xf] }
 0x253   :  { %5840 = vmatpush.bf16.msrb.mxu1 %v9470_v25  ;;  %v9438_v25 = vor.u32 %v10093_v44, %v9437_v39  ;;  %v9277_v58 = vld [vmem:[#allocation7 + $0x400] sm:$0xf]  ;;  %v9294_v22 = vor.u32 %v10057_v28, %v9293_v45  ;;  %v10117_v39 = vld [vmem:[#allocation7 + $0x60c] sm:$0xf0]  ;;  %v9422_v44 = vor.u32 %v10089_v33, %v9421_v38  ;;  %v9263_v28 = vld [vmem:[#allocation7 + $0x3f0] sm:$0xf0]  ;;  %v11287_v52 = vor.u32 %v9918_v1, %v8759_v14 }
 0x254   :  { %5854 = vmatpush.bf16.msrb.mxu2 %v9598_v32  ;;  %v9566_v32 = vor.u32 %v10125_v12, %v9565_v63  ;;  %v9405_v4 = vld [vmem:[#allocation7 + $0x500] sm:$0xf]  ;;  %v9550_v63 = vor.u32 %v10121_v10, %v9549_v51  ;;  %v8749_v36 = vld [vmem:[#allocation2 + $0x10] sm:$0xf]  ;;  %v8757_v38 = vld [vmem:[#allocation2 + $0x18] sm:$0xf] }
 0x255   :  { %5868 = vmatpush.bf16.msrb.mxu3 %v9726_v41  ;;  %v11279_v41 = vadd.f32 %v4274_v19, %v4261_v31  ;;  %v9661_v12 = vld [vmem:[#allocation7 + $0x700] sm:$0xf]  ;;  %v9983_v31 = vld [vmem:[#allocation7 + $0x1e4] sm:$0xf]  ;;  %v9007_v19 = vld [vmem:[#allocation7 + $0x1f0] sm:$0xf0] }
 0x256   :  { %5827 = vmatpush.bf16.msrb.mxu0 %v9326_v34  ;;  %v10053_v34 = vld [vmem:[#allocation7 + $0x40c] sm:$0xf0]  ;;  %v9922_v33 = vld [vmem:[#allocation2 + $0x34] sm:$0xf0]  ;;  %v9917_v51 = vld [vmem:[#allocation2 + $0x14] sm:$0xf]  ;;  %v9662_v3 = vor.u32 %v10149_v47, %v9661_v12  ;;  %v9010_v8 = vor.u32 %v9983_v31, %v9007_v19 }
 0x257   :  { %5841 = vmatpush.bf16.msrb.mxu1 %v9454_v0  ;;  %v10085_v0 = vld [vmem:[#allocation7 + $0x50c] sm:$0xf0]  ;;  %v9278_v45 = vor.u32 %v10053_v34, %v9277_v58  ;;  %v8751_v10 = vld [vmem:[#allocation2 + $0x30] sm:$0xf0]  ;;  %v9947_v58 = vld [vmem:[#allocation7 + $0xc4] sm:$0xf]  ;;  %v11283_v12 = vor.u32 %v9922_v33, %v8757_v38  ;;  %v4276_v33 = vpop.f32.mrf.mxu3 }
 0x258   :  { %5855 = vmatpush.bf16.msrb.mxu2 %v9582_v30  ;;  %v9533_v30 = vld [vmem:[#allocation7 + $0x600] sm:$0xf]  ;;  %v8863_v34 = vld [vmem:[#allocation7 + $0xd0] sm:$0xf0]  ;;  %v11285_v47 = vor.u32 %v9917_v51, %v8751_v10  ;;  %v9975_v19 = vld [vmem:[#allocation7 + $0x1a4] sm:$0xf] }
 0x259   :  { %5869 = vmatpush.bf16.msrb.mxu3 %v9710_v62  ;;  %v9951_v62 = vld [vmem:[#allocation7 + $0xe4] sm:$0xf]  ;;  %v8847_v31 = vld [vmem:[#allocation7 + $0xb0] sm:$0xf0] }
 0x25a   :  { %5828 = vmatpush.bf16.msrb.mxu0 %v9310_v35  ;;  %v10047_v35 = vld [vmem:[#allocation7 + $0x3e4] sm:$0xf] }
 0x25b   :  { %5842 = vmatpush.bf16.msrb.mxu1 %v9438_v25  ;;  %v9406_v25 = vor.u32 %v10085_v0, %v9405_v4  ;;  %v8991_v4 = vld [vmem:[#allocation7 + $0x1d0] sm:$0xf0]  ;;  %v10011_v0 = vld [vmem:[#allocation7 + $0x2c4] sm:$0xf] }
 0x25c   :  { %5856 = vmatpush.bf16.msrb.mxu2 %v9566_v32  ;;  %v9534_v32 = vor.u32 %v10117_v39, %v9533_v30  ;;  %v9119_v30 = vld [vmem:[#allocation7 + $0x2d0] sm:$0xf0]  ;;  %v4248_v39 = vpop.f32.mrf.mxu1  ;;  %v10039_v14 = vld [vmem:[#allocation7 + $0x3a4] sm:$0xf] }
 0x25d   :  { %5870 = vmatpush.bf16.msrb.mxu3 %v9694_v46  ;;  %v8882_v46 = vor.u32 %v9951_v62, %v8879_v6  ;;  %v10043_v62 = vld [vmem:[#allocation7 + $0x3c4] sm:$0xf] }
 0x25e   :  { %5829 = vmatpush.bf16.msrb.mxu0 %v9294_v22  ;;  %v4234_v22 = vpop.f32.mrf.mxu0  ;;  %v9943_v6 = vld [vmem:[#allocation7 + $0xa4] sm:$0xf] }
 0x25f   :  { %5843 = vmatpush.bf16.msrb.mxu1 %v9422_v44  ;;  %v9266_v44 = vor.u32 %v10047_v35, %v9263_v28  ;;  %v9250_v35 = vor.u32 %v10043_v62, %v9247_v5  ;;  %v10007_v28 = vld [vmem:[#allocation7 + $0x2a4] sm:$0xf]  ;;  %v4249_v10 = vadd.f32 %v4248_v39, %v4234_v22 }
 0x260   :  { %5857 = vmatpush.bf16.msrb.mxu2 %v9550_v63  ;;  %v11281_v63 = vor.u32 %v9921_v26, %v8749_v36  ;;  %v8994_v26 = vor.u32 %v9979_v43, %v8991_v4  ;;  %v9122_v36 = vor.u32 %v10011_v0, %v9119_v30  ;;  %v8850_v43 = vor.u32 %v9943_v6, %v8847_v31  ;;  %v9939_v51 = vld [vmem:[#allocation7 + $0x84] sm:$0xf]  ;;  %v9215_v30 = vld [vmem:[#allocation7 + $0x390] sm:$0xf0] }
 0x261   :  { %5871 = vmatpush.bf16.msrb.mxu3 %v9678_v11  ;;  %v8866_v11 = vor.u32 %v9947_v58, %v8863_v34  ;;  %v8959_v58 = vld [vmem:[#allocation7 + $0x190] sm:$0xf0]  ;;  %v10003_v34 = vld [vmem:[#allocation7 + $0x284] sm:$0xf] }
 0x262   :  { %5830 = vmatpush.bf16.msrb.mxu0 %v9278_v45  ;;  %v8975_v45 = vld [vmem:[#allocation7 + $0x1b0] sm:$0xf0]  ;;  %v10035_v0 = vld [vmem:[#allocation7 + $0x384] sm:$0xf] }
 0x263   :  { %5844 = vmatpush.bf16.msrb.mxu1 %v9406_v25  ;;  %v9103_v25 = vld [vmem:[#allocation7 + $0x2b0] sm:$0xf0]  ;;  %v9935_v6 = vld [vmem:[#allocation7 + $0x64] sm:$0xf]  ;;  %v9218_v39 = vor.u32 %v10035_v0, %v9215_v30 }
 0x264   :  { %5858 = vmatpush.bf16.msrb.mxu2 %v9534_v32  ;;  %v9231_v32 = vld [vmem:[#allocation7 + $0x3b0] sm:$0xf0]  ;;  %v9106_v38 = vor.u32 %v10007_v28, %v9103_v25  ;;  %v9999_v28 = vld [vmem:[#allocation7 + $0x264] sm:$0xf] }
 0x265   :  { %5872 = vmatpush.bf16.msrb.mxu3 %v9662_v3  ;;  %5831 = vmatmul.bf16.vlgmr.msrb.gmra.mxu0 %v11281_v63  ;;  %v8831_v3 = vld [vmem:[#allocation7 + $0x90] sm:$0xf0]  ;;  %v9234_v1 = vor.u32 %v10039_v14, %v9231_v32  ;;  %v10031_v14 = vld [vmem:[#allocation7 + $0x364] sm:$0xf] }
 0x266   :  { %5879 = vmatpush.bf16.msra.mxu0 %v8882_v46  ;;  %5845 = vmatmul.bf16.vlgmr.msrb.gmra.mxu1 %v11285_v47  ;;  %v9971_v46 = vld [vmem:[#allocation7 + $0x184] sm:$0xf]  ;;  %v4288_v4 = vpop.f32.mrf.mxu0  ;;  %v8834_v5 = vor.u32 %v9939_v51, %v8831_v3  ;;  %v8815_v31 = vld [vmem:[#allocation7 + $0x70] sm:$0xf0] }
 0x267   :  { %5893 = vmatpush.bf16.msra.mxu1 %v9010_v8  ;;  %5859 = vmatmul.bf16.vlgmr.msrb.gmra.mxu2 %v11283_v12  ;;  %v8978_v8 = vor.u32 %v9975_v19, %v8975_v45  ;;  %v4289_v62 = vadd.f32 %v4288_v4, %v11279_v41  ;;  %v9967_v19 = vld [vmem:[#allocation7 + $0x164] sm:$0xf]  ;;  %v8943_v45 = vld [vmem:[#allocation7 + $0x170] sm:$0xf0]  ;;  %v8818_v41 = vor.u32 %v9935_v6, %v8815_v31 }
 0x268   :  { %5907 = vmatpush.bf16.msra.mxu2 %v9138_v49  ;;  %5873 = vmatmul.bf16.vlgmr.msrb.gmra.mxu3 %v11287_v52  ;;  %v4262_v49 = vpop.f32.mrf.mxu2  ;;  %v9071_v25 = vld [vmem:[#allocation7 + $0x270] sm:$0xf0]  ;;  %v9963_v3 = vld [vmem:[#allocation7 + $0x144] sm:$0xf] }
 0x269   :  { %5921 = vmatpush.bf16.msra.mxu3 %v9266_v44  ;;  %v9087_v44 = vld [vmem:[#allocation7 + $0x290] sm:$0xf0]  ;;  %v4263_v22 = vadd.f32 %v4262_v49, %v4249_v10  ;;  %v10027_v30 = vld [vmem:[#allocation7 + $0x344] sm:$0xf] }
 0x26a   :  { %5880 = vmatpush.bf16.msra.mxu0 %v8866_v11  ;;  %v4302_v11 = vpop.f32.mrf.mxu1  ;;  %v9199_v32 = vld [vmem:[#allocation7 + $0x370] sm:$0xf0]  ;;  %v9927_v31 = vld [vmem:[#allocation7 + $0x24] sm:$0xf] }
 0x26b   :  { %5894 = vmatpush.bf16.msra.mxu1 %v8994_v26  ;;  %v8962_v26 = vor.u32 %v9971_v46, %v8959_v58  ;;  %v8799_v51 = vld [vmem:[#allocation7 + $0x50] sm:$0xf0]  ;;  %v4277_v46 = vadd.f32 %v4276_v33, %v4263_v22  ;;  %v9995_v58 = vld [vmem:[#allocation7 + $0x244] sm:$0xf]  ;;  %v4330_v0 = vpop.f32.mrf.mxu3 }
 0x26c   :  { %5908 = vmatpush.bf16.msra.mxu2 %v9122_v36  ;;  %v9090_v36 = vor.u32 %v10003_v34, %v9087_v44  ;;  %v8927_v10 = vld [vmem:[#allocation7 + $0x150] sm:$0xf0]  ;;  %v9959_v22 = vld [vmem:[#allocation7 + $0x124] sm:$0xf] }
 0x26d   :  { %5922 = vmatpush.bf16.msra.mxu3 %v9250_v35  ;;  %v4303_v35 = vadd.f32 %v4302_v11, %v4289_v62  ;;  %v9055_v34 = vld [vmem:[#allocation7 + $0x250] sm:$0xf0]  ;;  %v8930_v33 = vor.u32 %v9963_v3, %v8927_v10  ;;  %v9955_v3 = vld [vmem:[#allocation7 + $0x104] sm:$0xf] }
 0x26e   :  { %5881 = vmatpush.bf16.msra.mxu0 %v8850_v43  ;;  %v8946_v43 = vor.u32 %v9967_v19, %v8943_v45  ;;  %v4290_v4 = vpop.f32.mrf.mxu0  ;;  %v9183_v62 = vld [vmem:[#allocation7 + $0x350] sm:$0xf0]  ;;  %v9058_v6 = vor.u32 %v9995_v58, %v9055_v34  ;;  %v10019_v34 = vld [vmem:[#allocation7 + $0x304] sm:$0xf] }
 0x26f   :  { %5895 = vmatpush.bf16.msra.mxu1 %v8978_v8  ;;  %v9074_v8 = vor.u32 %v9999_v28, %v9071_v25  ;;  %v8783_v19 = vld [vmem:[#allocation7 + $0x30] sm:$0xf0]  ;;  %v9991_v28 = vld [vmem:[#allocation7 + $0x224] sm:$0xf] }
 0x270   :  { %5909 = vmatpush.bf16.msra.mxu2 %v9106_v38  ;;  %v9931_v38 = vld [vmem:[#allocation7 + $0x44] sm:$0xf]  ;;  %v4316_v49 = vpop.f32.mrf.mxu2  ;;  %v8911_v45 = vld [vmem:[#allocation7 + $0x130] sm:$0xf0] }
 0x271   :  { %5923 = vmatpush.bf16.msra.mxu3 %v9234_v1  ;;  %v9202_v1 = vor.u32 %v10031_v14, %v9199_v32  ;;  %v4317_v44 = vadd.f32 %v4316_v49, %v4303_v35  ;;  %v8802_v11 = vor.u32 %v9931_v38, %v8799_v51  ;;  %v9039_v25 = vld [vmem:[#allocation7 + $0x230] sm:$0xf0]  ;;  %v10023_v14 = vld [vmem:[#allocation7 + $0x324] sm:$0xf] }
 0x272   :  { %5882 = vmatpush.bf16.msra.mxu0 %v8834_v5  ;;  %v4291_v5 = vadd.f32 %v4290_v4, %v4277_v46  ;;  %v9167_v32 = vld [vmem:[#allocation7 + $0x330] sm:$0xf0]  ;;  %v9923_v38 = vld [vmem:[#allocation7 + $0x4] sm:$0xf]  ;;  %v9042_v51 = vor.u32 %v9991_v28, %v9039_v25 }
 0x273   :  { %5896 = vmatpush.bf16.msra.mxu1 %v8962_v26  ;;  %v4304_v26 = vpop.f32.mrf.mxu1  ;;  %v8895_v46 = vld [vmem:[#allocation7 + $0x110] sm:$0xf0]  ;;  %v9987_v49 = vld [vmem:[#allocation7 + $0x204] sm:$0xf] }
 0x274   :  { %5910 = vmatpush.bf16.msra.mxu2 %v9090_v36  ;;  %v11294_v36 = vadd.f32 %v4330_v0, %v4317_v44  ;;  %v4305_v35 = vadd.f32 %v4304_v26, %v4291_v5  ;;  %v9023_v58 = vld [vmem:[#allocation7 + $0x210] sm:$0xf0]  ;;  %v4332_v0 = vpop.f32.mrf.mxu3  ;;  %v10111_v5 = vld [vmem:[#allocation7 + $0x5e4] sm:$0xf] }
 0x275   :  { %5924 = vmatpush.bf16.msra.mxu3 %v9218_v39  ;;  %v9186_v39 = vor.u32 %v10027_v30, %v9183_v62  ;;  %v9151_v44 = vld [vmem:[#allocation7 + $0x310] sm:$0xf0]  ;;  %v10079_v30 = vld [vmem:[#allocation7 + $0x4e4] sm:$0xf] }
 0x276   :  { %5883 = vmatpush.bf16.msra.mxu0 %v8818_v41  ;;  %v8786_v41 = vor.u32 %v9927_v31, %v8783_v19  ;;  %v9391_v62 = vld [vmem:[#allocation7 + $0x4f0] sm:$0xf0]  ;;  %v8898_v19 = vor.u32 %v9955_v3, %v8895_v46  ;;  %v9154_v28 = vor.u32 %v10019_v34, %v9151_v44  ;;  %v10103_v44 = vld [vmem:[#allocation7 + $0x5a4] sm:$0xf] }
 0x277   :  { %5897 = vmatpush.bf16.msra.mxu1 %v8946_v43  ;;  %v8767_v43 = vld [vmem:[#allocation7 + $0x10] sm:$0xf0] }
 0x278   :  { %5911 = vmatpush.bf16.msra.mxu2 %v9074_v8  ;;  %v8914_v8 = vor.u32 %v9959_v22, %v8911_v45  ;;  %v4318_v10 = vpop.f32.mrf.mxu2  ;;  %v9519_v26 = vld [vmem:[#allocation7 + $0x5f0] sm:$0xf0]  ;;  %v9026_v22 = vor.u32 %v9987_v49, %v9023_v58  ;;  %v10071_v58 = vld [vmem:[#allocation7 + $0x4a4] sm:$0xf] }
 0x279   :  { %5925 = vmatpush.bf16.msra.mxu3 %v9202_v1  ;;  %v9170_v1 = vor.u32 %v10023_v14, %v9167_v32  ;;  %v4319_v4 = vadd.f32 %v4318_v10, %v4305_v35  ;;  %v9775_v45 = vld [vmem:[#allocation7 + $0x7f0] sm:$0xf0]  ;;  %v9394_v35 = vor.u32 %v10079_v30, %v9391_v62  ;;  %v9522_v25 = vor.u32 %v10111_v5, %v9519_v26  ;;  %v10075_v32 = vld [vmem:[#allocation7 + $0x4c4] sm:$0xf] }
 0x27a   :  { %5884 = vmatpush.bf16.msra.mxu0 %v8802_v11  ;;  %v8770_v11 = vor.u32 %v9923_v38, %v8767_v43  ;;  %v9375_v10 = vld [vmem:[#allocation7 + $0x4d0] sm:$0xf0]  ;;  %v10135_v30 = vld [vmem:[#allocation7 + $0x6a4] sm:$0xf] }
 0x27b   :  { %5898 = vmatpush.bf16.msra.mxu1 %v8930_v33  ;;  %v10143_v33 = vld [vmem:[#allocation7 + $0x6e4] sm:$0xf]  ;;  %v11296_v31 = vadd.f32 %v4332_v0, %v4319_v4  ;;  %v9503_v43 = vld [vmem:[#allocation7 + $0x5d0] sm:$0xf0]  ;;  %v9378_v46 = vor.u32 %v10075_v32, %v9375_v10 }
 0x27c   :  { %5912 = vmatpush.bf16.msra.mxu2 %v9058_v6  ;;  %v9647_v6 = vld [vmem:[#allocation7 + $0x6f0] sm:$0xf0]  ;;  %v10167_v5 = vld [vmem:[#allocation7 + $0x7a4] sm:$0xf] }
 0x27d   :  { %5926 = vmatpush.bf16.msra.mxu3 %v9186_v39  ;;  %v10175_v39 = vld [vmem:[#allocation7 + $0x7e4] sm:$0xf]  ;;  %v9650_v14 = vor.u32 %v10143_v33, %v9647_v6  ;;  %v9759_v3 = vld [vmem:[#allocation7 + $0x7d0] sm:$0xf0] }
 0x27e   :  { %5885 = vmatpush.bf16.msra.mxu0 %v8786_v41  ;;  %v10107_v41 = vld [vmem:[#allocation7 + $0x5c4] sm:$0xf]  ;;  %v9778_v38 = vor.u32 %v10175_v39, %v9775_v45  ;;  %v9359_v34 = vld [vmem:[#allocation7 + $0x4b0] sm:$0xf0] }
 0x27f   :  { %5899 = vmatpush.bf16.msra.mxu1 %v8914_v8  ;;  %v9631_v8 = vld [vmem:[#allocation7 + $0x6d0] sm:$0xf0]  ;;  %v9506_v49 = vor.u32 %v10107_v41, %v9503_v43  ;;  %v10067_v6 = vld [vmem:[#allocation7 + $0x484] sm:$0xf] }
 0x280   :  { %5913 = vmatpush.bf16.msra.mxu2 %v9042_v51  ;;  %v10171_v51 = vld [vmem:[#allocation7 + $0x7c4] sm:$0xf]  ;;  %v9487_v0 = vld [vmem:[#allocation7 + $0x5b0] sm:$0xf0] }
 0x281   :  { %5927 = vmatpush.bf16.msra.mxu3 %v9170_v1  ;;  %v9634_v1 = vor.u32 %v10139_v17, %v9631_v8  ;;  %v9762_v4 = vor.u32 %v10171_v51, %v9759_v3  ;;  %v9615_v62 = vld [vmem:[#allocation7 + $0x6b0] sm:$0xf0]  ;;  %v9362_v17 = vor.u32 %v10071_v58, %v9359_v34  ;;  %v9490_v26 = vor.u32 %v10103_v44, %v9487_v0  ;;  %v10063_v51 = vld [vmem:[#allocation7 + $0x464] sm:$0xf] }
 0x282   :  { %5886 = vmatpush.bf16.msra.mxu0 %v8770_v11  ;;  %v9743_v11 = vld [vmem:[#allocation7 + $0x7b0] sm:$0xf0]  ;;  %v9618_v33 = vor.u32 %v10135_v30, %v9615_v62  ;;  %v10127_v34 = vld [vmem:[#allocation7 + $0x664] sm:$0xf] }
 0x283   :  { %5900 = vmatpush.bf16.msra.mxu1 %v8898_v19  ;;  %v9343_v19 = vld [vmem:[#allocation7 + $0x490] sm:$0xf0]  ;;  %v9746_v39 = vor.u32 %v10167_v5, %v9743_v11  ;;  %v10059_v5 = vld [vmem:[#allocation7 + $0x444] sm:$0xf] }
 0x284   :  { %5914 = vmatpush.bf16.msra.mxu2 %v9026_v22  ;;  %v10099_v22 = vld [vmem:[#allocation7 + $0x584] sm:$0xf]  ;;  %v9471_v45 = vld [vmem:[#allocation7 + $0x590] sm:$0xf0]  ;;  %v9346_v41 = vor.u32 %v10067_v6, %v9343_v19 }
 0x285   :  { %5928 = vmatpush.bf16.msra.mxu3 %v9154_v28  ;;  %5887 = vmatmul.bf16.vlgmr.msra.gmra.mxu0 %v11259_v2  ;;  %v10131_v28 = vld [vmem:[#allocation7 + $0x684] sm:$0xf]  ;;  %v9727_v32 = vld [vmem:[#allocation7 + $0x790] sm:$0xf0]  ;;  %v9474_v43 = vor.u32 %v10099_v22, %v9471_v45 }
 0x286   :  { %5935 = vmatpush.bf16.msrb.mxu0 %v9394_v35  ;;  %5901 = vmatmul.bf16.vlgmr.msra.gmra.mxu1 %v11263_v15  ;;  %v9599_v35 = vld [vmem:[#allocation7 + $0x690] sm:$0xf0]  ;;  %v10123_v19 = vld [vmem:[#allocation7 + $0x644] sm:$0xf] }
 0x287   :  { %5949 = vmatpush.bf16.msrb.mxu1 %v9522_v25  ;;  %5915 = vmatmul.bf16.vlgmr.msra.gmra.mxu2 %v11261_v40  ;;  %v4344_v25 = vpop.f32.mrf.mxu0  ;;  %v9602_v8 = vor.u32 %v10131_v28, %v9599_v35  ;;  %v9327_v3 = vld [vmem:[#allocation7 + $0x470] sm:$0xf0]  ;;  %v10155_v35 = vld [vmem:[#allocation7 + $0x744] sm:$0xf] }
 0x288   :  { %5963 = vmatpush.bf16.msrb.mxu2 %v9650_v14  ;;  %5929 = vmatmul.bf16.vlgmr.msra.gmra.mxu3 %v11269_v48  ;;  %v10163_v14 = vld [vmem:[#allocation7 + $0x784] sm:$0xf]  ;;  %v4345_v10 = vadd.f32 %v4344_v25, %v11294_v36  ;;  %v9455_v58 = vld [vmem:[#allocation7 + $0x570] sm:$0xf0]  ;;  %v9330_v30 = vor.u32 %v10063_v51, %v9327_v3 }
 0x289   :  { %5977 = vmatpush.bf16.msrb.mxu3 %v9778_v38  ;;  %v4358_v38 = vpop.f32.mrf.mxu1  ;;  %v9583_v44 = vld [vmem:[#allocation7 + $0x670] sm:$0xf0]  ;;  %v10087_v3 = vld [vmem:[#allocation7 + $0x524] sm:$0xf] }
 0x28a   :  { %5936 = vmatpush.bf16.msrb.mxu0 %v9378_v46  ;;  %v10095_v46 = vld [vmem:[#allocation7 + $0x564] sm:$0xf]  ;;  %v9711_v0 = vld [vmem:[#allocation7 + $0x770] sm:$0xf0]  ;;  %v9586_v62 = vor.u32 %v10127_v34, %v9583_v44 }
 0x28b   :  { %5950 = vmatpush.bf16.msrb.mxu1 %v9506_v49  ;;  %v9730_v49 = vor.u32 %v10163_v14, %v9727_v32  ;;  %v9458_v36 = vor.u32 %v10095_v46, %v9455_v58  ;;  %v9311_v11 = vld [vmem:[#allocation7 + $0x450] sm:$0xf0]  ;;  %v4386_v28 = vpop.f32.mrf.mxu3  ;;  %v10119_v58 = vld [vmem:[#allocation7 + $0x624] sm:$0xf] }
 0x28c   :  { %5964 = vmatpush.bf16.msrb.mxu2 %v9634_v1  ;;  %v4359_v1 = vadd.f32 %v4358_v38, %v4345_v10  ;;  %v9439_v6 = vld [vmem:[#allocation7 + $0x550] sm:$0xf0]  ;;  %v9314_v32 = vor.u32 %v10059_v5, %v9311_v11  ;;  %v10151_v44 = vld [vmem:[#allocation7 + $0x724] sm:$0xf] }
 0x28d   :  { %5978 = vmatpush.bf16.msrb.mxu3 %v9762_v4  ;;  %v10159_v4 = vld [vmem:[#allocation7 + $0x764] sm:$0xf]  ;;  %v9567_v22 = vld [vmem:[#allocation7 + $0x650] sm:$0xf0] }
 0x28e   :  { %5937 = vmatpush.bf16.msrb.mxu0 %v9362_v17  ;;  %v10091_v17 = vld [vmem:[#allocation7 + $0x544] sm:$0xf]  ;;  %v9695_v25 = vld [vmem:[#allocation7 + $0x750] sm:$0xf0] }
 0x28f   :  { %5951 = vmatpush.bf16.msrb.mxu1 %v9490_v26  ;;  %v9714_v26 = vor.u32 %v10159_v4, %v9711_v0  ;;  %v4346_v45 = vpop.f32.mrf.mxu0  ;;  %v9442_v38 = vor.u32 %v10091_v17, %v9439_v6  ;;  %v9295_v51 = vld [vmem:[#allocation7 + $0x430] sm:$0xf0]  ;;  %v9698_v46 = vor.u32 %v10155_v35, %v9695_v25  ;;  %v10051_v0 = vld [vmem:[#allocation7 + $0x404] sm:$0xf]  ;;  %v9954_v35 = vld [vmem:[#allocation7 + $0xf4] sm:$0xf0] }
 0x290   :  { %5965 = vmatpush.bf16.msrb.mxu2 %v9618_v33  ;;  %v4372_v33 = vpop.f32.mrf.mxu2  ;;  %v4347_v14 = vadd.f32 %v4346_v45, %v11296_v31  ;;  %v9551_v34 = vld [vmem:[#allocation7 + $0x630] sm:$0xf0]  ;;  %v10083_v5 = vld [vmem:[#allocation7 + $0x504] sm:$0xf]  ;;  %v9013_v25 = vld [vmem:[#allocation7 + $0x1e8] sm:$0xf] }
 0x291   :  { %5979 = vmatpush.bf16.msrb.mxu3 %v9746_v39  ;;  %v4373_v39 = vadd.f32 %v4372_v33, %v4359_v1  ;;  %v4360_v10 = vpop.f32.mrf.mxu1  ;;  %v9423_v1 = vld [vmem:[#allocation7 + $0x530] sm:$0xf0]  ;;  %v10115_v17 = vld [vmem:[#allocation7 + $0x604] sm:$0xf] }
 0x292   :  { %5938 = vmatpush.bf16.msrb.mxu0 %v9346_v41  ;;  %v9679_v4 = vld [vmem:[#allocation7 + $0x730] sm:$0xf0] }
 0x293   :  { %5952 = vmatpush.bf16.msrb.mxu1 %v9474_v43  ;;  %v11304_v41 = vadd.f32 %v4386_v28, %v4373_v39  ;;  %v9570_v43 = vor.u32 %v10123_v19, %v9567_v22  ;;  %v9407_v11 = vld [vmem:[#allocation7 + $0x510] sm:$0xf0]  ;;  %v10147_v19 = vld [vmem:[#allocation7 + $0x704] sm:$0xf]  ;;  %v4388_v45 = vpop.f32.mrf.mxu3  ;;  %v8885_v28 = vld [vmem:[#allocation7 + $0xe8] sm:$0xf] }
 0x294   :  { %5966 = vmatpush.bf16.msrb.mxu2 %v9602_v8  ;;  %v10055_v8 = vld [vmem:[#allocation7 + $0x424] sm:$0xf]  ;;  %v9535_v6 = vld [vmem:[#allocation7 + $0x610] sm:$0xf0] }
 0x295   :  { %5980 = vmatpush.bf16.msrb.mxu3 %v9730_v49  ;;  %v4361_v49 = vadd.f32 %v4360_v10, %v4347_v14  ;;  %v9298_v31 = vor.u32 %v10055_v8, %v9295_v51  ;;  %v9663_v22 = vld [vmem:[#allocation7 + $0x710] sm:$0xf0]  ;;  %v9141_v10 = vld [vmem:[#allocation7 + $0x2e8] sm:$0xf]  ;;  %v9410_v8 = vor.u32 %v10083_v5, %v9407_v11  ;;  %v9538_v51 = vor.u32 %v10115_v17, %v9535_v6  ;;  %v10046_v5 = vld [vmem:[#allocation7 + $0x3d4] sm:$0xf0] }
 0x296   :  { %5939 = vmatpush.bf16.msrb.mxu0 %v9330_v30  ;;  %v9279_v30 = vld [vmem:[#allocation7 + $0x410] sm:$0xf0]  ;;  %v8853_v6 = vld [vmem:[#allocation7 + $0xa8] sm:$0xf] }
 0x297   :  { %5953 = vmatpush.bf16.msrb.mxu1 %v9458_v36  ;;  %v9426_v36 = vor.u32 %v10087_v3, %v9423_v1  ;;  %v9282_v14 = vor.u32 %v10051_v0, %v9279_v30  ;;  %v9269_v3 = vld [vmem:[#allocation7 + $0x3e8] sm:$0xf]  ;;  %v9666_v1 = vor.u32 %v10147_v19, %v9663_v22  ;;  %v9982_v30 = vld [vmem:[#allocation7 + $0x1d4] sm:$0xf0] }
 0x298   :  { %5967 = vmatpush.bf16.msrb.mxu2 %v9586_v62  ;;  %v9554_v62 = vor.u32 %v10119_v58, %v9551_v34  ;;  %v4374_v33 = vpop.f32.mrf.mxu2  ;;  %v9946_v19 = vld [vmem:[#allocation7 + $0xb4] sm:$0xf0]  ;;  %v8981_v22 = vld [vmem:[#allocation7 + $0x1a8] sm:$0xf] }
 0x299   :  { %5981 = vmatpush.bf16.msrb.mxu3 %v9714_v26  ;;  %v9682_v26 = vor.u32 %v10151_v44, %v9679_v4  ;;  %v4375_v39 = vadd.f32 %v4374_v33, %v4361_v49  ;;  %v8886_v49 = vor.u32 %v9954_v35, %v8885_v28  ;;  %v8869_v44 = vld [vmem:[#allocation7 + $0xc8] sm:$0xf]  ;;  %v9950_v4 = vld [vmem:[#allocation7 + $0xd4] sm:$0xf0] }
 0x29a   :  { %5940 = vmatpush.bf16.msrb.mxu0 %v9314_v32  ;;  %v9986_v32 = vld [vmem:[#allocation7 + $0x1f4] sm:$0xf0]  ;;  %v9125_v33 = vld [vmem:[#allocation7 + $0x2c8] sm:$0xf]  ;;  %v8870_v11 = vor.u32 %v9950_v4, %v8869_v44 }
 0x29b   :  { %5954 = vmatpush.bf16.msrb.mxu1 %v9442_v38  ;;  %v10018_v38 = vld [vmem:[#allocation7 + $0x2f4] sm:$0xf0]  ;;  %v9014_v58 = vor.u32 %v9986_v32, %v9013_v25  ;;  %v9109_v28 = vld [vmem:[#allocation7 + $0x2a8] sm:$0xf]  ;;  %v8854_v32 = vor.u32 %v9946_v19, %v8853_v6 }
 0x29c   :  { %5968 = vmatpush.bf16.msrb.mxu2 %v9570_v43  ;;  %v11306_v43 = vadd.f32 %v4388_v45, %v4375_v39  ;;  %v9142_v34 = vor.u32 %v10018_v38, %v9141_v10  ;;  %v9978_v45 = vld [vmem:[#allocation7 + $0x1b4] sm:$0xf0]  ;;  %v9237_v25 = vld [vmem:[#allocation7 + $0x3a8] sm:$0xf] }
 0x29d   :  { %5982 = vmatpush.bf16.msrb.mxu3 %v9698_v46  ;;  %v10050_v46 = vld [vmem:[#allocation7 + $0x3f4] sm:$0xf0]  ;;  %v8982_v10 = vor.u32 %v9978_v45, %v8981_v22  ;;  %v9221_v44 = vld [vmem:[#allocation7 + $0x388] sm:$0xf] }
 0x29e   :  { %5941 = vmatpush.bf16.msrb.mxu0 %v9298_v31  ;;  %v8997_v31 = vld [vmem:[#allocation7 + $0x1c8] sm:$0xf]  ;;  %v9270_v0 = vor.u32 %v10050_v46, %v9269_v3  ;;  %v10010_v35 = vld [vmem:[#allocation7 + $0x2b4] sm:$0xf0] }
 0x29f   :  { %5955 = vmatpush.bf16.msrb.mxu1 %v9426_v36  ;;  %v10014_v36 = vld [vmem:[#allocation7 + $0x2d4] sm:$0xf0]  ;;  %v8998_v17 = vor.u32 %v9982_v30, %v8997_v31  ;;  %v9110_v38 = vor.u32 %v10010_v35, %v9109_v28  ;;  %v8965_v3 = vld [vmem:[#allocation7 + $0x188] sm:$0xf] }
 0x2a0   :  { %5969 = vmatpush.bf16.msrb.mxu2 %v9554_v62  ;;  %v9253_v62 = vld [vmem:[#allocation7 + $0x3c8] sm:$0xf]  ;;  %v10038_v4 = vld [vmem:[#allocation7 + $0x394] sm:$0xf0] }
 0x2a1   :  { %5983 = vmatpush.bf16.msrb.mxu3 %v9682_v26  ;;  %v9126_v26 = vor.u32 %v10014_v36, %v9125_v33  ;;  %v9254_v39 = vor.u32 %v10046_v5, %v9253_v62  ;;  %v8821_v62 = vld [vmem:[#allocation7 + $0x68] sm:$0xf]  ;;  %v9938_v5 = vld [vmem:[#allocation7 + $0x74] sm:$0xf0] }
 0x2a2   :  { %5942 = vmatpush.bf16.msrb.mxu0 %v9282_v14  ;;  %v10042_v14 = vld [vmem:[#allocation7 + $0x3b4] sm:$0xf0]  ;;  %v9077_v19 = vld [vmem:[#allocation7 + $0x268] sm:$0xf]  ;;  %v8822_v28 = vor.u32 %v9938_v5, %v8821_v62 }
 0x2a3   :  { %5956 = vmatpush.bf16.msrb.mxu1 %v9410_v8  ;;  %v8837_v8 = vld [vmem:[#allocation7 + $0x88] sm:$0xf]  ;;  %v9238_v46 = vor.u32 %v10042_v14, %v9237_v25  ;;  %v4414_v30 = vpop.f32.mrf.mxu1  ;;  %v9970_v6 = vld [vmem:[#allocation7 + $0x174] sm:$0xf0] }
 0x2a4   :  { %5970 = vmatpush.bf16.msrb.mxu2 %v9538_v51  ;;  %v9942_v51 = vld [vmem:[#allocation7 + $0x94] sm:$0xf0]  ;;  %v8805_v25 = vld [vmem:[#allocation7 + $0x48] sm:$0xf] }
 0x2a5   :  { %5984 = vmatpush.bf16.msrb.mxu3 %v9666_v1  ;;  %5943 = vmatmul.bf16.vlgmr.msrb.gmra.mxu0 %v11281_v63  ;;  %v9974_v1 = vld [vmem:[#allocation7 + $0x194] sm:$0xf0]  ;;  %v8917_v5 = vld [vmem:[#allocation7 + $0x128] sm:$0xf] }
 0x2a6   :  { %5991 = vmatpush.bf16.msra.mxu0 %v8886_v49  ;;  %5957 = vmatmul.bf16.vlgmr.msrb.gmra.mxu1 %v11285_v47  ;;  %v9093_v49 = vld [vmem:[#allocation7 + $0x288] sm:$0xf]  ;;  %v8966_v33 = vor.u32 %v9974_v1, %v8965_v3  ;;  %v10002_v22 = vld [vmem:[#allocation7 + $0x274] sm:$0xf0] }
 0x2a7   :  { %6005 = vmatpush.bf16.msra.mxu1 %v9014_v58  ;;  %5971 = vmatmul.bf16.vlgmr.msrb.gmra.mxu2 %v11283_v12  ;;  %v10006_v58 = vld [vmem:[#allocation7 + $0x294] sm:$0xf0]  ;;  %v9078_v35 = vor.u32 %v10002_v22, %v9077_v19  ;;  %v9173_v22 = vld [vmem:[#allocation7 + $0x328] sm:$0xf] }
 0x2a8   :  { %6019 = vmatpush.bf16.msra.mxu2 %v9142_v34  ;;  %5985 = vmatmul.bf16.vlgmr.msrb.gmra.mxu3 %v11287_v52  ;;  %v4400_v34 = vpop.f32.mrf.mxu0  ;;  %v9094_v36 = vor.u32 %v10006_v58, %v9093_v49  ;;  %v10034_v45 = vld [vmem:[#allocation7 + $0x374] sm:$0xf0]  ;;  %v9189_v58 = vld [vmem:[#allocation7 + $0x348] sm:$0xf] }
 0x2a9   :  { %6033 = vmatpush.bf16.msra.mxu3 %v9270_v0  ;;  %v4401_v31 = vadd.f32 %v4400_v34, %v11304_v41  ;;  %v8838_v0 = vor.u32 %v9942_v51, %v8837_v8  ;;  %v9934_v14 = vld [vmem:[#allocation7 + $0x54] sm:$0xf0]  ;;  %v9061_v51 = vld [vmem:[#allocation7 + $0x248] sm:$0xf] }
 0x2aa   :  { %5992 = vmatpush.bf16.msra.mxu0 %v8870_v11  ;;  %v8949_v11 = vld [vmem:[#allocation7 + $0x168] sm:$0xf]  ;;  %v9966_v8 = vld [vmem:[#allocation7 + $0x154] sm:$0xf0] }
 0x2ab   :  { %6006 = vmatpush.bf16.msra.mxu1 %v8998_v17  ;;  %v9222_v17 = vor.u32 %v10038_v4, %v9221_v44  ;;  %v8950_v41 = vor.u32 %v9970_v6, %v8949_v11  ;;  %v9998_v3 = vld [vmem:[#allocation7 + $0x254] sm:$0xf0]  ;;  %v4442_v49 = vpop.f32.mrf.mxu3  ;;  %v8806_v4 = vor.u32 %v9934_v14, %v8805_v25  ;;  %v9045_v6 = vld [vmem:[#allocation7 + $0x228] sm:$0xf] }
 0x2ac   :  { %6020 = vmatpush.bf16.msra.mxu2 %v9126_v26  ;;  %v4415_v26 = vadd.f32 %v4414_v30, %v4401_v31  ;;  %v10030_v34 = vld [vmem:[#allocation7 + $0x354] sm:$0xf0]  ;;  %v4416_v31 = vpop.f32.mrf.mxu1  ;;  %v8901_v14 = vld [vmem:[#allocation7 + $0x108] sm:$0xf] }
 0x2ad   :  { %6034 = vmatpush.bf16.msra.mxu3 %v9254_v39  ;;  %v9205_v39 = vld [vmem:[#allocation7 + $0x368] sm:$0xf]  ;;  %v9930_v62 = vld [vmem:[#allocation7 + $0x34] sm:$0xf0]  ;;  %v9190_v11 = vor.u32 %v10030_v34, %v9189_v58 }
 0x2ae   :  { %5993 = vmatpush.bf16.msra.mxu0 %v8854_v32  ;;  %v8933_v32 = vld [vmem:[#allocation7 + $0x148] sm:$0xf]  ;;  %v9994_v19 = vld [vmem:[#allocation7 + $0x234] sm:$0xf0] }
 0x2af   :  { %6007 = vmatpush.bf16.msra.mxu1 %v8982_v10  ;;  %v9206_v10 = vor.u32 %v10034_v45, %v9205_v39  ;;  %v8934_v30 = vor.u32 %v9966_v8, %v8933_v32  ;;  %v10026_v39 = vld [vmem:[#allocation7 + $0x334] sm:$0xf0]  ;;  %v9046_v25 = vor.u32 %v9994_v19, %v9045_v6  ;;  %v9525_v34 = vld [vmem:[#allocation7 + $0x5e8] sm:$0xf] }
 0x2b0   :  { %6021 = vmatpush.bf16.msra.mxu2 %v9110_v38  ;;  %v4428_v38 = vpop.f32.mrf.mxu2  ;;  %v4402_v1 = vpop.f32.mrf.mxu0  ;;  %v9958_v32 = vld [vmem:[#allocation7 + $0x114] sm:$0xf0] }
 0x2b1   :  { %6035 = vmatpush.bf16.msra.mxu3 %v9238_v46  ;;  %v4429_v46 = vadd.f32 %v4428_v38, %v4415_v26  ;;  %v4403_v44 = vadd.f32 %v4402_v1, %v11306_v43  ;;  %v9962_v26 = vld [vmem:[#allocation7 + $0x134] sm:$0xf0]  ;;  %v3577_v43 = vadd.f32 %v11098_v56, %v11096_v42  ;;  %v9174_v38 = vor.u32 %v10026_v39, %v9173_v22  ;;  %v9509_v39 = vld [vmem:[#allocation7 + $0x5c8] sm:$0xf] }
 0x2b2   :  { %5994 = vmatpush.bf16.msra.mxu0 %v8838_v0  ;;  %v10082_v58 = vld [vmem:[#allocation7 + $0x4f4] sm:$0xf0] }
 0x2b3   :  { %6008 = vmatpush.bf16.msra.mxu1 %v8966_v33  ;;  %v11314_v0 = vadd.f32 %v4442_v49, %v4429_v46  ;;  %v9062_v33 = vor.u32 %v9998_v3, %v9061_v51  ;;  %v9990_v51 = vld [vmem:[#allocation7 + $0x214] sm:$0xf0]  ;;  %v9157_v3 = vld [vmem:[#allocation7 + $0x308] sm:$0xf]  ;;  %v3591_v42 = vadd.f32 %v11104_v9, %v3577_v43  ;;  %v4444_v1 = vpop.f32.mrf.mxu3 }
 0x2b4   :  { %6022 = vmatpush.bf16.msra.mxu2 %v9094_v36  ;;  %v8789_v36 = vld [vmem:[#allocation7 + $0x28] sm:$0xf]  ;;  %v10022_v46 = vld [vmem:[#allocation7 + $0x314] sm:$0xf0] }
 0x2b5   :  { %6036 = vmatpush.bf16.msra.mxu3 %v9222_v17  ;;  %v4417_v17 = vadd.f32 %v4416_v31, %v4403_v44  ;;  %v8790_v45 = vor.u32 %v9930_v62, %v8789_v36  ;;  %v9397_v49 = vld [vmem:[#allocation7 + $0x4e8] sm:$0xf]  ;;  %v8902_v36 = vor.u32 %v9958_v32, %v8901_v14  ;;  %v9158_v9 = vor.u32 %v10022_v46, %v9157_v3  ;;  %v10078_v22 = vld [vmem:[#allocation7 + $0x4d4] sm:$0xf0] }
 0x2b6   :  { %5995 = vmatpush.bf16.msra.mxu0 %v8822_v28  ;;  %v8773_v28 = vld [vmem:[#allocation7 + $0x8] sm:$0xf]  ;;  %v10174_v32 = vld [vmem:[#allocation7 + $0x7d4] sm:$0xf0] }
 0x2b7   :  { %6009 = vmatpush.bf16.msra.mxu1 %v8950_v41  ;;  %v9926_v41 = vld [vmem:[#allocation7 + $0x14] sm:$0xf0]  ;;  %v9653_v31 = vld [vmem:[#allocation7 + $0x6e8] sm:$0xf] }
 0x2b8   :  { %6023 = vmatpush.bf16.msra.mxu2 %v9078_v35  ;;  %v8918_v35 = vor.u32 %v9962_v26, %v8917_v5  ;;  %v4430_v8 = vpop.f32.mrf.mxu2  ;;  %v8774_v44 = vor.u32 %v9926_v41, %v8773_v28  ;;  %v9781_v5 = vld [vmem:[#allocation7 + $0x7e8] sm:$0xf]  ;;  %v3605_v26 = vadd.f32 %v11106_v18, %v3591_v42  ;;  %v10110_v28 = vld [vmem:[#allocation7 + $0x5d4] sm:$0xf0] }
 0x2b9   :  { %6037 = vmatpush.bf16.msra.mxu3 %v9206_v10  ;;  %v9029_v10 = vld [vmem:[#allocation7 + $0x208] sm:$0xf]  ;;  %v4431_v56 = vadd.f32 %v4430_v8, %v4417_v17  ;;  %v9398_v17 = vor.u32 %v10082_v58, %v9397_v49  ;;  %v9510_v18 = vor.u32 %v10110_v28, %v9509_v39  ;;  %v10106_v42 = vld [vmem:[#allocation7 + $0x5b4] sm:$0xf0] }
 0x2ba   :  { %5996 = vmatpush.bf16.msra.mxu0 %v8806_v4  ;;  %v10114_v4 = vld [vmem:[#allocation7 + $0x5f4] sm:$0xf0]  ;;  %v9030_v62 = vor.u32 %v9990_v51, %v9029_v10  ;;  %v9381_v43 = vld [vmem:[#allocation7 + $0x4c8] sm:$0xf] }
 0x2bb   :  { %6010 = vmatpush.bf16.msra.mxu1 %v8934_v30  ;;  %v10146_v30 = vld [vmem:[#allocation7 + $0x6f4] sm:$0xf0]  ;;  %v9526_v6 = vor.u32 %v10114_v4, %v9525_v34  ;;  %v9637_v41 = vld [vmem:[#allocation7 + $0x6c8] sm:$0xf]  ;;  %v9382_v10 = vor.u32 %v10078_v22, %v9381_v43 }
 0x2bc   :  { %6024 = vmatpush.bf16.msra.mxu2 %v9062_v33  ;;  %v11319_v33 = vadd.f32 %v4444_v1, %v4431_v56  ;;  %v9654_v19 = vor.u32 %v10146_v30, %v9653_v31  ;;  %v9765_v14 = vld [vmem:[#allocation7 + $0x7c8] sm:$0xf]  ;;  %v10074_v51 = vld [vmem:[#allocation7 + $0x4b4] sm:$0xf0] }
 0x2bd   :  { %6038 = vmatpush.bf16.msra.mxu3 %v9190_v11  ;;  %v10178_v11 = vld [vmem:[#allocation7 + $0x7f4] sm:$0xf0]  ;;  %v9365_v8 = vld [vmem:[#allocation7 + $0x4a8] sm:$0xf]  ;;  %v9766_v46 = vor.u32 %v10174_v32, %v9765_v14 }
 0x2be   :  { %5997 = vmatpush.bf16.msra.mxu0 %v8790_v45  ;;  %v9782_v45 = vor.u32 %v10178_v11, %v9781_v5  ;;  %v9493_v3 = vld [vmem:[#allocation7 + $0x5a8] sm:$0xf]  ;;  %v10138_v56 = vld [vmem:[#allocation7 + $0x6b4] sm:$0xf0]  ;;  %v9366_v34 = vor.u32 %v10074_v51, %v9365_v8 }
 0x2bf   :  { %6011 = vmatpush.bf16.msra.mxu1 %v8918_v35  ;;  %v10142_v35 = vld [vmem:[#allocation7 + $0x6d4] sm:$0xf0]  ;;  %v9749_v49 = vld [vmem:[#allocation7 + $0x7a8] sm:$0xf]  ;;  %v9494_v4 = vor.u32 %v10106_v42, %v9493_v3 }
 0x2c0   :  { %6025 = vmatpush.bf16.msra.mxu2 %v9046_v25  ;;  %v3619_v25 = vadd.f32 %v11111_v13, %v3605_v26  ;;  %v9621_v13 = vld [vmem:[#allocation7 + $0x6a8] sm:$0xf]  ;;  %v10170_v58 = vld [vmem:[#allocation7 + $0x7b4] sm:$0xf0] }
 0x2c1   :  { %6039 = vmatpush.bf16.msra.mxu3 %v9174_v38  ;;  %v9638_v38 = vor.u32 %v10142_v35, %v9637_v41  ;;  %v9622_v31 = vor.u32 %v10138_v56, %v9621_v13  ;;  %v9349_v30 = vld [vmem:[#allocation7 + $0x488] sm:$0xf]  ;;  %v10102_v5 = vld [vmem:[#allocation7 + $0x594] sm:$0xf0] }
 0x2c2   :  { %5998 = vmatpush.bf16.msra.mxu0 %v8774_v44  ;;  %v3633_v1 = vadd.f32 %v11113_v16, %v3619_v25  ;;  %v9750_v16 = vor.u32 %v10170_v58, %v9749_v49  ;;  %v9605_v11 = vld [vmem:[#allocation7 + $0x688] sm:$0xf]  ;;  %v10166_v26 = vld [vmem:[#allocation7 + $0x794] sm:$0xf0] }
 0x2c3   :  { %6012 = vmatpush.bf16.msra.mxu1 %v8902_v36  ;;  %v10070_v36 = vld [vmem:[#allocation7 + $0x494] sm:$0xf0]  ;;  %v9333_v22 = vld [vmem:[#allocation7 + $0x468] sm:$0xf] }
 0x2c4   :  { %6026 = vmatpush.bf16.msra.mxu2 %v9030_v62  ;;  %v3647_v44 = vadd.f32 %v11119_v50, %v3633_v1  ;;  %v9477_v62 = vld [vmem:[#allocation7 + $0x588] sm:$0xf]  ;;  %v10066_v39 = vld [vmem:[#allocation7 + $0x474] sm:$0xf0] }
 0x2c5   :  { %6040 = vmatpush.bf16.msra.mxu3 %v9158_v9  ;;  %5999 = vmatmul.bf16.vlgmr.msra.gmra.mxu0 %v11259_v2  ;;  %v10134_v9 = vld [vmem:[#allocation7 + $0x694] sm:$0xf0]  ;;  %v9478_v50 = vor.u32 %v10102_v5, %v9477_v62  ;;  %v9589_v35 = vld [vmem:[#allocation7 + $0x668] sm:$0xf] }
 0x2c6   :  { %6047 = vmatpush.bf16.msrb.mxu0 %v9398_v17  ;;  %6013 = vmatmul.bf16.vlgmr.msra.gmra.mxu1 %v11263_v15  ;;  %v9733_v17 = vld [vmem:[#allocation7 + $0x788] sm:$0xf]  ;;  %v9606_v43 = vor.u32 %v10134_v9, %v9605_v11  ;;  %v10098_v41 = vld [vmem:[#allocation7 + $0x574] sm:$0xf0]  ;;  %v5776_v9 = vpop.f32.mrf.mxu0 }
 0x2c7   :  { %6061 = vmatpush.bf16.msrb.mxu1 %v9526_v6  ;;  %6027 = vmatmul.bf16.vlgmr.msra.gmra.mxu2 %v11261_v40  ;;  %v9350_v6 = vor.u32 %v10070_v36, %v9349_v30  ;;  %v9734_v28 = vor.u32 %v10166_v26, %v9733_v17  ;;  %v10130_v25 = vld [vmem:[#allocation7 + $0x674] sm:$0xf0]  ;;  %v9717_v32 = vld [vmem:[#allocation7 + $0x768] sm:$0xf]  ;;  %v5790_v26 = vpop.f32.mrf.mxu1 }
 0x2c8   :  { %6075 = vmatpush.bf16.msrb.mxu2 %v9654_v19  ;;  %6041 = vmatmul.bf16.vlgmr.msra.gmra.mxu3 %v11269_v48  ;;  %v3661_v19 = vadd.f32 %v11121_v54, %v3647_v44  ;;  %v9317_v8 = vld [vmem:[#allocation7 + $0x448] sm:$0xf]  ;;  %v10062_v51 = vld [vmem:[#allocation7 + $0x454] sm:$0xf0] }
 0x2c9   :  { %6089 = vmatpush.bf16.msrb.mxu3 %v9782_v45  ;;  %v9461_v45 = vld [vmem:[#allocation7 + $0x568] sm:$0xf]  ;;  %v10094_v42 = vld [vmem:[#allocation7 + $0x554] sm:$0xf0]  ;;  %v9318_v58 = vor.u32 %v10062_v51, %v9317_v8  ;;  %v10016_v8 = vld [vmem:[#allocation7 + $0x2ec] sm:$0xf] }
 0x2ca   :  { %6048 = vmatpush.bf16.msrb.mxu0 %v9382_v10  ;;  %v3675_v14 = vadd.f32 %v11126_v57, %v3661_v19  ;;  %v10162_v10 = vld [vmem:[#allocation7 + $0x774] sm:$0xf0]  ;;  %v9462_v54 = vor.u32 %v10098_v41, %v9461_v45  ;;  %v9445_v3 = vld [vmem:[#allocation7 + $0x548] sm:$0xf]  ;;  %v9143_v51 = vld [vmem:[#allocation7 + $0x2f8] sm:$0xf0] }
 0x2cb   :  { %6062 = vmatpush.bf16.msrb.mxu1 %v9510_v18  ;;  %v9334_v18 = vor.u32 %v10066_v39, %v9333_v22  ;;  %v9573_v13 = vld [vmem:[#allocation7 + $0x648] sm:$0xf]  ;;  %v10126_v56 = vld [vmem:[#allocation7 + $0x654] sm:$0xf0]  ;;  %v9446_v44 = vor.u32 %v10094_v42, %v9445_v3  ;;  %v10048_v42 = vld [vmem:[#allocation7 + $0x3ec] sm:$0xf] }
 0x2cc   :  { %6076 = vmatpush.bf16.msrb.mxu2 %v9638_v38  ;;  %v9590_v38 = vor.u32 %v10130_v25, %v9589_v35  ;;  %v3689_v1 = vadd.f32 %v11128_v61, %v3675_v14  ;;  %v9701_v49 = vld [vmem:[#allocation7 + $0x748] sm:$0xf]  ;;  %v10158_v57 = vld [vmem:[#allocation7 + $0x754] sm:$0xf0] }
 0x2cd   :  { %6090 = vmatpush.bf16.msrb.mxu3 %v9766_v46  ;;  %v9718_v46 = vor.u32 %v10162_v10, %v9717_v32  ;;  %v10058_v30 = vld [vmem:[#allocation7 + $0x434] sm:$0xf0]  ;;  %v9429_v36 = vld [vmem:[#allocation7 + $0x528] sm:$0xf]  ;;  %v9702_v62 = vor.u32 %v10158_v57, %v9701_v49  ;;  %v9952_v10 = vld [vmem:[#allocation7 + $0xec] sm:$0xf]  ;;  %v5777_v57 = vadd.f32 %v5776_v9, %v11139_v27 }
 0x2ce   :  { %6049 = vmatpush.bf16.msrb.mxu0 %v9366_v34  ;;  %v3703_v34 = vadd.f32 %v11134_v24, %v3689_v1  ;;  %v9557_v5 = vld [vmem:[#allocation7 + $0x628] sm:$0xf]  ;;  %v10122_v11 = vld [vmem:[#allocation7 + $0x634] sm:$0xf0] }
 0x2cf   :  { %6063 = vmatpush.bf16.msrb.mxu1 %v9494_v4  ;;  %v9574_v4 = vor.u32 %v10126_v56, %v9573_v13  ;;  %v9685_v61 = vld [vmem:[#allocation7 + $0x728] sm:$0xf]  ;;  %v10154_v17 = vld [vmem:[#allocation7 + $0x734] sm:$0xf0]  ;;  %v9558_v22 = vor.u32 %v10122_v11, %v9557_v5  ;;  %v9271_v13 = vld [vmem:[#allocation7 + $0x3f8] sm:$0xf0]  ;;  %v5804_v56 = vpop.f32.mrf.mxu2  ;;  %v5791_v9 = vadd.f32 %v5790_v26, %v5777_v57 }
 0x2d0   :  { %6077 = vmatpush.bf16.msrb.mxu2 %v9622_v31  ;;  %v9301_v31 = vld [vmem:[#allocation7 + $0x428] sm:$0xf]  ;;  %v10054_v24 = vld [vmem:[#allocation7 + $0x414] sm:$0xf0]  ;;  %v9686_v41 = vor.u32 %v10154_v17, %v9685_v61  ;;  %v9127_v5 = vld [vmem:[#allocation7 + $0x2d8] sm:$0xf0]  ;;  %v5778_v17 = vpop.f32.mrf.mxu0 }
 0x2d1   :  { %6091 = vmatpush.bf16.msrb.mxu3 %v9750_v16  ;;  %v10090_v16 = vld [vmem:[#allocation7 + $0x534] sm:$0xf0]  ;;  %v9285_v19 = vld [vmem:[#allocation7 + $0x408] sm:$0xf]  ;;  %v10040_v26 = vld [vmem:[#allocation7 + $0x3ac] sm:$0xf] }
 0x2d2   :  { %6050 = vmatpush.bf16.msrb.mxu0 %v9350_v6  ;;  %v9302_v6 = vor.u32 %v10058_v30, %v9301_v31  ;;  %v9413_v39 = vld [vmem:[#allocation7 + $0x508] sm:$0xf]  ;;  %v10086_v45 = vld [vmem:[#allocation7 + $0x514] sm:$0xf0]  ;;  %v8871_v31 = vld [vmem:[#allocation7 + $0xd8] sm:$0xf0] }
 0x2d3   :  { %6064 = vmatpush.bf16.msrb.mxu1 %v9478_v50  ;;  %v3717_v50 = vadd.f32 %v11136_v29, %v3703_v34  ;;  %v10118_v35 = vld [vmem:[#allocation7 + $0x614] sm:$0xf0]  ;;  %v9669_v25 = vld [vmem:[#allocation7 + $0x708] sm:$0xf]  ;;  %v9015_v29 = vld [vmem:[#allocation7 + $0x1f8] sm:$0xf0]  ;;  %v9414_v3 = vor.u32 %v10086_v45, %v9413_v39 }
 0x2d4   :  { %6078 = vmatpush.bf16.msrb.mxu2 %v9606_v43  ;;  %v9430_v43 = vor.u32 %v10090_v16, %v9429_v36  ;;  %v10150_v14 = vld [vmem:[#allocation7 + $0x714] sm:$0xf0]  ;;  %v9980_v30 = vld [vmem:[#allocation7 + $0x1cc] sm:$0xf]  ;;  %v9274_v36 = vor.u32 %v10048_v42, %v9271_v13 }
 0x2d5   :  { %6092 = vmatpush.bf16.msrb.mxu3 %v9734_v28  ;;  %v9541_v28 = vld [vmem:[#allocation7 + $0x608] sm:$0xf]  ;;  %v3731_v32 = vadd.f32 %v11141_v59, %v3717_v50  ;;  %v9670_v1 = vor.u32 %v10150_v14, %v9669_v25  ;;  %v10012_v16 = vld [vmem:[#allocation7 + $0x2cc] sm:$0xf]  ;;  %v11451_v11 = vld [vmem:[#allocation22_spill] sm:$0xff] }
 0x2d6   :  { %6051 = vmatpush.bf16.msrb.mxu0 %v9334_v18  ;;  %v8887_v18 = vld [vmem:[#allocation7 + $0xf8] sm:$0xf0]  ;;  %v9130_v50 = vor.u32 %v10012_v16, %v9127_v5  ;;  %v9976_v39 = vld [vmem:[#allocation7 + $0x1ac] sm:$0xf] }
 0x2d7   :  { %6065 = vmatpush.bf16.msrb.mxu1 %v9462_v54  ;;  %v9984_v54 = vld [vmem:[#allocation7 + $0x1ec] sm:$0xf]  ;;  %v8890_v49 = vor.u32 %v9952_v10, %v8887_v18  ;;  %v3745_v59 = vadd.f32 %v11143_v60, %v3731_v32  ;;  %v9255_v60 = vld [vmem:[#allocation7 + $0x3d8] sm:$0xf0]  ;;  %v5805_v32 = vadd.f32 %v5804_v56, %v5791_v9  ;;  %v5806_v42 = vpop.f32.mrf.mxu2 }
 0x2d8   :  { %6079 = vmatpush.bf16.msrb.mxu2 %v9590_v38  ;;  %v9286_v38 = vor.u32 %v10054_v24, %v9285_v19  ;;  %v9018_v34 = vor.u32 %v9984_v54, %v9015_v29  ;;  %v5792_v19 = vpop.f32.mrf.mxu1  ;;  %v11452_v25 = vld [vmem:[#allocation23_spill] sm:$0xff]  ;;  %v9940_v54 = vld [vmem:[#allocation7 + $0x8c] sm:$0xf] }
 0x2d9   :  { %6093 = vmatpush.bf16.msrb.mxu3 %v9718_v46  ;;  %v9542_v46 = vor.u32 %v10118_v35, %v9541_v28  ;;  %v3759_v61 = vadd.f32 %v11451_v11, %v3745_v59  ;;  %v8983_v28 = vld [vmem:[#allocation7 + $0x1b8] sm:$0xf0]  ;;  %v10004_v56 = vld [vmem:[#allocation7 + $0x28c] sm:$0xf] }
 0x2da   :  { %6052 = vmatpush.bf16.msrb.mxu0 %v9318_v58  ;;  %v5818_v58 = vpop.f32.mrf.mxu3  ;;  %v9111_v35 = vld [vmem:[#allocation7 + $0x2b8] sm:$0xf0]  ;;  %v8986_v29 = vor.u32 %v9976_v39, %v8983_v28  ;;  %v9936_v5 = vld [vmem:[#allocation7 + $0x6c] sm:$0xf] }
 0x2db   :  { %6066 = vmatpush.bf16.msrb.mxu1 %v9446_v44  ;;  %v9146_v44 = vor.u32 %v10016_v8, %v9143_v51  ;;  %v3773_v14 = vadd.f32 %v11452_v25, %v3759_v61  ;;  %v9239_v10 = vld [vmem:[#allocation7 + $0x3b8] sm:$0xf0]  ;;  %v9968_v61 = vld [vmem:[#allocation7 + $0x16c] sm:$0xf] }
 0x2dc   :  { %6080 = vmatpush.bf16.msrb.mxu2 %v9574_v4  ;;  %v9948_v4 = vld [vmem:[#allocation7 + $0xcc] sm:$0xf]  ;;  %v8839_v51 = vld [vmem:[#allocation7 + $0x98] sm:$0xf0]  ;;  %v9242_v13 = vor.u32 %v10040_v26, %v9239_v10 }
 0x2dd   :  { %6094 = vmatpush.bf16.msrb.mxu3 %v9702_v62  ;;  %v8999_v62 = vld [vmem:[#allocation7 + $0x1d8] sm:$0xf0]  ;;  %v8874_v27 = vor.u32 %v9948_v4, %v8871_v31  ;;  %v8842_v4 = vor.u32 %v9940_v54, %v8839_v51  ;;  %v10032_v9 = vld [vmem:[#allocation7 + $0x36c] sm:$0xf] }
 0x2de   :  { %6053 = vmatpush.bf16.msrb.mxu0 %v9302_v6  ;;  %v10044_v6 = vld [vmem:[#allocation7 + $0x3cc] sm:$0xf]  ;;  %v9002_v24 = vor.u32 %v9980_v30, %v8999_v62  ;;  %v8823_v11 = vld [vmem:[#allocation7 + $0x78] sm:$0xf0] }
 0x2df   :  { %6067 = vmatpush.bf16.msrb.mxu1 %v9430_v43  ;;  %v9944_v43 = vld [vmem:[#allocation7 + $0xac] sm:$0xf]  ;;  %v9258_v45 = vor.u32 %v10044_v6, %v9255_v60  ;;  %v8951_v6 = vld [vmem:[#allocation7 + $0x178] sm:$0xf0] }
 0x2e0   :  { %6081 = vmatpush.bf16.msrb.mxu2 %v9558_v22  ;;  %v8855_v22 = vld [vmem:[#allocation7 + $0xb8] sm:$0xf0]  ;;  %v8954_v39 = vor.u32 %v9968_v61, %v8951_v6 }
 0x2e1   :  { %6095 = vmatpush.bf16.msrb.mxu3 %v9686_v41  ;;  %v10008_v41 = vld [vmem:[#allocation7 + $0x2ac] sm:$0xf]  ;;  %v8858_v18 = vor.u32 %v9944_v43, %v8855_v22  ;;  %v9079_v60 = vld [vmem:[#allocation7 + $0x278] sm:$0xf0]  ;;  %v11343_v43 = vld [vmem:[#allocation11] sm:$0xf] }
 0x2e2   :  { %6054 = vmatpush.bf16.msrb.mxu0 %v9286_v38  ;;  %v5779_v38 = vadd.f32 %v5778_v17, %v3773_v14  ;;  %v9114_v8 = vor.u32 %v10008_v41, %v9111_v35  ;;  %v5820_v59 = vpop.f32.mrf.mxu3  ;;  %v5832_v57 = vpop.f32.mrf.mxu0  ;;  %v8807_v28 = vld [vmem:[#allocation7 + $0x58] sm:$0xf0]  ;;  %v9964_v41 = vld [vmem:[#allocation7 + $0x14c] sm:$0xf] }
 0x2e3   :  { %6068 = vmatpush.bf16.msrb.mxu1 %v9414_v3  ;;  %v9972_v3 = vld [vmem:[#allocation7 + $0x18c] sm:$0xf]  ;;  %v5846_v30 = vpop.f32.mrf.mxu1  ;;  %v8935_v35 = vld [vmem:[#allocation7 + $0x158] sm:$0xf0] }
 0x2e4   :  { %6082 = vmatpush.bf16.msrb.mxu2 %v9542_v46  ;;  %v8967_v46 = vld [vmem:[#allocation7 + $0x198] sm:$0xf0] }
 0x2e5   :  { %6096 = vmatpush.bf16.msrb.mxu3 %v9670_v1  ;;  %6055 = vmatmul.bf16.vlgmr.msrb.gmra.mxu0 %v11281_v63  ;;  %v9095_v1 = vld [vmem:[#allocation7 + $0x298] sm:$0xf0]  ;;  %v8970_v31 = vor.u32 %v9972_v3, %v8967_v46  ;;  %v8938_v46 = vor.u32 %v9964_v41, %v8935_v35 }
 0x2e6   :  { %6103 = vmatpush.bf16.msra.mxu0 %v8890_v49  ;;  %6069 = vmatmul.bf16.vlgmr.msrb.gmra.mxu1 %v11285_v47  ;;  %v5819_v49 = vadd.f32 %v5818_v58, %v5805_v32  ;;  %v9098_v16 = vor.u32 %v10004_v56, %v9095_v1  ;;  %v10000_v58 = vld [vmem:[#allocation7 + $0x26c] sm:$0xf]  ;;  %v9063_v26 = vld [vmem:[#allocation7 + $0x258] sm:$0xf0] }
 0x2e7   :  { %6117 = vmatpush.bf16.msra.mxu1 %v9018_v34  ;;  %6083 = vmatmul.bf16.vlgmr.msrb.gmra.mxu2 %v11283_v12  ;;  %v10036_v34 = vld [vmem:[#allocation7 + $0x38c] sm:$0xf]  ;;  %v9191_v51 = vld [vmem:[#allocation7 + $0x358] sm:$0xf0] }
 0x2e8   :  { %6131 = vmatpush.bf16.msra.mxu2 %v9146_v44  ;;  %6097 = vmatmul.bf16.vlgmr.msrb.gmra.mxu3 %v11287_v52  ;;  %v9223_v44 = vld [vmem:[#allocation7 + $0x398] sm:$0xf0]  ;;  %v5833_v62 = vadd.f32 %v5832_v57, %v5819_v49  ;;  %v9996_v32 = vld [vmem:[#allocation7 + $0x24c] sm:$0xf] }
 0x2e9   :  { %6145 = vmatpush.bf16.msra.mxu3 %v9274_v36  ;;  %v5793_v36 = vadd.f32 %v5792_v19, %v5779_v38  ;;  %v9226_v17 = vor.u32 %v10036_v34, %v9223_v44  ;;  %v9932_v19 = vld [vmem:[#allocation7 + $0x4c] sm:$0xf]  ;;  %v9066_v56 = vor.u32 %v9996_v32, %v9063_v26  ;;  %v8791_v49 = vld [vmem:[#allocation7 + $0x38] sm:$0xf0] }
 0x2ea   :  { %6104 = vmatpush.bf16.msra.mxu0 %v8874_v27  ;;  %v5847_v22 = vadd.f32 %v5846_v30, %v5833_v62  ;;  %v5860_v14 = vpop.f32.mrf.mxu2  ;;  %v5834_v54 = vpop.f32.mrf.mxu0  ;;  %v8810_v3 = vor.u32 %v9932_v19, %v8807_v28  ;;  %v9928_v1 = vld [vmem:[#allocation7 + $0x2c] sm:$0xf]  ;;  %v8919_v44 = vld [vmem:[#allocation7 + $0x138] sm:$0xf0] }
 0x2eb   :  { %6118 = vmatpush.bf16.msra.mxu1 %v9002_v24  ;;  %v5807_v27 = vadd.f32 %v5806_v42, %v5793_v36  ;;  %v9207_v24 = vld [vmem:[#allocation7 + $0x378] sm:$0xf0]  ;;  %v5874_v38 = vpop.f32.mrf.mxu3  ;;  %v9960_v57 = vld [vmem:[#allocation7 + $0x12c] sm:$0xf]  ;;  %v5848_v34 = vpop.f32.mrf.mxu1  ;;  %v8794_v61 = vor.u32 %v9928_v1, %v8791_v49 }
 0x2ec   :  { %6132 = vmatpush.bf16.msra.mxu2 %v9130_v50  ;;  %v8826_v50 = vor.u32 %v9936_v5, %v8823_v11  ;;  %v9210_v25 = vor.u32 %v10032_v9, %v9207_v24  ;;  %v11453_v30 = vld [vmem:[#allocation24_spill] sm:$0xff]  ;;  %v11454_v36 = vld [vmem:[#allocation25_spill] sm:$0xff]  ;;  %v9175_v11 = vld [vmem:[#allocation7 + $0x338] sm:$0xf0]  ;;  %v8922_v9 = vor.u32 %v9960_v57, %v8919_v44 }
 0x2ed   :  { %6146 = vmatpush.bf16.msra.mxu3 %v9258_v45  ;;  %v9082_v45 = vor.u32 %v10000_v58, %v9079_v60  ;;  %v5821_v10 = vadd.f32 %v5820_v59, %v5807_v27  ;;  %v3801_v62 = vadd.f32 %v11454_v36, %v11453_v30  ;;  %v10024_v5 = vld [vmem:[#allocation7 + $0x32c] sm:$0xf]  ;;  %v8775_v6 = vld [vmem:[#allocation7 + $0x18] sm:$0xf0] }
 0x2ee   :  { %6105 = vmatpush.bf16.msra.mxu0 %v8858_v18  ;;  %v5861_v18 = vadd.f32 %v5860_v14, %v5847_v22  ;;  %v9956_v58 = vld [vmem:[#allocation7 + $0x10c] sm:$0xf]  ;;  %v9178_v22 = vor.u32 %v10024_v5, %v9175_v11  ;;  %v9159_v41 = vld [vmem:[#allocation7 + $0x318] sm:$0xf0] }
 0x2ef   :  { %6119 = vmatpush.bf16.msra.mxu1 %v8986_v29  ;;  %v6217_v29 = vperm.slane %v11343_v43, 0  ;;  %v5835_v42 = vadd.f32 %v5834_v54, %v5821_v10  ;;  %v9988_v19 = vld [vmem:[#allocation7 + $0x20c] sm:$0xf]  ;;  %v11455_v35 = vld [vmem:[#allocation26_spill] sm:$0xff] }
 0x2f0   :  { %6133 = vmatpush.bf16.msra.mxu2 %v9114_v8  ;;  %v10028_v8 = vld [vmem:[#allocation7 + $0x34c] sm:$0xf]  ;;  %v9783_v1 = vld [vmem:[#allocation7 + $0x7f8] sm:$0xf0] }
 0x2f1   :  { %6147 = vmatpush.bf16.msra.mxu3 %v9242_v13  ;;  %v5875_v13 = vadd.f32 %v5874_v38, %v5861_v18  ;;  %v9194_v59 = vor.u32 %v10028_v8, %v9191_v51  ;;  %v5849_v27 = vadd.f32 %v5848_v34, %v5835_v42  ;;  %v10020_v28 = vld [vmem:[#allocation7 + $0x30c] sm:$0xf]  ;;  %v9399_v18 = vld [vmem:[#allocation7 + $0x4f8] sm:$0xf0] }
 0x2f2   :  { %6106 = vmatpush.bf16.msra.mxu0 %v8842_v4  ;;  %v9992_v4 = vld [vmem:[#allocation7 + $0x22c] sm:$0xf]  ;;  %v9527_v8 = vld [vmem:[#allocation7 + $0x5f8] sm:$0xf0]  ;;  %v9162_v49 = vor.u32 %v10020_v28, %v9159_v41 }
 0x2f3   :  { %6120 = vmatpush.bf16.msra.mxu1 %v8970_v31  ;;  %v9047_v31 = vld [vmem:[#allocation7 + $0x238] sm:$0xf0]  ;;  %v5876_v26 = vpop.f32.mrf.mxu3  ;;  %v10080_v10 = vld [vmem:[#allocation7 + $0x4ec] sm:$0xf] }
 0x2f4   :  { %6134 = vmatpush.bf16.msra.mxu2 %v9098_v16  ;;  %v6225_v16 = vadd.f32 %v6217_v29, %v5875_v13  ;;  %v9050_v24 = vor.u32 %v9992_v4, %v9047_v31  ;;  %v10112_v54 = vld [vmem:[#allocation7 + $0x5ec] sm:$0xf]  ;;  %v9402_v57 = vor.u32 %v10080_v10, %v9399_v18  ;;  %v9383_v36 = vld [vmem:[#allocation7 + $0x4d8] sm:$0xf0] }
 0x2f5   :  { %6148 = vmatpush.bf16.msra.mxu3 %v9226_v17  ;;  %v9924_v17 = vld [vmem:[#allocation7 + $0xc] sm:$0xf]  ;;  %v9530_v4 = vor.u32 %v10112_v54, %v9527_v8  ;;  %v9511_v5 = vld [vmem:[#allocation7 + $0x5d8] sm:$0xf0] }
 0x2f6   :  { %6107 = vmatpush.bf16.msra.mxu0 %v8826_v50  ;;  %v6233_v60 = vmul.f32 0.1, %v6225_v16  ;;  %v8903_v50 = vld [vmem:[#allocation7 + $0x118] sm:$0xf0]  ;;  %v8778_v38 = vor.u32 %v9924_v17, %v8775_v6  ;;  %v10144_v51 = vld [vmem:[#allocation7 + $0x6ec] sm:$0xf] }
 0x2f7   :  { %6121 = vmatpush.bf16.msra.mxu1 %v8954_v39  ;;  %v5862_v39 = vpop.f32.mrf.mxu2  ;;  %v8906_v42 = vor.u32 %v9956_v58, %v8903_v50  ;;  %v10076_v30 = vld [vmem:[#allocation7 + $0x4cc] sm:$0xf]  ;;  %v9495_v28 = vld [vmem:[#allocation7 + $0x5b8] sm:$0xf0] }
 0x2f8   :  { %6135 = vmatpush.bf16.msra.mxu2 %v9082_v45  ;;  %v9031_v45 = vld [vmem:[#allocation7 + $0x218] sm:$0xf0]  ;;  %v11351_v14 = vmax.f32 %v6225_v16, %v6233_v60  ;;  %v5863_v32 = vadd.f32 %v5862_v39, %v5849_v27  ;;  %v10140_v11 = vld [vmem:[#allocation7 + $0x6cc] sm:$0xf] }
 0x2f9   :  { %6149 = vmatpush.bf16.msra.mxu3 %v9210_v25  ;;  %v3815_v25 = vadd.f32 %v11455_v35, %v3801_v62  ;;  %v9034_v13 = vor.u32 %v9988_v19, %v9031_v45  ;;  %v10108_v62 = vld [vmem:[#allocation7 + $0x5cc] sm:$0xf]  ;;  %v9767_v27 = vld [vmem:[#allocation7 + $0x7d8] sm:$0xf0] }
 0x2fa   :  { %6108 = vmatpush.bf16.msra.mxu0 %v8810_v3  ;;  %v9655_v3 = vld [vmem:[#allocation7 + $0x6f8] sm:$0xf0]  ;;  %6249 = vst [vmem:[#allocation14] sm:$0xff] %v11351_v14  ;;  %v11457_v17 = vld [vmem:[#allocation28_spill] sm:$0xff] }
 0x2fb   :  { %6122 = vmatpush.bf16.msra.mxu1 %v8938_v46  ;;  %v5877_v46 = vadd.f32 %v5876_v26, %v5863_v32  ;;  %v9658_v31 = vor.u32 %v10144_v51, %v9655_v3  ;;  %v10172_v60 = vld [vmem:[#allocation7 + $0x7cc] sm:$0xf]  ;;  %v9623_v35 = vld [vmem:[#allocation7 + $0x6b8] sm:$0xf0] }
 0x2fc   :  { %6136 = vmatpush.bf16.msra.mxu2 %v9066_v56  ;;  %v10176_v56 = vld [vmem:[#allocation7 + $0x7ec] sm:$0xf]  ;;  %v9770_v45 = vor.u32 %v10172_v60, %v9767_v27  ;;  %v9751_v10 = vld [vmem:[#allocation7 + $0x7b8] sm:$0xf0] }
 0x2fd   :  { %6150 = vmatpush.bf16.msra.mxu3 %v9194_v59  ;;  %v11456_v59 = vld [vmem:[#allocation27_spill] sm:$0xff]  ;;  %v6229_v44 = vadd.f32 %v6217_v29, %v5877_v46  ;;  %v9786_v16 = vor.u32 %v10176_v56, %v9783_v1  ;;  %v9386_v29 = vor.u32 %v10076_v30, %v9383_v36  ;;  %v10072_v19 = vld [vmem:[#allocation7 + $0x4ac] sm:$0xf]  ;;  %v11459_v54 = vld [vmem:[#allocation30_spill] sm:$0xff] }
 0x2fe   :  { %6109 = vmatpush.bf16.msra.mxu0 %v8794_v61  ;;  %v3829_v34 = vadd.f32 %v11456_v59, %v3815_v25  ;;  %v9639_v61 = vld [vmem:[#allocation7 + $0x6d8] sm:$0xf0]  ;;  %v10104_v39 = vld [vmem:[#allocation7 + $0x5ac] sm:$0xf] }
 0x2ff   :  { %6123 = vmatpush.bf16.msra.mxu1 %v8922_v9  ;;  %v6237_v58 = vmul.f32 0.1, %v6229_v44  ;;  %v9642_v50 = vor.u32 %v10140_v11, %v9639_v61  ;;  %v10136_v41 = vld [vmem:[#allocation7 + $0x6ac] sm:$0xf]  ;;  %v9351_v3 = vld [vmem:[#allocation7 + $0x498] sm:$0xf0] }
 0x300   :  { %6137 = vmatpush.bf16.msra.mxu2 %v9050_v24  ;;  %v3843_v6 = vadd.f32 %v11457_v17, %v3829_v34  ;;  %v9514_v24 = vor.u32 %v10108_v62, %v9511_v5  ;;  %v11458_v25 = vld [vmem:[#allocation29_spill] sm:$0xff]  ;;  %v9626_v8 = vor.u32 %v10136_v41, %v9623_v35  ;;  %v9735_v1 = vld [vmem:[#allocation7 + $0x798] sm:$0xf0]  ;;  %v11461_v41 = vld [vmem:[#allocation32_spill] sm:$0xff] }
 0x301   :  { %6151 = vmatpush.bf16.msra.mxu3 %v9178_v22  ;;  %v11358_v9 = vmax.f32 %v6229_v44, %v6237_v58  ;;  %v9367_v22 = vld [vmem:[#allocation7 + $0x4b8] sm:$0xf0]  ;;  %v10168_v26 = vld [vmem:[#allocation7 + $0x7ac] sm:$0xf] }
 0x302   :  { %6110 = vmatpush.bf16.msra.mxu0 %v8778_v38  ;;  %v3857_v32 = vadd.f32 %v11458_v25, %v3843_v6  ;;  %v9370_v18 = vor.u32 %v10072_v19, %v9367_v22  ;;  %v9498_v38 = vor.u32 %v10104_v39, %v9495_v28  ;;  %v10068_v51 = vld [vmem:[#allocation7 + $0x48c] sm:$0xf]  ;;  %v9463_v36 = vld [vmem:[#allocation7 + $0x578] sm:$0xf0] }
 0x303   :  { %6124 = vmatpush.bf16.msra.mxu1 %v8906_v42  ;;  %6253 = vst [vmem:[#allocation14 + $0x20] sm:$0xff] %v11358_v9  ;;  %v10100_v46 = vld [vmem:[#allocation7 + $0x58c] sm:$0xf]  ;;  %v9754_v42 = vor.u32 %v10168_v26, %v9751_v10  ;;  %v9719_v61 = vld [vmem:[#allocation7 + $0x778] sm:$0xf0] }
 0x304   :  { %6138 = vmatpush.bf16.msra.mxu2 %v9034_v13  ;;  %v10132_v13 = vld [vmem:[#allocation7 + $0x68c] sm:$0xf]  ;;  %v9319_v27 = vld [vmem:[#allocation7 + $0x458] sm:$0xf0] }
 0x305   :  { %6152 = vmatpush.bf16.msra.mxu3 %v9162_v49  ;;  %6111 = vmatmul.bf16.vlgmr.msra.gmra.mxu0 %v11259_v2  ;;  %v3871_v2 = vadd.f32 %v11459_v54, %v3857_v32  ;;  %v10164_v56 = vld [vmem:[#allocation7 + $0x78c] sm:$0xf]  ;;  %v11460_v49 = vld [vmem:[#allocation31_spill] sm:$0xff] }
 0x306   :  { %6159 = vmatpush.bf16.msrb.mxu0 %v9402_v57  ;;  %6125 = vmatmul.bf16.vlgmr.msra.gmra.mxu1 %v11263_v15  ;;  %v9607_v15 = vld [vmem:[#allocation7 + $0x698] sm:$0xf0]  ;;  %v10064_v44 = vld [vmem:[#allocation7 + $0x46c] sm:$0xf]  ;;  %v9738_v30 = vor.u32 %v10164_v56, %v9735_v1 }
 0x307   :  { %6173 = vmatpush.bf16.msrb.mxu1 %v9530_v4  ;;  %6139 = vmatmul.bf16.vlgmr.msra.gmra.mxu2 %v11261_v40  ;;  %v9479_v40 = vld [vmem:[#allocation7 + $0x598] sm:$0xf0]  ;;  %v3885_v57 = vadd.f32 %v11460_v49, %v3871_v2  ;;  %v9610_v34 = vor.u32 %v10132_v13, %v9607_v15  ;;  %v10128_v62 = vld [vmem:[#allocation7 + $0x66c] sm:$0xf] }
 0x308   :  { %6187 = vmatpush.bf16.msrb.mxu2 %v9658_v31  ;;  %6153 = vmatmul.bf16.vlgmr.msra.gmra.mxu3 %v11269_v48  ;;  %v9354_v48 = vor.u32 %v10068_v51, %v9351_v3  ;;  %v9482_v59 = vor.u32 %v10100_v46, %v9479_v40  ;;  %v9335_v4 = vld [vmem:[#allocation7 + $0x478] sm:$0xf0]  ;;  %v10096_v31 = vld [vmem:[#allocation7 + $0x56c] sm:$0xf]  ;;  %v5888_v51 = vpop.f32.mrf.mxu0  ;;  %v5902_v46 = vpop.f32.mrf.mxu1 }
 0x309   :  { %6201 = vmatpush.bf16.msrb.mxu3 %v9786_v16  ;;  %v9591_v16 = vld [vmem:[#allocation7 + $0x678] sm:$0xf0]  ;;  %v3899_v5 = vadd.f32 %v11185_v23, %v3885_v57  ;;  %v10160_v11 = vld [vmem:[#allocation7 + $0x76c] sm:$0xf]  ;;  %v9338_v17 = vor.u32 %v10064_v44, %v9335_v4  ;;  %v9466_v6 = vor.u32 %v10096_v31, %v9463_v36 }
 0x30a   :  { %6160 = vmatpush.bf16.msrb.mxu0 %v9386_v29  ;;  %v9594_v58 = vor.u32 %v10128_v62, %v9591_v16  ;;  %v10060_v60 = vld [vmem:[#allocation7 + $0x44c] sm:$0xf]  ;;  %v9575_v22 = vld [vmem:[#allocation7 + $0x658] sm:$0xf0] }
 0x30b   :  { %6174 = vmatpush.bf16.msrb.mxu1 %v9514_v24  ;;  %v10092_v29 = vld [vmem:[#allocation7 + $0x54c] sm:$0xf]  ;;  %v9722_v24 = vor.u32 %v10160_v11, %v9719_v61  ;;  %v3913_v39 = vadd.f32 %v11187_v21, %v3899_v5  ;;  %v9703_v23 = vld [vmem:[#allocation7 + $0x758] sm:$0xf0]  ;;  %v9322_v28 = vor.u32 %v10060_v60, %v9319_v27  ;;  %v5916_v5 = vpop.f32.mrf.mxu2  ;;  %v5930_v60 = vpop.f32.mrf.mxu3 }
 0x30c   :  { %6188 = vmatpush.bf16.msrb.mxu2 %v9642_v50  ;;  %v9447_v50 = vld [vmem:[#allocation7 + $0x558] sm:$0xf0]  ;;  %v10124_v19 = vld [vmem:[#allocation7 + $0x64c] sm:$0xf] }
 0x30d   :  { %6202 = vmatpush.bf16.msrb.mxu3 %v9770_v45  ;;  %v10156_v45 = vld [vmem:[#allocation7 + $0x74c] sm:$0xf]  ;;  %v3927_v35 = vadd.f32 %v11461_v41, %v3913_v39  ;;  %v9450_v25 = vor.u32 %v10092_v29, %v9447_v50  ;;  %v9578_v32 = vor.u32 %v10124_v19, %v9575_v22  ;;  %v9303_v10 = vld [vmem:[#allocation7 + $0x438] sm:$0xf0]  ;;  %v10713_v50 = vld [vmem:[#allocation10 + $0x30] sm:$0xff] }
 0x30e   :  { %6161 = vmatpush.bf16.msrb.mxu0 %v9370_v18  ;;  %v10056_v26 = vld [vmem:[#allocation7 + $0x42c] sm:$0xf]  ;;  %v9706_v54 = vor.u32 %v10156_v45, %v9703_v23  ;;  %v9431_v2 = vld [vmem:[#allocation7 + $0x538] sm:$0xf0]  ;;  %v10721_v22 = vld [vmem:[#allocation10 + $0x70] sm:$0xff] }
 0x30f   :  { %6175 = vmatpush.bf16.msrb.mxu1 %v9498_v38  ;;  %v10088_v18 = vld [vmem:[#allocation7 + $0x52c] sm:$0xf]  ;;  %v9687_v3 = vld [vmem:[#allocation7 + $0x738] sm:$0xf0] }
 0x310   :  { %6189 = vmatpush.bf16.msrb.mxu2 %v9626_v8  ;;  %v10120_v38 = vld [vmem:[#allocation7 + $0x62c] sm:$0xf]  ;;  %v9559_v8 = vld [vmem:[#allocation7 + $0x638] sm:$0xf0]  ;;  %v9434_v15 = vor.u32 %v10088_v18, %v9431_v2  ;;  %v5890_v29 = vpop.f32.mrf.mxu0 }
 0x311   :  { %6203 = vmatpush.bf16.msrb.mxu3 %v9754_v42  ;;  %v10152_v21 = vld [vmem:[#allocation7 + $0x72c] sm:$0xf]  ;;  %v9306_v42 = vor.u32 %v10056_v26, %v9303_v10  ;;  %v9562_v56 = vor.u32 %v10120_v38, %v9559_v8  ;;  %v9543_v44 = vld [vmem:[#allocation7 + $0x618] sm:$0xf0] }
 0x312   :  { %6162 = vmatpush.bf16.msrb.mxu0 %v9354_v48  ;;  %v11462_v40 = vld [vmem:[#allocation33_spill] sm:$0xff]  ;;  %v9287_v48 = vld [vmem:[#allocation7 + $0x418] sm:$0xf0]  ;;  %v9690_v57 = vor.u32 %v10152_v21, %v9687_v3 }
 0x313   :  { %6176 = vmatpush.bf16.msrb.mxu1 %v9482_v59  ;;  %v3941_v13 = vadd.f32 %v11462_v40, %v3927_v35  ;;  %v10052_v1 = vld [vmem:[#allocation7 + $0x40c] sm:$0xf]  ;;  %v9415_v59 = vld [vmem:[#allocation7 + $0x518] sm:$0xf0]  ;;  %v5918_v41 = vpop.f32.mrf.mxu2 }
 0x314   :  { %6190 = vmatpush.bf16.msrb.mxu2 %v9610_v34  ;;  %v10084_v49 = vld [vmem:[#allocation7 + $0x50c] sm:$0xf]  ;;  %v9290_v36 = vor.u32 %v10052_v1, %v9287_v48  ;;  %v10714_v61 = vld [vmem:[#allocation10 + $0x38] sm:$0xff]  ;;  %v4025_v1 = vadd.f32 %v11216_v20, %v11214_v7  ;;  %v10715_v7 = vld [vmem:[#allocation10 + $0x40] sm:$0xff] }
 0x315   :  { %6204 = vmatpush.bf16.msrb.mxu3 %v9738_v30  ;;  %v10116_v34 = vld [vmem:[#allocation7 + $0x60c] sm:$0xf]  ;;  %v3955_v4 = vadd.f32 %v11200_v55, %v3941_v13  ;;  %v9671_v30 = vld [vmem:[#allocation7 + $0x718] sm:$0xf0]  ;;  %v9418_v62 = vor.u32 %v10084_v49, %v9415_v59 }
 0x316   :  { %6163 = vmatpush.bf16.msrb.mxu0 %v9338_v17  ;;  %v10148_v31 = vld [vmem:[#allocation7 + $0x70c] sm:$0xf]  ;;  %v9546_v16 = vor.u32 %v10116_v34, %v9543_v44  ;;  %v10722_v27 = vld [vmem:[#allocation10 + $0x78] sm:$0xff] }
 0x317   :  { %6177 = vmatpush.bf16.msrb.mxu1 %v9466_v6  ;;  %v9674_v11 = vor.u32 %v10148_v31, %v9671_v30  ;;  %v3969_v17 = vadd.f32 %v11202_v53, %v3955_v4  ;;  %v11463_v6 = vld [vmem:[#allocation34_spill] sm:$0xff]  ;;  %v11464_v53 = vld [vmem:[#allocation35_spill] sm:$0xff]  ;;  %v10708_v49 = vld [vmem:[#allocation10 + $0x8] sm:$0xff] }
 0x318   :  { %6191 = vmatpush.bf16.msrb.mxu2 %v9594_v58  ;;  %v5889_v58 = vadd.f32 %v5888_v51, %v11463_v6  ;;  %v10718_v2 = vld [vmem:[#allocation10 + $0x58] sm:$0xff]  ;;  %v10716_v34 = vld [vmem:[#allocation10 + $0x48] sm:$0xff] }
 0x319   :  { %6205 = vmatpush.bf16.msrb.mxu3 %v9722_v24  ;;  %v3983_v55 = vadd.f32 %v11208_v37, %v3969_v17  ;;  %v5904_v24 = vpop.f32.mrf.mxu1  ;;  %v10712_v37 = vld [vmem:[#allocation10 + $0x28] sm:$0xff]  ;;  %v11467_v6 = vld [vmem:[#allocation38_spill] sm:$0xff] }
 0x31a   :  { %6164 = vmatpush.bf16.msrb.mxu0 %v9322_v28  ;;  %v5903_v19 = vadd.f32 %v5902_v46, %v5889_v58  ;;  %v10720_v28 = vld [vmem:[#allocation10 + $0x68] sm:$0xff]  ;;  %v6218_v46 = vperm.slane %v11343_v43, 1 }
 0x31b   :  { %6178 = vmatpush.bf16.msrb.mxu1 %v9450_v25  ;;  %v3997_v39 = vadd.f32 %v11464_v53, %v3983_v55  ;;  %v5932_v25 = vpop.f32.mrf.mxu3  ;;  %v11465_v4 = vld [vmem:[#allocation36_spill] sm:$0xff]  ;;  %v11466_v20 = vld [vmem:[#allocation37_spill] sm:$0xff] }
 0x31c   :  { %6192 = vmatpush.bf16.msrb.mxu2 %v9578_v32  ;;  %v5917_v45 = vadd.f32 %v5916_v5, %v5903_v19  ;;  %v10711_v32 = vld [vmem:[#allocation10 + $0x20] sm:$0xff]  ;;  %v4039_v31 = vadd.f32 %v11465_v4, %v4025_v1  ;;  %v10729_v53 = vld [vmem:[#allocation10 + $0xb0] sm:$0xff] }
 0x31d   :  { %6206 = vmatpush.bf16.msrb.mxu3 %v9706_v54  ;;  %v5891_v23 = vadd.f32 %v5890_v29, %v3997_v39  ;;  %v10710_v54 = vld [vmem:[#allocation10 + $0x18] sm:$0xff]  ;;  %v10707_v5 = vld [vmem:[#allocation10] sm:$0xff]  ;;  %v10728_v39 = vld [vmem:[#allocation10 + $0xa8] sm:$0xff] }
 0x31e   :  { %6165 = vmatpush.bf16.msrb.mxu0 %v9306_v42  ;;  %v5931_v35 = vadd.f32 %v5930_v60, %v5917_v45  ;;  %v10709_v42 = vld [vmem:[#allocation10 + $0x10] sm:$0xff]  ;;  %v6257_v60 = vpack.c.bf16 %v11358_v9, %v11351_v14  ;;  %v11468_v29 = vld [vmem:[#allocation39_spill] sm:$0xff]  ;;  %v11469_v19 = vld [vmem:[#allocation40_spill] sm:$0xff] }
 0x31f   :  { %6179 = vmatpush.bf16.msrb.mxu1 %v9434_v15  ;;  %v10717_v15 = vld [vmem:[#allocation10 + $0x50] sm:$0xff]  ;;  %v10727_v14 = vld [vmem:[#allocation10 + $0xa0] sm:$0xff] }
 0x320   :  { %6193 = vmatpush.bf16.msrb.mxu2 %v9562_v56  ;;  %v11470_v45 = vld [vmem:[#allocation41_spill] sm:$0xff]  ;;  %v11472_v9 = vld [vmem:[#allocation43_spill] sm:$0xff]  ;;  %v11479_v1 = vld [vmem:[#allocation50_spill] sm:$0xff] }
 0x321   :  { %6207 = vmatpush.bf16.msrb.mxu3 %v9690_v57 }
 0x322   :  { %6166 = vmatpush.bf16.msrb.mxu0 %v9290_v36 }
 0x323   :  { %6180 = vmatpush.bf16.msrb.mxu1 %v9418_v62  ;;  %v5958_v26 = vpop.f32.mrf.mxu1 }
 0x324   :  { %6194 = vmatpush.bf16.msrb.mxu2 %v9546_v16  ;;  %v10730_v16 = vld [vmem:[#allocation10 + $0xb8] sm:$0xff] }
 0x325   :  { %6208 = vmatpush.bf16.msrb.mxu3 %v9674_v11  ;;  %6167 = vmatmul.bf16.vlgmr.msrb.gmra.mxu0 %v11281_v63  ;;  %v5944_v63 = vpop.f32.mrf.mxu0 }
 0x326   :  { %6521 = vmatpush.bf16.msra.mxu0 %v10714_v61  ;;  %6181 = vmatmul.bf16.vlgmr.msrb.gmra.mxu1 %v11285_v47  ;;  %v5905_v47 = vadd.f32 %v5904_v24, %v5891_v23  ;;  %v5945_v10 = vadd.f32 %v5944_v63, %v5931_v35  ;;  %v4053_v61 = vadd.f32 %v11466_v20, %v4039_v31  ;;  %v11471_v23 = vld [vmem:[#allocation42_spill] sm:$0xff]  ;;  %v11473_v35 = vld [vmem:[#allocation44_spill] sm:$0xff] }
 0x327   :  { %6535 = vmatpush.bf16.msra.mxu1 %v10722_v27  ;;  %6195 = vmatmul.bf16.vlgmr.msrb.gmra.mxu2 %v11283_v12  ;;  %v10719_v12 = vld [vmem:[#allocation10 + $0x60] sm:$0xff]  ;;  %v10726_v63 = vld [vmem:[#allocation10 + $0x98] sm:$0xff] }
 0x328   :  { %6209 = vmatmul.bf16.vlgmr.msrb.gmra.mxu3 %v11287_v52  ;;  %v5919_v18 = vadd.f32 %v5918_v41, %v5905_v47  ;;  %v5959_v52 = vadd.f32 %v5958_v26, %v5945_v10  ;;  %6549 = vmatpush.bf16.msra.mxu2 %v10730_v16  ;;  %v4067_v58 = vadd.f32 %v11467_v6, %v4053_v61  ;;  %v11474_v47 = vld [vmem:[#allocation45_spill] sm:$0xff] }
 0x32a   :  { %6522 = vmatpush.bf16.msra.mxu0 %v10713_v50  ;;  %v5972_v38 = vpop.f32.mrf.mxu2  ;;  %v5933_v8 = vadd.f32 %v5932_v25, %v5919_v18  ;;  %v4081_v24 = vadd.f32 %v11468_v29, %v4067_v58  ;;  %v11475_v18 = vld [vmem:[#allocation47_spill] sm:$0xff] }
 0x32b   :  { %6536 = vmatpush.bf16.msra.mxu1 %v10721_v22  ;;  %v5973_v51 = vadd.f32 %v5972_v38, %v5959_v52  ;;  %v5986_v3 = vpop.f32.mrf.mxu3  ;;  %v5960_v56 = vpop.f32.mrf.mxu1  ;;  %v11476_v38 = vld [vmem:[#allocation48_spill] sm:$0xff] }
 0x32c   :  { %v4095_v22 = vadd.f32 %v11469_v19, %v4081_v24  ;;  %6550 = vmatpush.bf16.msra.mxu2 %v10729_v53  ;;  %v10738_v53 = vld [vmem:[#allocation10 + $0xf8] sm:$0xff] }
 0x32d   :  { %v5946_v21 = vpop.f32.mrf.mxu0  ;;  %v5987_v13 = vadd.f32 %v5986_v3, %v5973_v51  ;;  %v11477_v51 = vld [vmem:[#allocation46_spill] sm:$0xff]  ;;  %6563 = vmatpush.bf16.msra.mxu3 %v10738_v53 }
 0x32e   :  { %6523 = vmatpush.bf16.msra.mxu0 %v10712_v37  ;;  %v5947_v40 = vadd.f32 %v5946_v21, %v5933_v8  ;;  %v4109_v37 = vadd.f32 %v11470_v45, %v4095_v22 }
 0x32f   :  { %6537 = vmatpush.bf16.msra.mxu1 %v10720_v28  ;;  %v6226_v48 = vadd.f32 %v6218_v46, %v5987_v13 }
 0x330   :  { %v5961_v59 = vadd.f32 %v5960_v56, %v5947_v40  ;;  %v4123_v28 = vadd.f32 %v11471_v23, %v4109_v37  ;;  %6551 = vmatpush.bf16.msra.mxu2 %v10728_v39 }
 0x331   :  { %v6234_v57 = vmul.f32 0.1, %v6226_v48 }
 0x332   :  { %6524 = vmatpush.bf16.msra.mxu0 %v10711_v32  ;;  %v5974_v44 = vpop.f32.mrf.mxu2  ;;  %v4137_v41 = vadd.f32 %v11472_v9, %v4123_v28  ;;  %v10736_v9 = vld [vmem:[#allocation10 + $0xe8] sm:$0xff] }
 0x333   :  { %6538 = vmatpush.bf16.msra.mxu1 %v10719_v12  ;;  %v6242_v30 = vmax.f32 %v6226_v48, %v6234_v57  ;;  %v5975_v36 = vadd.f32 %v5974_v44, %v5961_v59  ;;  %v5988_v62 = vpop.f32.mrf.mxu3  ;;  %v10725_v12 = vld [vmem:[#allocation10 + $0x90] sm:$0xff] }
 0x334   :  { %6552 = vmatpush.bf16.msra.mxu2 %v10727_v14  ;;  %v4151_v25 = vadd.f32 %v11473_v35, %v4137_v41  ;;  %v10737_v14 = vld [vmem:[#allocation10 + $0xf0] sm:$0xff]  ;;  %v10735_v41 = vld [vmem:[#allocation10 + $0xe0] sm:$0xff]  ;;  %v10734_v35 = vld [vmem:[#allocation10 + $0xd8] sm:$0xff] }
 0x335   :  { %6250 = vst [vmem:[#allocation14 + $0x8] sm:$0xff] %v6242_v30  ;;  %v5989_v11 = vadd.f32 %v5988_v62, %v5975_v36  ;;  %6564 = vmatpush.bf16.msra.mxu3 %v10737_v14 }
 0x336   :  { %6525 = vmatpush.bf16.msra.mxu0 %v10710_v54  ;;  %v4165_v10 = vadd.f32 %v11474_v47, %v4151_v25 }
 0x337   :  { %6539 = vmatpush.bf16.msra.mxu1 %v10718_v2  ;;  %v6230_v17 = vadd.f32 %v6218_v46, %v5989_v11  ;;  %v10724_v2 = vld [vmem:[#allocation10 + $0x88] sm:$0xff] }
 0x338   :  { %6553 = vmatpush.bf16.msra.mxu2 %v10726_v63  ;;  %v4179_v54 = vadd.f32 %v11475_v18, %v4165_v10  ;;  %v11478_v46 = vld [vmem:[#allocation49_spill] sm:$0xff] }
 0x339   :  { %v6238_v27 = vmul.f32 0.1, %v6230_v17  ;;  %6565 = vmatpush.bf16.msra.mxu3 %v10736_v9  ;;  %v10733_v63 = vld [vmem:[#allocation10 + $0xd0] sm:$0xff] }
 0x33a   :  { %6526 = vmatpush.bf16.msra.mxu0 %v10709_v42  ;;  %v4193_v8 = vadd.f32 %v11476_v38, %v4179_v54  ;;  %v10731_v54 = vld [vmem:[#allocation10 + $0xc0] sm:$0xff] }
 0x33b   :  { %6540 = vmatpush.bf16.msra.mxu1 %v10717_v15  ;;  %v6246_v55 = vmax.f32 %v6230_v17, %v6238_v27  ;;  %v10723_v15 = vld [vmem:[#allocation10 + $0x80] sm:$0xff]  ;;  %v6219_v17 = vperm.slane %v11343_v43, 2 }
 0x33c   :  { %6554 = vmatpush.bf16.msra.mxu2 %v10725_v12  ;;  %v4207_v42 = vadd.f32 %v11478_v46, %v4193_v8 }
 0x33d   :  { %6254 = vst [vmem:[#allocation14 + $0x28] sm:$0xff] %v6246_v55  ;;  %v6258_v50 = vpack.c.bf16 %v6246_v55, %v6242_v30  ;;  %6566 = vmatpush.bf16.msra.mxu3 %v10735_v41 }
 0x33e   :  { %6527 = vmatpush.bf16.msra.mxu0 %v10708_v49  ;;  %v4221_v48 = vadd.f32 %v11479_v1, %v4207_v42 }
 0x33f   :  { %6541 = vmatpush.bf16.msra.mxu1 %v10716_v34 }
 0x340   :  { %6555 = vmatpush.bf16.msra.mxu2 %v10724_v2 }
 0x341   :  { %6567 = vmatpush.bf16.msra.mxu3 %v10734_v35 }
 0x342   :  { %6528 = vmatpush.bf16.msra.mxu0 %v10707_v5  ;;  %v6000_v32 = vpop.f32.mrf.mxu0 }
 0x343   :  { %6542 = vmatpush.bf16.msra.mxu1 %v10715_v7  ;;  %v6014_v26 = vpop.f32.mrf.mxu1  ;;  %v6001_v21 = vadd.f32 %v6000_v32, %v11477_v51 }
 0x344   :  { %6556 = vmatpush.bf16.msra.mxu2 %v10723_v15 }
 0x345   :  { %6529 = vmatmul.bf16.vlgmr.msra.gmra.mxu0 %v6257_v60  ;;  %v6015_v56 = vadd.f32 %v6014_v26, %v6001_v21  ;;  %6568 = vmatpush.bf16.msra.mxu3 %v10733_v63  ;;  %v10732_v26 = vld [vmem:[#allocation10 + $0xc8] sm:$0xff] }
 0x346   :  { %6543 = vmatmul.bf16.vlgmr.msra.gmra.mxu1 %v6258_v50 }
 0x349   :  { %6569 = vmatpush.bf16.msra.mxu3 %v10732_v26 }
 0x34a   :  { %v6028_v52 = vpop.f32.mrf.mxu2  ;;  %v6002_v40 = vpop.f32.mrf.mxu0 }
 0x34b   :  { %v6042_v3 = vpop.f32.mrf.mxu3  ;;  %v6016_v13 = vpop.f32.mrf.mxu1  ;;  %v6029_v49 = vadd.f32 %v6028_v52, %v6015_v56  ;;  %v6003_v57 = vadd.f32 %v6002_v40, %v4221_v48 }
 0x34d   :  { %v6043_v34 = vadd.f32 %v6042_v3, %v6029_v49  ;;  %v6017_v30 = vadd.f32 %v6016_v13, %v6003_v57  ;;  %6570 = vmatpush.bf16.msra.mxu3 %v10731_v54  ;;  %v6220_v57 = vperm.slane %v11343_v43, 3 }
 0x352   :  { %v6030_v59 = vpop.f32.mrf.mxu2 }
 0x353   :  { %v6044_v44 = vpop.f32.mrf.mxu3  ;;  %v6031_v62 = vadd.f32 %v6030_v59, %v6017_v30 }
 0x355   :  { %v6045_v11 = vadd.f32 %v6044_v44, %v6031_v62 }
 0x362   :  { %v6056_v4 = vpop.f32.mrf.mxu0 }
 0x363   :  { %v6070_v31 = vpop.f32.mrf.mxu1  ;;  %v6057_v36 = vadd.f32 %v6056_v4, %v6043_v34 }
 0x365   :  { %v6071_v16 = vadd.f32 %v6070_v31, %v6057_v36 }
 0x36a   :  { %v6084_v5 = vpop.f32.mrf.mxu2  ;;  %v6058_v20 = vpop.f32.mrf.mxu0 }
 0x36b   :  { %v6085_v7 = vadd.f32 %v6084_v5, %v6071_v16  ;;  %v6098_v61 = vpop.f32.mrf.mxu3  ;;  %v6059_v6 = vadd.f32 %v6058_v20, %v6045_v11  ;;  %v6072_v60 = vpop.f32.mrf.mxu1 }
 0x36d   :  { %v6099_v58 = vadd.f32 %v6098_v61, %v6085_v7  ;;  %v6073_v29 = vadd.f32 %v6072_v60, %v6059_v6  ;;  %v10756_v6 = vld [vmem:[#allocation11 + $0x4] ss:$0 sm:$0xff] }
 0x36f   :  { %v6227_v27 = vadd.f32 %v6219_v17, %v6099_v58 }
 0x371   :  { %v6235_v55 = vmul.f32 0.1, %v6227_v27 }
 0x372   :  { %v6086_v24 = vpop.f32.mrf.mxu2 }
 0x373   :  { %v6243_v50 = vmax.f32 %v6227_v27, %v6235_v55  ;;  %v6087_v19 = vadd.f32 %v6086_v24, %v6073_v29  ;;  %v6100_v22 = vpop.f32.mrf.mxu3 }
 0x375   :  { %6251 = vst [vmem:[#allocation14 + $0x10] sm:$0xff] %v6243_v50  ;;  %v6101_v39 = vadd.f32 %v6100_v22, %v6087_v19 }
 0x377   :  { %v6231_v45 = vadd.f32 %v6219_v17, %v6101_v39 }
 0x379   :  { %v6239_v37 = vmul.f32 0.1, %v6231_v45 }
 0x37b   :  { %v6247_v23 = vmax.f32 %v6231_v45, %v6239_v37 }
 0x37d   :  { %6255 = vst [vmem:[#allocation14 + $0x30] sm:$0xff] %v6247_v23  ;;  %v6259_v28 = vpack.c.bf16 %v6247_v23, %v6243_v50 }
 0x37f   :  { %6557 = vmatmul.bf16.vlgmr.msra.gmra.mxu2 %v6259_v28 }
 0x382   :  { %v6112_v25 = vpop.f32.mrf.mxu0 }
 0x383   :  { %v6126_v32 = vpop.f32.mrf.mxu1  ;;  %v6113_v10 = vadd.f32 %v6112_v25, %v11314_v0 }
 0x385   :  { %v6127_v52 = vadd.f32 %v6126_v32, %v6113_v10 }
 0x38a   :  { %v6140_v47 = vpop.f32.mrf.mxu2  ;;  %v6114_v18 = vpop.f32.mrf.mxu0 }
 0x38b   :  { %v6154_v12 = vpop.f32.mrf.mxu3  ;;  %v6128_v2 = vpop.f32.mrf.mxu1  ;;  %v6141_v38 = vadd.f32 %v6140_v47, %v6127_v52  ;;  %v6115_v8 = vadd.f32 %v6114_v18, %v11319_v33 }
 0x38d   :  { %v6155_v21 = vadd.f32 %v6154_v12, %v6141_v38  ;;  %v6129_v42 = vadd.f32 %v6128_v2, %v6115_v8 }
 0x392   :  { %v6142_v51 = vpop.f32.mrf.mxu2 }
 0x393   :  { %v6156_v3 = vpop.f32.mrf.mxu3  ;;  %v6143_v15 = vadd.f32 %v6142_v51, %v6129_v42 }
 0x395   :  { %v6157_v1 = vadd.f32 %v6156_v3, %v6143_v15 }
 0x3a2   :  { %v6168_v46 = vpop.f32.mrf.mxu0 }
 0x3a3   :  { %v6169_v40 = vadd.f32 %v6168_v46, %v6155_v21  ;;  %v6182_v13 = vpop.f32.mrf.mxu1 }
 0x3a5   :  { %v6183_v56 = vadd.f32 %v6182_v13, %v6169_v40 }
 0x3aa   :  { %v6196_v0 = vpop.f32.mrf.mxu2  ;;  %v6170_v59 = vpop.f32.mrf.mxu0 }
 0x3ab   :  { %v6197_v48 = vadd.f32 %v6196_v0, %v6183_v56  ;;  %v6210_v49 = vpop.f32.mrf.mxu3  ;;  %v6171_v44 = vadd.f32 %v6170_v59, %v6157_v1  ;;  %v6184_v33 = vpop.f32.mrf.mxu1 }
 0x3ad   :  { %v6211_v34 = vadd.f32 %v6210_v49, %v6197_v48  ;;  %v6185_v30 = vadd.f32 %v6184_v33, %v6171_v44 }
 0x3af   :  { %v6228_v4 = vadd.f32 %v6220_v57, %v6211_v34 }
 0x3b1   :  { %v6236_v31 = vmul.f32 0.1, %v6228_v4 }
 0x3b2   :  { %v6198_v36 = vpop.f32.mrf.mxu2 }
 0x3b3   :  { %v6244_v62 = vmax.f32 %v6228_v4, %v6236_v31  ;;  %v6199_v16 = vadd.f32 %v6198_v36, %v6185_v30  ;;  %v6212_v5 = vpop.f32.mrf.mxu3 }
 0x3b5   :  { %6252 = vst [vmem:[#allocation14 + $0x18] sm:$0xff] %v6244_v62  ;;  %v6213_v11 = vadd.f32 %v6212_v5, %v6199_v16 }
 0x3b7   :  { %v6232_v7 = vadd.f32 %v6220_v57, %v6213_v11 }
 0x3b9   :  { %v6240_v20 = vmul.f32 0.1, %v6232_v7 }
 0x3bb   :  { %v6248_v61 = vmax.f32 %v6232_v7, %v6240_v20 }
 0x3bd   :  { %6256 = vst [vmem:[#allocation14 + $0x38] sm:$0xff] %v6248_v61  ;;  %v6260_v17 = vpack.c.bf16 %v6248_v61, %v6244_v62 }
 0x3be   :  { %6604 = dma.vmem_to_hbm [thread:$0]  %s6597_s5, 1024, %s6599_s13, [#allocation15], %s10968_s3, %s10968_s3, %s10969_s22  }
 0x3bf   :  { %6571 = vmatmul.bf16.vlgmr.msra.gmra.mxu3 %v6260_v17 }
 0x3c2   :  { %v6530_v43 = vpop.f32.mrf.mxu0 }
 0x3c3   :  { %v6544_v58 = vpop.f32.mrf.mxu1  ;;  %v6531_v27 = vadd.f32 %v10756_v6, %v6530_v43 }
 0x3c5   :  { %v6545_v55 = vadd.f32 %v6544_v58, %v6531_v27 }
 0x3ca   :  { %v6532_v24 = vpop.f32.mrf.mxu0 }
 0x3cb   :  { %v6546_v22 = vpop.f32.mrf.mxu1  ;;  %v6533_v53 = vadd.f32 %v10756_v6, %v6532_v24 }
 0x3cd   :  { %v6547_v45 = vadd.f32 %v6546_v22, %v6533_v53 }
 0x402   :  { %v6558_v60 = vpop.f32.mrf.mxu2 }
 0x403   :  { %v6559_v29 = vadd.f32 %v6558_v60, %v6545_v55 }
 0x40a   :  { %v6560_v39 = vpop.f32.mrf.mxu2 }
 0x40b   :  { %v6561_v37 = vadd.f32 %v6560_v39, %v6547_v45 }
 0x442   :  { %v6572_v50 = vpop.f32.mrf.mxu3 }
 0x443   :  { %v6573_v19 = vadd.f32 %v6572_v50, %v6559_v29 }
 0x445   :  { %6577 = vst [vmem:[#allocation13] sm:$0xff] %v6573_v19 }
 0x44a   :  { %v6574_v23 = vpop.f32.mrf.mxu3 }
 0x44b   :  { %v6575_v28 = vadd.f32 %v6574_v23, %v6561_v37 }
 0x44d   :  { %6578 = vst [vmem:[#allocation13 + $0x8] sm:$0xff] %v6575_v28 }
 0x44e   :  { %6591 = dma.vmem_to_hbm [thread:$0]  %s6584_s14, 256, %s6586_s16, [#allocation4], %s10976_s17, %s10976_s17, %s10977_s18  }
 0x44f   :  { %10957 = dma.done.wait [#allocation4], 256  }
 0x450   :  { %10958 = vsyncadd [#allocation4], 4294967040 }
 0x451   :  { %10959 = dma.done.wait [#allocation15], 1024  }
 0x452   :  { %10960 = vsyncadd [#allocation15], 4294966272 }
 0x453   :  { %6613 = vsyncpa [#allocation3], 1 }
 0x454   :  { %6614 = vsyncpa [#allocation6], 1 }
 0x455   :  { %6615 = vsyncpa [#allocation9], 1 }
 0x456   :  { %6616 = vsyncpa [#allocation12], 1 }
 0x457   :  { %6617 = vsyncpa [#allocation4], 1 }
 0x458   :  { %6618 = vsyncpa [#allocation15], 1 }

</bundles_post_ra>
